<compile_context>
chip_gen: v7x
topology: tpu7x:2x2x1
jax: 0.10.0
libtpu: 0.0.40
codegen_flags: <defaults>
</compile_context>

<pallas_src>
import functools

import jax
import jax.numpy as jnp
from jax.experimental import pallas as pl
from jax.experimental.pallas import tpu as pltpu


# ----------------------------- small helpers -------------------------------- #

def _silu(x):
    # numerically-stable x * sigmoid(x)
    ex = jnp.exp(-jnp.abs(x))
    sig = jnp.where(x >= 0.0, 1.0 / (1.0 + ex), ex / (1.0 + ex))
    return x * sig


def _softplus(x):
    xc = jnp.minimum(x, 20.0)
    return jnp.where(x > 20.0, x, jnp.log(1.0 + jnp.exp(xc)))


def _matvec_rows(w, x):
    """(O, I) @ (I, N) -> (O, N) via broadcast VPU FMAs (I is tiny; MXU would waste >90%)."""
    acc = w[:, 0:1] * x[0:1, :]
    for i in range(1, w.shape[1]):
        acc = acc + w[:, i:i + 1] * x[i:i + 1, :]
    return acc


def _pad_time(x, left, right, bt):
    """Zero-pad the time-major flat axis by `left`/`right` TIME steps (bt cols each).

    With the time-major flat layout (col = t*bt + b) a single global pad gives
    correct per-time zero padding for every batch element -- no masks, no rolls,
    no per-tap concatenates.
    """
    parts = []
    if left:
        parts.append(jnp.zeros((x.shape[0], left * bt), x.dtype))
    parts.append(x)
    if right:
        parts.append(jnp.zeros((x.shape[0], right * bt), x.dtype))
    return jnp.concatenate(parts, axis=1) if len(parts) > 1 else x


def _full_spec(a):
    # whole-array block, same block for every grid step (no re-fetch)
    return pl.BlockSpec(a.shape, lambda g, _nd=a.ndim: (0,) * _nd)


# ------------------------------ Mamba block --------------------------------- #

def _mamba_block(x, bt, L, wix, wiz, cw, cb, wxdt, wxb, wxc, wdt, bdt,
                 a_neg, dcol, wo):
    """One Mamba block on a (d_model, N) time-major-flat tile; N = L*bt."""
    d_inner, d_conv = cw.shape
    d_state = a_neg.shape[1]
    N = x.shape[-1]

    # input projection (x branch + gate z branch) -- VPU mul-adds
    xin = _matvec_rows(wix, x)                          # (d_inner, N)
    z = _matvec_rows(wiz, x)                            # (d_inner, N)

    # depthwise causal conv1d: one zero-pad + static tap slices, bias + SiLU
    xp = _pad_time(xin, d_conv - 1, 0, bt)              # (d_inner, N + (d_conv-1)*bt)
    xc = cw[:, 0:1] * xp[:, 0:N]
    for k in range(1, d_conv):
        xc = xc + cw[:, k:k + 1] * xp[:, k * bt:k * bt + N]
    xc = _silu(xc + cb)

    # x_proj (dt / B / C) and dt_proj + softplus
    dt_in = _matvec_rows(wxdt, xc)                      # (dt_rank, N)
    Bm = _matvec_rows(wxb, xc)                          # (d_state, N)
    Cm = _matvec_rows(wxc, xc)                          # (d_state, N)
    dt = _softplus(_matvec_rows(wdt, dt_in) + bdt)      # (d_inner, N)

    # hoisted scan coefficients: one big exp / one big product instead of L tiny ones
    dA = jnp.exp(dt[:, None, :] * a_neg[:, :, None])    # (d_inner, d_state, N)
    dBu = (dt * xc)[:, None, :] * Bm[None, :, :]        # (d_inner, d_state, N)

    # selective scan: only the h FMA chain is serial; every per-step operand is a
    # static lane slice of the precomputed dA / dBu tensors.
    # TODO(synk): for large L switch this static unroll to lax.fori_loop / chunked-L.
    h = jnp.zeros((d_inner, d_state, bt), jnp.float32)
    hs = []
    for t in range(L):
        lo = t * bt
        h = dA[:, :, lo:lo + bt] * h + dBu[:, :, lo:lo + bt]
        hs.append(h)
    hfull = jnp.concatenate(hs, axis=2)                 # (d_inner, d_state, N)

    # deferred output reduction: one vectorized sum over d_state after the loop
    y = jnp.sum(hfull * Cm[None, :, :], axis=1) + dcol * xc   # (d_inner, N)

    # gate and output projection
    y = y * _silu(z)
    return _matvec_rows(wo, y)                          # (d_model, N)


# -------------------------------- ResTcn ------------------------------------ #

def _restcn_block(x, bt, w1_ref, b1_ref, w2_ref, b2_ref, wd_ref, bd_ref):
    """Residual TCN block on a (C_in, N) time-major-flat tile -> (H, N)."""
    K, H, c_in = w1_ref.shape
    pad = K // 2
    N = x.shape[-1]

    # conv1: C_in -> H, kernel K, 'same' padding (one pad + static tap slices)
    xp = _pad_time(x, pad, pad, bt)
    h1 = jnp.zeros((H, N), jnp.float32)
    for k in range(K):
        xs = xp[:, k * bt:k * bt + N]                   # time offset k - pad
        wk = w1_ref[k]                                  # (H, C_in)
        for c in range(c_in):
            h1 = h1 + wk[:, c:c + 1] * xs[c:c + 1, :]
    h1 = jnp.maximum(h1 + b1_ref[...], 0.0)
    # TODO(synk): Dropout(conv_p_dropout) omitted -- inference-time identity.

    # conv2: H -> H, kernel K, 'same' padding
    hp = _pad_time(h1, pad, pad, bt)
    h2 = jnp.zeros((H, N), jnp.float32)
    for k in range(K):
        hsh = hp[:, k * bt:k * bt + N]
        wk = w2_ref[k]                                  # (H, H)
        for c in range(H):
            h2 = h2 + wk[:, c:c + 1] * hsh[c:c + 1, :]
    h2 = h2 + b2_ref[...]

    # 1x1 residual projection + ReLU
    res = _matvec_rows(wd_ref[...], x) + bd_ref[...]
    return jnp.maximum(h2 + res, 0.0)


# ------------------------- fused forward kernel ------------------------------ #

def explorer_kernel(x_ref,
                    wix_ref, wiz_ref, cw_ref, cb_ref,
                    wxdt_ref, wxb_ref, wxc_ref, wdt_ref, bdt_ref,
                    a_ref, d_ref, wo_ref,
                    w1_ref, b1_ref, w2_ref, b2_ref, wd_ref, bd_ref,
                    out_ref, *, bt, L):
    n_layers = wix_ref.shape[0]
    x = x_ref[0]                                        # (d_model, N) time-major flat

    # ---- Mamba stack (layer loop unrolled in-kernel) --------------------------
    for li in range(n_layers):
        x = _mamba_block(x, bt, L,
                         wix_ref[li], wiz_ref[li], cw_ref[li], cb_ref[li],
                         wxdt_ref[li], wxb_ref[li], wxc_ref[li],
                         wdt_ref[li], bdt_ref[li],
                         a_ref[li], d_ref[li], wo_ref[li])

    # torch's final x.transpose(-1, -2) is a no-op in this channel-major layout.
    # ---- ResTcn head ------------------------------------------------------------
    # Store in the natural (H, N) layout; lane width N = L*Bt becomes >=128 (and
    # hence unmasked) at production sequence lengths. Un-tiling is wrapper plumbing.
    out_ref[0] = _restcn_block(x, bt, w1_ref, b1_ref, w2_ref, b2_ref, wd_ref, bd_ref)


# ----------------------------- parameters ------------------------------------ #

def init_explorer_params(seed, d_model, d_state, n_layers,
                         d_conv=4, expand=2, tcn_hidden=8, tcn_kernel=3):
    key = jax.random.PRNGKey(seed)
    d_inner = expand * d_model
    dt_rank = max(1, -(-d_model // 16))                 # ceil(d_model / 16)

    layers = []
    for _ in range(n_layers):
        key, *ks = jax.random.split(key, 9)
        layers.append({
            "in_proj_wx": 0.2 * jax.random.normal(ks[0], (d_inner, d_model), jnp.float32),
            "in_proj_wz": 0.2 * jax.random.normal(ks[1], (d_inner, d_model), jnp.float32),
            "conv_w":     0.2 * jax.random.normal(ks[2], (d_inner, d_conv), jnp.float32),
            "conv_b":     jnp.zeros((d_inner, 1), jnp.float32),
            "x_proj_wdt": 0.2 * jax.random.normal(ks[3], (dt_rank, d_inner), jnp.float32),
            "x_proj_wb":  0.2 * jax.random.normal(ks[4], (d_state, d_inner), jnp.float32),
            "x_proj_wc":  0.2 * jax.random.normal(ks[5], (d_state, d_inner), jnp.float32),
            "dt_proj_w":  0.2 * jax.random.normal(ks[6], (d_inner, dt_rank), jnp.float32),
            "dt_proj_b":  0.05 * jnp.ones((d_inner, 1), jnp.float32),
            "A_log": jnp.log(jnp.tile(
                jnp.arange(1, d_state + 1, dtype=jnp.float32)[None, :], (d_inner, 1))),
            "D": jnp.ones((d_inner, 1), jnp.float32),
            "out_proj_w": 0.2 * jax.random.normal(ks[7], (d_model, d_inner), jnp.float32),
        })
    # stack per-layer weights along a leading n_layers axis (kernel indexes [li])
    mamba = {k: jnp.stack([lp[k] for lp in layers], axis=0) for k in layers[0]}

    key, k1, k2, k3 = jax.random.split(key, 4)
    H, K = tcn_hidden, tcn_kernel
    tcn = {
        "w1": 0.2 * jax.random.normal(k1, (K, H, d_model), jnp.float32),
        "b1": jnp.zeros((H, 1), jnp.float32),
        "w2": 0.2 * jax.random.normal(k2, (K, H, H), jnp.float32),
        "b2": jnp.zeros((H, 1), jnp.float32),
        "wd": 0.2 * jax.random.normal(k3, (H, d_model), jnp.float32),
        "bd": jnp.zeros((H, 1), jnp.float32),
    }
    return {"bn_gamma": jnp.ones((1, 1), jnp.float32),
            "bn_beta": jnp.zeros((1, 1), jnp.float32),
            "mamba": mamba, "tcn": tcn}


# ------------------------------- forward ------------------------------------- #

@jax.jit
def explorer_v2_forward(angle, intensity, params):
    B = angle.shape[0]
    angle2 = angle.reshape(B, -1).astype(jnp.float32)
    inten2 = intensity.reshape(B, -1).astype(jnp.float32)
    L = angle2.shape[1]

    # ---- wrapper-side preprocessing (tiny XLA ops / layout plumbing) -----------
    # TODO(synk): sin(deg2rad) kept in plain JAX (sin has no guaranteed Mosaic lowering).
    sin_angle = jnp.sin(jnp.deg2rad(angle2))                         # (B, L)
    # TODO(synk): BatchNorm1d uses batch statistics (training-mode semantics);
    #             stats computed ONCE here instead of per grid program.
    mean = jnp.mean(inten2)
    var = jnp.mean((inten2 - mean) ** 2)
    inten_bn = ((inten2 - mean) * jax.lax.rsqrt(var + 1e-5)
                * params["bn_gamma"][0, 0] + params["bn_beta"][0, 0])  # (B, L)

    x0 = jnp.stack([sin_angle, inten_bn], axis=1)                    # (B, d_model=2, L)
    d_model = x0.shape[1]

    # batch tiling: 2 programs when possible (keeps both v7x TensorCores busy),
    # each program packs Bt = B // G batch rows into the lane axis (time-major flat).
    G = 2 if (B % 2 == 0 and B >= 2) else 1
    Bt = B // G
    N = Bt * L
    x_tiled = (x0.reshape(G, Bt, d_model, L)
                 .transpose(0, 2, 3, 1)
                 .reshape(G, d_model, N))                            # col = t*Bt + b

    m, t = params["mamba"], params["tcn"]
    H = t["w1"].shape[1]
    a_neg = -jnp.exp(m["A_log"])          # hoisted parameter-only transform

    args = (x_tiled,
            m["in_proj_wx"], m["in_proj_wz"], m["conv_w"], m["conv_b"],
            m["x_proj_wdt"], m["x_proj_wb"], m["x_proj_wc"],
            m["dt_proj_w"], m["dt_proj_b"], a_neg, m["D"], m["out_proj_w"],
            t["w1"], t["b1"], t["w2"], t["b2"], t["wd"], t["bd"])

    in_specs = [pl.BlockSpec((1, d_model, N), lambda g: (g, 0, 0))]  # per-tile input
    in_specs += [_full_spec(a) for a in args[1:]]                    # weights: whole

    out_tiled = pl.pallas_call(
        functools.partial(explorer_kernel, bt=Bt, L=L),
        out_shape=jax.ShapeDtypeStruct((G, H, N), jnp.float32),
        grid=(G,),
        in_specs=in_specs,
        out_specs=pl.BlockSpec((1, H, N), lambda g: (g, 0, 0)),
        compiler_params=pltpu.CompilerParams(
            dimension_semantics=("parallel",)),   # v7x megacore splits the 2 tiles
    )(*args)

    # undo the time-major flat packing: (G, H, L*Bt) -> (B, H, L)
    return (out_tiled.reshape(G, H, L, Bt)
                     .transpose(0, 3, 1, 2)
                     .reshape(B, H, L))


if __name__ == "__main__":
    B, L = 2, 16
    d_model, d_state, n_layers = 2, 8, 2      # d_model=2 is forced by the concat in forward()
    conv_p_dropout = 0.1                      # unused at inference

    key = jax.random.PRNGKey(0)
    ka, ki = jax.random.split(key)
    angle = jax.random.uniform(ka, (B, L), jnp.float32, 0.0, 180.0)
    intensity = jax.random.uniform(ki, (B, L), jnp.float32, 0.0, 10.0)

    params = init_explorer_params(0, d_model, d_state, n_layers)

    out = explorer_v2_forward(angle, intensity, params)
    out = jax.block_until_ready(out)

    assert out.shape == (B, 8, L), out.shape
    assert bool(jnp.all(jnp.isfinite(out)))
    print("KERNEL_OK")
</pallas_src>

<mosaic_0001>
module attributes {stable_mosaic.version = 11 : i64} {
  func.func @explorer_kernel(%arg0: i32, %arg1: memref<1x2x16xf32, #tpu.memory_space<vmem>>, %arg2: memref<2x4x2xf32, #tpu.memory_space<vmem>>, %arg3: memref<2x4x2xf32, #tpu.memory_space<vmem>>, %arg4: memref<2x4x4xf32, #tpu.memory_space<vmem>>, %arg5: memref<2x4x1xf32, #tpu.memory_space<vmem>>, %arg6: memref<2x1x4xf32, #tpu.memory_space<vmem>>, %arg7: memref<2x8x4xf32, #tpu.memory_space<vmem>>, %arg8: memref<2x8x4xf32, #tpu.memory_space<vmem>>, %arg9: memref<2x4x1xf32, #tpu.memory_space<vmem>>, %arg10: memref<2x4x1xf32, #tpu.memory_space<vmem>>, %arg11: memref<2x4x8xf32, #tpu.memory_space<vmem>>, %arg12: memref<2x4x1xf32, #tpu.memory_space<vmem>>, %arg13: memref<2x2x4xf32, #tpu.memory_space<vmem>>, %arg14: memref<3x8x2xf32, #tpu.memory_space<vmem>>, %arg15: memref<8x1xf32, #tpu.memory_space<vmem>>, %arg16: memref<3x8x8xf32, #tpu.memory_space<vmem>>, %arg17: memref<8x1xf32, #tpu.memory_space<vmem>>, %arg18: memref<8x2xf32, #tpu.memory_space<vmem>>, %arg19: memref<8x1xf32, #tpu.memory_space<vmem>>, %arg20: memref<1x8x16xf32, #tpu.memory_space<vmem>>) attributes {dimension_semantics = [#tpu.dimension_semantics<parallel>], iteration_bounds = array<i64: 2>, scalar_prefetch = 0 : i64, scratch_operands = 0 : i64, tpu.core_type = #tpu.core_type<tc>, window_params = [{transform_indices = @transform_0, window_bounds = array<i64: 1, 2, 16>}, {pipeline_mode = #tpu.pipeline_mode<synchronous>, transform_indices = @transform_1, window_bounds = array<i64: 2, 4, 2>}, {pipeline_mode = #tpu.pipeline_mode<synchronous>, transform_indices = @transform_2, window_bounds = array<i64: 2, 4, 2>}, {pipeline_mode = #tpu.pipeline_mode<synchronous>, transform_indices = @transform_3, window_bounds = array<i64: 2, 4, 4>}, {pipeline_mode = #tpu.pipeline_mode<synchronous>, transform_indices = @transform_4, window_bounds = array<i64: 2, 4, 1>}, {pipeline_mode = #tpu.pipeline_mode<synchronous>, transform_indices = @transform_5, window_bounds = array<i64: 2, 1, 4>}, {pipeline_mode = #tpu.pipeline_mode<synchronous>, transform_indices = @transform_6, window_bounds = array<i64: 2, 8, 4>}, {pipeline_mode = #tpu.pipeline_mode<synchronous>, transform_indices = @transform_7, window_bounds = array<i64: 2, 8, 4>}, {pipeline_mode = #tpu.pipeline_mode<synchronous>, transform_indices = @transform_8, window_bounds = array<i64: 2, 4, 1>}, {pipeline_mode = #tpu.pipeline_mode<synchronous>, transform_indices = @transform_9, window_bounds = array<i64: 2, 4, 1>}, {pipeline_mode = #tpu.pipeline_mode<synchronous>, transform_indices = @transform_10, window_bounds = array<i64: 2, 4, 8>}, {pipeline_mode = #tpu.pipeline_mode<synchronous>, transform_indices = @transform_11, window_bounds = array<i64: 2, 4, 1>}, {pipeline_mode = #tpu.pipeline_mode<synchronous>, transform_indices = @transform_12, window_bounds = array<i64: 2, 2, 4>}, {pipeline_mode = #tpu.pipeline_mode<synchronous>, transform_indices = @transform_13, window_bounds = array<i64: 3, 8, 2>}, {pipeline_mode = #tpu.pipeline_mode<synchronous>, transform_indices = @transform_14, window_bounds = array<i64: 8, 1>}, {pipeline_mode = #tpu.pipeline_mode<synchronous>, transform_indices = @transform_15, window_bounds = array<i64: 3, 8, 8>}, {pipeline_mode = #tpu.pipeline_mode<synchronous>, transform_indices = @transform_16, window_bounds = array<i64: 8, 1>}, {pipeline_mode = #tpu.pipeline_mode<synchronous>, transform_indices = @transform_17, window_bounds = array<i64: 8, 2>}, {pipeline_mode = #tpu.pipeline_mode<synchronous>, transform_indices = @transform_18, window_bounds = array<i64: 8, 1>}, {transform_indices = @transform_19, window_bounds = array<i64: 1, 8, 16>}]} {
    %c0 = arith.constant 0 : index
    %c0_0 = arith.constant 0 : index
    %c0_1 = arith.constant 0 : index
    %0 = vector.load %arg1[%c0, %c0_0, %c0_1] : memref<1x2x16xf32, #tpu.memory_space<vmem>>, vector<1x2x16xf32>
    %1 = vector.shape_cast %0 : vector<1x2x16xf32> to vector<2x16xf32>
    %c0_2 = arith.constant 0 : index
    %c0_3 = arith.constant 0 : index
    %c0_4 = arith.constant 0 : index
    %2 = vector.load %arg2[%c0_2, %c0_3, %c0_4] : memref<2x4x2xf32, #tpu.memory_space<vmem>>, vector<1x4x2xf32>
    %3 = vector.shape_cast %2 : vector<1x4x2xf32> to vector<4x2xf32>
    %c0_5 = arith.constant 0 : index
    %c0_6 = arith.constant 0 : index
    %c0_7 = arith.constant 0 : index
    %4 = vector.load %arg3[%c0_5, %c0_6, %c0_7] : memref<2x4x2xf32, #tpu.memory_space<vmem>>, vector<1x4x2xf32>
    %5 = vector.shape_cast %4 : vector<1x4x2xf32> to vector<4x2xf32>
    %c0_8 = arith.constant 0 : index
    %c0_9 = arith.constant 0 : index
    %c0_10 = arith.constant 0 : index
    %6 = vector.load %arg4[%c0_8, %c0_9, %c0_10] : memref<2x4x4xf32, #tpu.memory_space<vmem>>, vector<1x4x4xf32>
    %7 = vector.shape_cast %6 : vector<1x4x4xf32> to vector<4x4xf32>
    %c0_11 = arith.constant 0 : index
    %c0_12 = arith.constant 0 : index
    %c0_13 = arith.constant 0 : index
    %8 = vector.load %arg5[%c0_11, %c0_12, %c0_13] : memref<2x4x1xf32, #tpu.memory_space<vmem>>, vector<1x4x1xf32>
    %9 = vector.shape_cast %8 : vector<1x4x1xf32> to vector<4x1xf32>
    %c0_14 = arith.constant 0 : index
    %c0_15 = arith.constant 0 : index
    %c0_16 = arith.constant 0 : index
    %10 = vector.load %arg6[%c0_14, %c0_15, %c0_16] : memref<2x1x4xf32, #tpu.memory_space<vmem>>, vector<1x1x4xf32>
    %11 = vector.shape_cast %10 : vector<1x1x4xf32> to vector<1x4xf32>
    %c0_17 = arith.constant 0 : index
    %c0_18 = arith.constant 0 : index
    %c0_19 = arith.constant 0 : index
    %12 = vector.load %arg7[%c0_17, %c0_18, %c0_19] : memref<2x8x4xf32, #tpu.memory_space<vmem>>, vector<1x8x4xf32>
    %13 = vector.shape_cast %12 : vector<1x8x4xf32> to vector<8x4xf32>
    %c0_20 = arith.constant 0 : index
    %c0_21 = arith.constant 0 : index
    %c0_22 = arith.constant 0 : index
    %14 = vector.load %arg8[%c0_20, %c0_21, %c0_22] : memref<2x8x4xf32, #tpu.memory_space<vmem>>, vector<1x8x4xf32>
    %15 = vector.shape_cast %14 : vector<1x8x4xf32> to vector<8x4xf32>
    %c0_23 = arith.constant 0 : index
    %c0_24 = arith.constant 0 : index
    %c0_25 = arith.constant 0 : index
    %16 = vector.load %arg9[%c0_23, %c0_24, %c0_25] : memref<2x4x1xf32, #tpu.memory_space<vmem>>, vector<1x4x1xf32>
    %17 = vector.shape_cast %16 : vector<1x4x1xf32> to vector<4x1xf32>
    %c0_26 = arith.constant 0 : index
    %c0_27 = arith.constant 0 : index
    %c0_28 = arith.constant 0 : index
    %18 = vector.load %arg10[%c0_26, %c0_27, %c0_28] : memref<2x4x1xf32, #tpu.memory_space<vmem>>, vector<1x4x1xf32>
    %19 = vector.shape_cast %18 : vector<1x4x1xf32> to vector<4x1xf32>
    %c0_29 = arith.constant 0 : index
    %c0_30 = arith.constant 0 : index
    %c0_31 = arith.constant 0 : index
    %20 = vector.load %arg11[%c0_29, %c0_30, %c0_31] : memref<2x4x8xf32, #tpu.memory_space<vmem>>, vector<1x4x8xf32>
    %21 = vector.shape_cast %20 : vector<1x4x8xf32> to vector<4x8xf32>
    %c0_32 = arith.constant 0 : index
    %c0_33 = arith.constant 0 : index
    %c0_34 = arith.constant 0 : index
    %22 = vector.load %arg12[%c0_32, %c0_33, %c0_34] : memref<2x4x1xf32, #tpu.memory_space<vmem>>, vector<1x4x1xf32>
    %23 = vector.shape_cast %22 : vector<1x4x1xf32> to vector<4x1xf32>
    %c0_35 = arith.constant 0 : index
    %c0_36 = arith.constant 0 : index
    %c0_37 = arith.constant 0 : index
    %24 = vector.load %arg13[%c0_35, %c0_36, %c0_37] : memref<2x2x4xf32, #tpu.memory_space<vmem>>, vector<1x2x4xf32>
    %25 = vector.shape_cast %24 : vector<1x2x4xf32> to vector<2x4xf32>
    %26 = vector.extract_strided_slice %3 {offsets = [0, 0], sizes = [4, 1], strides = [1, 1]} : vector<4x2xf32> to vector<4x1xf32>
    %27 = vector.extract_strided_slice %1 {offsets = [0, 0], sizes = [1, 16], strides = [1, 1]} : vector<2x16xf32> to vector<1x16xf32>
    %28 = vector.broadcast %26 : vector<4x1xf32> to vector<4x16xf32>
    %29 = vector.broadcast %27 : vector<1x16xf32> to vector<4x16xf32>
    %30 = arith.mulf %28, %29 : vector<4x16xf32>
    %31 = vector.extract_strided_slice %3 {offsets = [0, 1], sizes = [4, 1], strides = [1, 1]} : vector<4x2xf32> to vector<4x1xf32>
    %32 = vector.extract_strided_slice %1 {offsets = [1, 0], sizes = [1, 16], strides = [1, 1]} : vector<2x16xf32> to vector<1x16xf32>
    %33 = vector.broadcast %31 : vector<4x1xf32> to vector<4x16xf32>
    %34 = vector.broadcast %32 : vector<1x16xf32> to vector<4x16xf32>
    %35 = arith.mulf %33, %34 : vector<4x16xf32>
    %36 = arith.addf %30, %35 : vector<4x16xf32>
    %37 = vector.extract_strided_slice %5 {offsets = [0, 0], sizes = [4, 1], strides = [1, 1]} : vector<4x2xf32> to vector<4x1xf32>
    %38 = vector.extract_strided_slice %1 {offsets = [0, 0], sizes = [1, 16], strides = [1, 1]} : vector<2x16xf32> to vector<1x16xf32>
    %39 = vector.broadcast %37 : vector<4x1xf32> to vector<4x16xf32>
    %40 = vector.broadcast %38 : vector<1x16xf32> to vector<4x16xf32>
    %41 = arith.mulf %39, %40 : vector<4x16xf32>
    %42 = vector.extract_strided_slice %5 {offsets = [0, 1], sizes = [4, 1], strides = [1, 1]} : vector<4x2xf32> to vector<4x1xf32>
    %43 = vector.extract_strided_slice %1 {offsets = [1, 0], sizes = [1, 16], strides = [1, 1]} : vector<2x16xf32> to vector<1x16xf32>
    %44 = vector.broadcast %42 : vector<4x1xf32> to vector<4x16xf32>
    %45 = vector.broadcast %43 : vector<1x16xf32> to vector<4x16xf32>
    %46 = arith.mulf %44, %45 : vector<4x16xf32>
    %47 = arith.addf %41, %46 : vector<4x16xf32>
    %cst = arith.constant 0.000000e+00 : f32
    %48 = vector.broadcast %cst : f32 to vector<4x3xf32>
    %49 = tpu.concatenate %48, %36 in 1 : vector<4x3xf32>, vector<4x16xf32> -> vector<4x19xf32>
    %50 = vector.extract_strided_slice %7 {offsets = [0, 0], sizes = [4, 1], strides = [1, 1]} : vector<4x4xf32> to vector<4x1xf32>
    %51 = vector.extract_strided_slice %49 {offsets = [0, 0], sizes = [4, 16], strides = [1, 1]} : vector<4x19xf32> to vector<4x16xf32>
    %52 = vector.broadcast %50 : vector<4x1xf32> to vector<4x16xf32>
    %53 = arith.mulf %52, %51 : vector<4x16xf32>
    %54 = vector.extract_strided_slice %7 {offsets = [0, 1], sizes = [4, 1], strides = [1, 1]} : vector<4x4xf32> to vector<4x1xf32>
    %55 = vector.extract_strided_slice %49 {offsets = [0, 1], sizes = [4, 16], strides = [1, 1]} : vector<4x19xf32> to vector<4x16xf32>
    %56 = vector.broadcast %54 : vector<4x1xf32> to vector<4x16xf32>
    %57 = arith.mulf %56, %55 : vector<4x16xf32>
    %58 = arith.addf %53, %57 : vector<4x16xf32>
    %59 = vector.extract_strided_slice %7 {offsets = [0, 2], sizes = [4, 1], strides = [1, 1]} : vector<4x4xf32> to vector<4x1xf32>
    %60 = vector.extract_strided_slice %49 {offsets = [0, 2], sizes = [4, 16], strides = [1, 1]} : vector<4x19xf32> to vector<4x16xf32>
    %61 = vector.broadcast %59 : vector<4x1xf32> to vector<4x16xf32>
    %62 = arith.mulf %61, %60 : vector<4x16xf32>
    %63 = arith.addf %58, %62 : vector<4x16xf32>
    %64 = vector.extract_strided_slice %7 {offsets = [0, 3], sizes = [4, 1], strides = [1, 1]} : vector<4x4xf32> to vector<4x1xf32>
    %65 = vector.extract_strided_slice %49 {offsets = [0, 3], sizes = [4, 16], strides = [1, 1]} : vector<4x19xf32> to vector<4x16xf32>
    %66 = vector.broadcast %64 : vector<4x1xf32> to vector<4x16xf32>
    %67 = arith.mulf %66, %65 : vector<4x16xf32>
    %68 = arith.addf %63, %67 : vector<4x16xf32>
    %69 = vector.broadcast %9 : vector<4x1xf32> to vector<4x16xf32>
    %70 = arith.addf %68, %69 : vector<4x16xf32>
    %71 = math.absf %70 : vector<4x16xf32>
    %cst_38 = arith.constant 0.000000e+00 : f32
    %72 = vector.broadcast %cst_38 : f32 to vector<4x16xf32>
    %73 = arith.subf %72, %71 : vector<4x16xf32>
    %74 = math.exp %73 : vector<4x16xf32>
    %cst_39 = arith.constant 0.000000e+00 : f32
    %75 = vector.broadcast %cst_39 : f32 to vector<4x16xf32>
    %76 = arith.cmpf oge, %70, %75 : vector<4x16xf32>
    %cst_40 = arith.constant 1.000000e+00 : f32
    %77 = vector.broadcast %cst_40 : f32 to vector<4x16xf32>
    %78 = arith.addf %77, %74 : vector<4x16xf32>
    %cst_41 = arith.constant 1.000000e+00 : f32
    %79 = vector.broadcast %cst_41 : f32 to vector<4x16xf32>
    %80 = arith.divf %79, %78 : vector<4x16xf32>
    %cst_42 = arith.constant 1.000000e+00 : f32
    %81 = vector.broadcast %cst_42 : f32 to vector<4x16xf32>
    %82 = arith.addf %81, %74 : vector<4x16xf32>
    %83 = arith.divf %74, %82 : vector<4x16xf32>
    %84 = arith.select %76, %80, %83 : vector<4x16xi1>, vector<4x16xf32>
    %85 = arith.mulf %70, %84 : vector<4x16xf32>
    %86 = vector.extract_strided_slice %11 {offsets = [0, 0], sizes = [1, 1], strides = [1, 1]} : vector<1x4xf32> to vector<1x1xf32>
    %87 = vector.extract_strided_slice %85 {offsets = [0, 0], sizes = [1, 16], strides = [1, 1]} : vector<4x16xf32> to vector<1x16xf32>
    %88 = vector.broadcast %86 : vector<1x1xf32> to vector<1x16xf32>
    %89 = arith.mulf %88, %87 : vector<1x16xf32>
    %90 = vector.extract_strided_slice %11 {offsets = [0, 1], sizes = [1, 1], strides = [1, 1]} : vector<1x4xf32> to vector<1x1xf32>
    %91 = vector.extract_strided_slice %85 {offsets = [1, 0], sizes = [1, 16], strides = [1, 1]} : vector<4x16xf32> to vector<1x16xf32>
    %92 = vector.broadcast %90 : vector<1x1xf32> to vector<1x16xf32>
    %93 = arith.mulf %92, %91 : vector<1x16xf32>
    %94 = arith.addf %89, %93 : vector<1x16xf32>
    %95 = vector.extract_strided_slice %11 {offsets = [0, 2], sizes = [1, 1], strides = [1, 1]} : vector<1x4xf32> to vector<1x1xf32>
    %96 = vector.extract_strided_slice %85 {offsets = [2, 0], sizes = [1, 16], strides = [1, 1]} : vector<4x16xf32> to vector<1x16xf32>
    %97 = vector.broadcast %95 : vector<1x1xf32> to vector<1x16xf32>
    %98 = arith.mulf %97, %96 : vector<1x16xf32>
    %99 = arith.addf %94, %98 : vector<1x16xf32>
    %100 = vector.extract_strided_slice %11 {offsets = [0, 3], sizes = [1, 1], strides = [1, 1]} : vector<1x4xf32> to vector<1x1xf32>
    %101 = vector.extract_strided_slice %85 {offsets = [3, 0], sizes = [1, 16], strides = [1, 1]} : vector<4x16xf32> to vector<1x16xf32>
    %102 = vector.broadcast %100 : vector<1x1xf32> to vector<1x16xf32>
    %103 = arith.mulf %102, %101 : vector<1x16xf32>
    %104 = arith.addf %99, %103 : vector<1x16xf32>
    %105 = vector.extract_strided_slice %13 {offsets = [0, 0], sizes = [8, 1], strides = [1, 1]} : vector<8x4xf32> to vector<8x1xf32>
    %106 = vector.extract_strided_slice %85 {offsets = [0, 0], sizes = [1, 16], strides = [1, 1]} : vector<4x16xf32> to vector<1x16xf32>
    %107 = vector.broadcast %105 : vector<8x1xf32> to vector<8x16xf32>
    %108 = vector.broadcast %106 : vector<1x16xf32> to vector<8x16xf32>
    %109 = arith.mulf %107, %108 : vector<8x16xf32>
    %110 = vector.extract_strided_slice %13 {offsets = [0, 1], sizes = [8, 1], strides = [1, 1]} : vector<8x4xf32> to vector<8x1xf32>
    %111 = vector.extract_strided_slice %85 {offsets = [1, 0], sizes = [1, 16], strides = [1, 1]} : vector<4x16xf32> to vector<1x16xf32>
    %112 = vector.broadcast %110 : vector<8x1xf32> to vector<8x16xf32>
    %113 = vector.broadcast %111 : vector<1x16xf32> to vector<8x16xf32>
    %114 = arith.mulf %112, %113 : vector<8x16xf32>
    %115 = arith.addf %109, %114 : vector<8x16xf32>
    %116 = vector.extract_strided_slice %13 {offsets = [0, 2], sizes = [8, 1], strides = [1, 1]} : vector<8x4xf32> to vector<8x1xf32>
    %117 = vector.extract_strided_slice %85 {offsets = [2, 0], sizes = [1, 16], strides = [1, 1]} : vector<4x16xf32> to vector<1x16xf32>
    %118 = vector.broadcast %116 : vector<8x1xf32> to vector<8x16xf32>
    %119 = vector.broadcast %117 : vector<1x16xf32> to vector<8x16xf32>
    %120 = arith.mulf %118, %119 : vector<8x16xf32>
    %121 = arith.addf %115, %120 : vector<8x16xf32>
    %122 = vector.extract_strided_slice %13 {offsets = [0, 3], sizes = [8, 1], strides = [1, 1]} : vector<8x4xf32> to vector<8x1xf32>
    %123 = vector.extract_strided_slice %85 {offsets = [3, 0], sizes = [1, 16], strides = [1, 1]} : vector<4x16xf32> to vector<1x16xf32>
    %124 = vector.broadcast %122 : vector<8x1xf32> to vector<8x16xf32>
    %125 = vector.broadcast %123 : vector<1x16xf32> to vector<8x16xf32>
    %126 = arith.mulf %124, %125 : vector<8x16xf32>
    %127 = arith.addf %121, %126 : vector<8x16xf32>
    %128 = vector.extract_strided_slice %15 {offsets = [0, 0], sizes = [8, 1], strides = [1, 1]} : vector<8x4xf32> to vector<8x1xf32>
    %129 = vector.extract_strided_slice %85 {offsets = [0, 0], sizes = [1, 16], strides = [1, 1]} : vector<4x16xf32> to vector<1x16xf32>
    %130 = vector.broadcast %128 : vector<8x1xf32> to vector<8x16xf32>
    %131 = vector.broadcast %129 : vector<1x16xf32> to vector<8x16xf32>
    %132 = arith.mulf %130, %131 : vector<8x16xf32>
    %133 = vector.extract_strided_slice %15 {offsets = [0, 1], sizes = [8, 1], strides = [1, 1]} : vector<8x4xf32> to vector<8x1xf32>
    %134 = vector.extract_strided_slice %85 {offsets = [1, 0], sizes = [1, 16], strides = [1, 1]} : vector<4x16xf32> to vector<1x16xf32>
    %135 = vector.broadcast %133 : vector<8x1xf32> to vector<8x16xf32>
    %136 = vector.broadcast %134 : vector<1x16xf32> to vector<8x16xf32>
    %137 = arith.mulf %135, %136 : vector<8x16xf32>
    %138 = arith.addf %132, %137 : vector<8x16xf32>
    %139 = vector.extract_strided_slice %15 {offsets = [0, 2], sizes = [8, 1], strides = [1, 1]} : vector<8x4xf32> to vector<8x1xf32>
    %140 = vector.extract_strided_slice %85 {offsets = [2, 0], sizes = [1, 16], strides = [1, 1]} : vector<4x16xf32> to vector<1x16xf32>
    %141 = vector.broadcast %139 : vector<8x1xf32> to vector<8x16xf32>
    %142 = vector.broadcast %140 : vector<1x16xf32> to vector<8x16xf32>
    %143 = arith.mulf %141, %142 : vector<8x16xf32>
    %144 = arith.addf %138, %143 : vector<8x16xf32>
    %145 = vector.extract_strided_slice %15 {offsets = [0, 3], sizes = [8, 1], strides = [1, 1]} : vector<8x4xf32> to vector<8x1xf32>
    %146 = vector.extract_strided_slice %85 {offsets = [3, 0], sizes = [1, 16], strides = [1, 1]} : vector<4x16xf32> to vector<1x16xf32>
    %147 = vector.broadcast %145 : vector<8x1xf32> to vector<8x16xf32>
    %148 = vector.broadcast %146 : vector<1x16xf32> to vector<8x16xf32>
    %149 = arith.mulf %147, %148 : vector<8x16xf32>
    %150 = arith.addf %144, %149 : vector<8x16xf32>
    %151 = vector.broadcast %17 : vector<4x1xf32> to vector<4x16xf32>
    %152 = vector.broadcast %104 : vector<1x16xf32> to vector<4x16xf32>
    %153 = arith.mulf %151, %152 : vector<4x16xf32>
    %154 = vector.broadcast %19 : vector<4x1xf32> to vector<4x16xf32>
    %155 = arith.addf %153, %154 : vector<4x16xf32>
    %cst_43 = arith.constant 2.000000e+01 : f32
    %156 = vector.broadcast %cst_43 : f32 to vector<4x16xf32>
    %157 = arith.minimumf %155, %156 : vector<4x16xf32>
    %cst_44 = arith.constant 2.000000e+01 : f32
    %158 = vector.broadcast %cst_44 : f32 to vector<4x16xf32>
    %159 = arith.cmpf ogt, %155, %158 : vector<4x16xf32>
    %160 = math.exp %157 : vector<4x16xf32>
    %cst_45 = arith.constant 1.000000e+00 : f32
    %161 = vector.broadcast %cst_45 : f32 to vector<4x16xf32>
    %162 = arith.addf %161, %160 : vector<4x16xf32>
    %163 = math.log %162 : vector<4x16xf32>
    %164 = arith.select %159, %155, %163 : vector<4x16xi1>, vector<4x16xf32>
    %165 = vector.shape_cast %164 : vector<4x16xf32> to vector<4x1x16xf32>
    %166 = vector.shape_cast %21 : vector<4x8xf32> to vector<4x8x1xf32>
    %167 = vector.broadcast %165 : vector<4x1x16xf32> to vector<4x8x16xf32>
    %168 = vector.broadcast %166 : vector<4x8x1xf32> to vector<4x8x16xf32>
    %169 = arith.mulf %167, %168 : vector<4x8x16xf32>
    %170 = math.exp %169 : vector<4x8x16xf32>
    %171 = arith.mulf %164, %85 : vector<4x16xf32>
    %172 = vector.shape_cast %171 : vector<4x16xf32> to vector<4x1x16xf32>
    %173 = vector.shape_cast %127 : vector<8x16xf32> to vector<1x8x16xf32>
    %174 = vector.broadcast %172 : vector<4x1x16xf32> to vector<4x8x16xf32>
    %175 = vector.broadcast %173 : vector<1x8x16xf32> to vector<4x8x16xf32>
    %176 = arith.mulf %174, %175 : vector<4x8x16xf32>
    %cst_46 = arith.constant 0.000000e+00 : f32
    %177 = vector.broadcast %cst_46 : f32 to vector<4x8x1xf32>
    %178 = vector.extract_strided_slice %170 {offsets = [0, 0, 0], sizes = [4, 8, 1], strides = [1, 1, 1]} : vector<4x8x16xf32> to vector<4x8x1xf32>
    %179 = arith.mulf %178, %177 : vector<4x8x1xf32>
    %180 = vector.extract_strided_slice %176 {offsets = [0, 0, 0], sizes = [4, 8, 1], strides = [1, 1, 1]} : vector<4x8x16xf32> to vector<4x8x1xf32>
    %181 = arith.addf %179, %180 : vector<4x8x1xf32>
    %182 = vector.extract_strided_slice %170 {offsets = [0, 0, 1], sizes = [4, 8, 1], strides = [1, 1, 1]} : vector<4x8x16xf32> to vector<4x8x1xf32>
    %183 = arith.mulf %182, %181 : vector<4x8x1xf32>
    %184 = vector.extract_strided_slice %176 {offsets = [0, 0, 1], sizes = [4, 8, 1], strides = [1, 1, 1]} : vector<4x8x16xf32> to vector<4x8x1xf32>
    %185 = arith.addf %183, %184 : vector<4x8x1xf32>
    %186 = vector.extract_strided_slice %170 {offsets = [0, 0, 2], sizes = [4, 8, 1], strides = [1, 1, 1]} : vector<4x8x16xf32> to vector<4x8x1xf32>
    %187 = arith.mulf %186, %185 : vector<4x8x1xf32>
    %188 = vector.extract_strided_slice %176 {offsets = [0, 0, 2], sizes = [4, 8, 1], strides = [1, 1, 1]} : vector<4x8x16xf32> to vector<4x8x1xf32>
    %189 = arith.addf %187, %188 : vector<4x8x1xf32>
    %190 = vector.extract_strided_slice %170 {offsets = [0, 0, 3], sizes = [4, 8, 1], strides = [1, 1, 1]} : vector<4x8x16xf32> to vector<4x8x1xf32>
    %191 = arith.mulf %190, %189 : vector<4x8x1xf32>
    %192 = vector.extract_strided_slice %176 {offsets = [0, 0, 3], sizes = [4, 8, 1], strides = [1, 1, 1]} : vector<4x8x16xf32> to vector<4x8x1xf32>
    %193 = arith.addf %191, %192 : vector<4x8x1xf32>
    %194 = vector.extract_strided_slice %170 {offsets = [0, 0, 4], sizes = [4, 8, 1], strides = [1, 1, 1]} : vector<4x8x16xf32> to vector<4x8x1xf32>
    %195 = arith.mulf %194, %193 : vector<4x8x1xf32>
    %196 = vector.extract_strided_slice %176 {offsets = [0, 0, 4], sizes = [4, 8, 1], strides = [1, 1, 1]} : vector<4x8x16xf32> to vector<4x8x1xf32>
    %197 = arith.addf %195, %196 : vector<4x8x1xf32>
    %198 = vector.extract_strided_slice %170 {offsets = [0, 0, 5], sizes = [4, 8, 1], strides = [1, 1, 1]} : vector<4x8x16xf32> to vector<4x8x1xf32>
    %199 = arith.mulf %198, %197 : vector<4x8x1xf32>
    %200 = vector.extract_strided_slice %176 {offsets = [0, 0, 5], sizes = [4, 8, 1], strides = [1, 1, 1]} : vector<4x8x16xf32> to vector<4x8x1xf32>
    %201 = arith.addf %199, %200 : vector<4x8x1xf32>
    %202 = vector.extract_strided_slice %170 {offsets = [0, 0, 6], sizes = [4, 8, 1], strides = [1, 1, 1]} : vector<4x8x16xf32> to vector<4x8x1xf32>
    %203 = arith.mulf %202, %201 : vector<4x8x1xf32>
    %204 = vector.extract_strided_slice %176 {offsets = [0, 0, 6], sizes = [4, 8, 1], strides = [1, 1, 1]} : vector<4x8x16xf32> to vector<4x8x1xf32>
    %205 = arith.addf %203, %204 : vector<4x8x1xf32>
    %206 = vector.extract_strided_slice %170 {offsets = [0, 0, 7], sizes = [4, 8, 1], strides = [1, 1, 1]} : vector<4x8x16xf32> to vector<4x8x1xf32>
    %207 = arith.mulf %206, %205 : vector<4x8x1xf32>
    %208 = vector.extract_strided_slice %176 {offsets = [0, 0, 7], sizes = [4, 8, 1], strides = [1, 1, 1]} : vector<4x8x16xf32> to vector<4x8x1xf32>
    %209 = arith.addf %207, %208 : vector<4x8x1xf32>
    %210 = vector.extract_strided_slice %170 {offsets = [0, 0, 8], sizes = [4, 8, 1], strides = [1, 1, 1]} : vector<4x8x16xf32> to vector<4x8x1xf32>
    %211 = arith.mulf %210, %209 : vector<4x8x1xf32>
    %212 = vector.extract_strided_slice %176 {offsets = [0, 0, 8], sizes = [4, 8, 1], strides = [1, 1, 1]} : vector<4x8x16xf32> to vector<4x8x1xf32>
    %213 = arith.addf %211, %212 : vector<4x8x1xf32>
    %214 = vector.extract_strided_slice %170 {offsets = [0, 0, 9], sizes = [4, 8, 1], strides = [1, 1, 1]} : vector<4x8x16xf32> to vector<4x8x1xf32>
    %215 = arith.mulf %214, %213 : vector<4x8x1xf32>
    %216 = vector.extract_strided_slice %176 {offsets = [0, 0, 9], sizes = [4, 8, 1], strides = [1, 1, 1]} : vector<4x8x16xf32> to vector<4x8x1xf32>
    %217 = arith.addf %215, %216 : vector<4x8x1xf32>
    %218 = vector.extract_strided_slice %170 {offsets = [0, 0, 10], sizes = [4, 8, 1], strides = [1, 1, 1]} : vector<4x8x16xf32> to vector<4x8x1xf32>
    %219 = arith.mulf %218, %217 : vector<4x8x1xf32>
    %220 = vector.extract_strided_slice %176 {offsets = [0, 0, 10], sizes = [4, 8, 1], strides = [1, 1, 1]} : vector<4x8x16xf32> to vector<4x8x1xf32>
    %221 = arith.addf %219, %220 : vector<4x8x1xf32>
    %222 = vector.extract_strided_slice %170 {offsets = [0, 0, 11], sizes = [4, 8, 1], strides = [1, 1, 1]} : vector<4x8x16xf32> to vector<4x8x1xf32>
    %223 = arith.mulf %222, %221 : vector<4x8x1xf32>
    %224 = vector.extract_strided_slice %176 {offsets = [0, 0, 11], sizes = [4, 8, 1], strides = [1, 1, 1]} : vector<4x8x16xf32> to vector<4x8x1xf32>
    %225 = arith.addf %223, %224 : vector<4x8x1xf32>
    %226 = vector.extract_strided_slice %170 {offsets = [0, 0, 12], sizes = [4, 8, 1], strides = [1, 1, 1]} : vector<4x8x16xf32> to vector<4x8x1xf32>
    %227 = arith.mulf %226, %225 : vector<4x8x1xf32>
    %228 = vector.extract_strided_slice %176 {offsets = [0, 0, 12], sizes = [4, 8, 1], strides = [1, 1, 1]} : vector<4x8x16xf32> to vector<4x8x1xf32>
    %229 = arith.addf %227, %228 : vector<4x8x1xf32>
    %230 = vector.extract_strided_slice %170 {offsets = [0, 0, 13], sizes = [4, 8, 1], strides = [1, 1, 1]} : vector<4x8x16xf32> to vector<4x8x1xf32>
    %231 = arith.mulf %230, %229 : vector<4x8x1xf32>
    %232 = vector.extract_strided_slice %176 {offsets = [0, 0, 13], sizes = [4, 8, 1], strides = [1, 1, 1]} : vector<4x8x16xf32> to vector<4x8x1xf32>
    %233 = arith.addf %231, %232 : vector<4x8x1xf32>
    %234 = vector.extract_strided_slice %170 {offsets = [0, 0, 14], sizes = [4, 8, 1], strides = [1, 1, 1]} : vector<4x8x16xf32> to vector<4x8x1xf32>
    %235 = arith.mulf %234, %233 : vector<4x8x1xf32>
    %236 = vector.extract_strided_slice %176 {offsets = [0, 0, 14], sizes = [4, 8, 1], strides = [1, 1, 1]} : vector<4x8x16xf32> to vector<4x8x1xf32>
    %237 = arith.addf %235, %236 : vector<4x8x1xf32>
    %238 = vector.extract_strided_slice %170 {offsets = [0, 0, 15], sizes = [4, 8, 1], strides = [1, 1, 1]} : vector<4x8x16xf32> to vector<4x8x1xf32>
    %239 = arith.mulf %238, %237 : vector<4x8x1xf32>
    %240 = vector.extract_strided_slice %176 {offsets = [0, 0, 15], sizes = [4, 8, 1], strides = [1, 1, 1]} : vector<4x8x16xf32> to vector<4x8x1xf32>
    %241 = arith.addf %239, %240 : vector<4x8x1xf32>
    %242 = tpu.concatenate %181, %185, %189, %193, %197, %201, %205, %209, %213, %217, %221, %225, %229, %233, %237, %241 in 2 : vector<4x8x1xf32>, vector<4x8x1xf32>, vector<4x8x1xf32>, vector<4x8x1xf32>, vector<4x8x1xf32>, vector<4x8x1xf32>, vector<4x8x1xf32>, vector<4x8x1xf32>, vector<4x8x1xf32>, vector<4x8x1xf32>, vector<4x8x1xf32>, vector<4x8x1xf32>, vector<4x8x1xf32>, vector<4x8x1xf32>, vector<4x8x1xf32>, vector<4x8x1xf32> -> vector<4x8x16xf32>
    %243 = vector.shape_cast %150 : vector<8x16xf32> to vector<1x8x16xf32>
    %244 = vector.broadcast %243 : vector<1x8x16xf32> to vector<4x8x16xf32>
    %245 = arith.mulf %242, %244 : vector<4x8x16xf32>
    %cst_47 = arith.constant dense<0.000000e+00> : vector<4x16xf32>
    %246 = vector.multi_reduction <add>, %245, %cst_47 [1] : vector<4x8x16xf32> to vector<4x16xf32>
    %247 = vector.broadcast %23 : vector<4x1xf32> to vector<4x16xf32>
    %248 = arith.mulf %247, %85 : vector<4x16xf32>
    %249 = arith.addf %246, %248 : vector<4x16xf32>
    %250 = math.absf %47 : vector<4x16xf32>
    %cst_48 = arith.constant 0.000000e+00 : f32
    %251 = vector.broadcast %cst_48 : f32 to vector<4x16xf32>
    %252 = arith.subf %251, %250 : vector<4x16xf32>
    %253 = math.exp %252 : vector<4x16xf32>
    %cst_49 = arith.constant 0.000000e+00 : f32
    %254 = vector.broadcast %cst_49 : f32 to vector<4x16xf32>
    %255 = arith.cmpf oge, %47, %254 : vector<4x16xf32>
    %cst_50 = arith.constant 1.000000e+00 : f32
    %256 = vector.broadcast %cst_50 : f32 to vector<4x16xf32>
    %257 = arith.addf %256, %253 : vector<4x16xf32>
    %cst_51 = arith.constant 1.000000e+00 : f32
    %258 = vector.broadcast %cst_51 : f32 to vector<4x16xf32>
    %259 = arith.divf %258, %257 : vector<4x16xf32>
    %cst_52 = arith.constant 1.000000e+00 : f32
    %260 = vector.broadcast %cst_52 : f32 to vector<4x16xf32>
    %261 = arith.addf %260, %253 : vector<4x16xf32>
    %262 = arith.divf %253, %261 : vector<4x16xf32>
    %263 = arith.select %255, %259, %262 : vector<4x16xi1>, vector<4x16xf32>
    %264 = arith.mulf %47, %263 : vector<4x16xf32>
    %265 = arith.mulf %249, %264 : vector<4x16xf32>
    %266 = vector.extract_strided_slice %25 {offsets = [0, 0], sizes = [2, 1], strides = [1, 1]} : vector<2x4xf32> to vector<2x1xf32>
    %267 = vector.extract_strided_slice %265 {offsets = [0, 0], sizes = [1, 16], strides = [1, 1]} : vector<4x16xf32> to vector<1x16xf32>
    %268 = vector.broadcast %266 : vector<2x1xf32> to vector<2x16xf32>
    %269 = vector.broadcast %267 : vector<1x16xf32> to vector<2x16xf32>
    %270 = arith.mulf %268, %269 : vector<2x16xf32>
    %271 = vector.extract_strided_slice %25 {offsets = [0, 1], sizes = [2, 1], strides = [1, 1]} : vector<2x4xf32> to vector<2x1xf32>
    %272 = vector.extract_strided_slice %265 {offsets = [1, 0], sizes = [1, 16], strides = [1, 1]} : vector<4x16xf32> to vector<1x16xf32>
    %273 = vector.broadcast %271 : vector<2x1xf32> to vector<2x16xf32>
    %274 = vector.broadcast %272 : vector<1x16xf32> to vector<2x16xf32>
    %275 = arith.mulf %273, %274 : vector<2x16xf32>
    %276 = arith.addf %270, %275 : vector<2x16xf32>
    %277 = vector.extract_strided_slice %25 {offsets = [0, 2], sizes = [2, 1], strides = [1, 1]} : vector<2x4xf32> to vector<2x1xf32>
    %278 = vector.extract_strided_slice %265 {offsets = [2, 0], sizes = [1, 16], strides = [1, 1]} : vector<4x16xf32> to vector<1x16xf32>
    %279 = vector.broadcast %277 : vector<2x1xf32> to vector<2x16xf32>
    %280 = vector.broadcast %278 : vector<1x16xf32> to vector<2x16xf32>
    %281 = arith.mulf %279, %280 : vector<2x16xf32>
    %282 = arith.addf %276, %281 : vector<2x16xf32>
    %283 = vector.extract_strided_slice %25 {offsets = [0, 3], sizes = [2, 1], strides = [1, 1]} : vector<2x4xf32> to vector<2x1xf32>
    %284 = vector.extract_strided_slice %265 {offsets = [3, 0], sizes = [1, 16], strides = [1, 1]} : vector<4x16xf32> to vector<1x16xf32>
    %285 = vector.broadcast %283 : vector<2x1xf32> to vector<2x16xf32>
    %286 = vector.broadcast %284 : vector<1x16xf32> to vector<2x16xf32>
    %287 = arith.mulf %285, %286 : vector<2x16xf32>
    %288 = arith.addf %282, %287 : vector<2x16xf32>
    %c1 = arith.constant 1 : index
    %c0_53 = arith.constant 0 : index
    %c0_54 = arith.constant 0 : index
    %289 = vector.load %arg2[%c1, %c0_53, %c0_54] : memref<2x4x2xf32, #tpu.memory_space<vmem>>, vector<1x4x2xf32>
    %290 = vector.shape_cast %289 : vector<1x4x2xf32> to vector<4x2xf32>
    %c1_55 = arith.constant 1 : index
    %c0_56 = arith.constant 0 : index
    %c0_57 = arith.constant 0 : index
    %291 = vector.load %arg3[%c1_55, %c0_56, %c0_57] : memref<2x4x2xf32, #tpu.memory_space<vmem>>, vector<1x4x2xf32>
    %292 = vector.shape_cast %291 : vector<1x4x2xf32> to vector<4x2xf32>
    %c1_58 = arith.constant 1 : index
    %c0_59 = arith.constant 0 : index
    %c0_60 = arith.constant 0 : index
    %293 = vector.load %arg4[%c1_58, %c0_59, %c0_60] : memref<2x4x4xf32, #tpu.memory_space<vmem>>, vector<1x4x4xf32>
    %294 = vector.shape_cast %293 : vector<1x4x4xf32> to vector<4x4xf32>
    %c1_61 = arith.constant 1 : index
    %c0_62 = arith.constant 0 : index
    %c0_63 = arith.constant 0 : index
    %295 = vector.load %arg5[%c1_61, %c0_62, %c0_63] : memref<2x4x1xf32, #tpu.memory_space<vmem>>, vector<1x4x1xf32>
    %296 = vector.shape_cast %295 : vector<1x4x1xf32> to vector<4x1xf32>
    %c1_64 = arith.constant 1 : index
    %c0_65 = arith.constant 0 : index
    %c0_66 = arith.constant 0 : index
    %297 = vector.load %arg6[%c1_64, %c0_65, %c0_66] : memref<2x1x4xf32, #tpu.memory_space<vmem>>, vector<1x1x4xf32>
    %298 = vector.shape_cast %297 : vector<1x1x4xf32> to vector<1x4xf32>
    %c1_67 = arith.constant 1 : index
    %c0_68 = arith.constant 0 : index
    %c0_69 = arith.constant 0 : index
    %299 = vector.load %arg7[%c1_67, %c0_68, %c0_69] : memref<2x8x4xf32, #tpu.memory_space<vmem>>, vector<1x8x4xf32>
    %300 = vector.shape_cast %299 : vector<1x8x4xf32> to vector<8x4xf32>
    %c1_70 = arith.constant 1 : index
    %c0_71 = arith.constant 0 : index
    %c0_72 = arith.constant 0 : index
    %301 = vector.load %arg8[%c1_70, %c0_71, %c0_72] : memref<2x8x4xf32, #tpu.memory_space<vmem>>, vector<1x8x4xf32>
    %302 = vector.shape_cast %301 : vector<1x8x4xf32> to vector<8x4xf32>
    %c1_73 = arith.constant 1 : index
    %c0_74 = arith.constant 0 : index
    %c0_75 = arith.constant 0 : index
    %303 = vector.load %arg9[%c1_73, %c0_74, %c0_75] : memref<2x4x1xf32, #tpu.memory_space<vmem>>, vector<1x4x1xf32>
    %304 = vector.shape_cast %303 : vector<1x4x1xf32> to vector<4x1xf32>
    %c1_76 = arith.constant 1 : index
    %c0_77 = arith.constant 0 : index
    %c0_78 = arith.constant 0 : index
    %305 = vector.load %arg10[%c1_76, %c0_77, %c0_78] : memref<2x4x1xf32, #tpu.memory_space<vmem>>, vector<1x4x1xf32>
    %306 = vector.shape_cast %305 : vector<1x4x1xf32> to vector<4x1xf32>
    %c1_79 = arith.constant 1 : index
    %c0_80 = arith.constant 0 : index
    %c0_81 = arith.constant 0 : index
    %307 = vector.load %arg11[%c1_79, %c0_80, %c0_81] : memref<2x4x8xf32, #tpu.memory_space<vmem>>, vector<1x4x8xf32>
    %308 = vector.shape_cast %307 : vector<1x4x8xf32> to vector<4x8xf32>
    %c1_82 = arith.constant 1 : index
    %c0_83 = arith.constant 0 : index
    %c0_84 = arith.constant 0 : index
    %309 = vector.load %arg12[%c1_82, %c0_83, %c0_84] : memref<2x4x1xf32, #tpu.memory_space<vmem>>, vector<1x4x1xf32>
    %310 = vector.shape_cast %309 : vector<1x4x1xf32> to vector<4x1xf32>
    %c1_85 = arith.constant 1 : index
    %c0_86 = arith.constant 0 : index
    %c0_87 = arith.constant 0 : index
    %311 = vector.load %arg13[%c1_85, %c0_86, %c0_87] : memref<2x2x4xf32, #tpu.memory_space<vmem>>, vector<1x2x4xf32>
    %312 = vector.shape_cast %311 : vector<1x2x4xf32> to vector<2x4xf32>
    %313 = vector.extract_strided_slice %290 {offsets = [0, 0], sizes = [4, 1], strides = [1, 1]} : vector<4x2xf32> to vector<4x1xf32>
    %314 = vector.extract_strided_slice %288 {offsets = [0, 0], sizes = [1, 16], strides = [1, 1]} : vector<2x16xf32> to vector<1x16xf32>
    %315 = vector.broadcast %313 : vector<4x1xf32> to vector<4x16xf32>
    %316 = vector.broadcast %314 : vector<1x16xf32> to vector<4x16xf32>
    %317 = arith.mulf %315, %316 : vector<4x16xf32>
    %318 = vector.extract_strided_slice %290 {offsets = [0, 1], sizes = [4, 1], strides = [1, 1]} : vector<4x2xf32> to vector<4x1xf32>
    %319 = vector.extract_strided_slice %288 {offsets = [1, 0], sizes = [1, 16], strides = [1, 1]} : vector<2x16xf32> to vector<1x16xf32>
    %320 = vector.broadcast %318 : vector<4x1xf32> to vector<4x16xf32>
    %321 = vector.broadcast %319 : vector<1x16xf32> to vector<4x16xf32>
    %322 = arith.mulf %320, %321 : vector<4x16xf32>
    %323 = arith.addf %317, %322 : vector<4x16xf32>
    %324 = vector.extract_strided_slice %292 {offsets = [0, 0], sizes = [4, 1], strides = [1, 1]} : vector<4x2xf32> to vector<4x1xf32>
    %325 = vector.extract_strided_slice %288 {offsets = [0, 0], sizes = [1, 16], strides = [1, 1]} : vector<2x16xf32> to vector<1x16xf32>
    %326 = vector.broadcast %324 : vector<4x1xf32> to vector<4x16xf32>
    %327 = vector.broadcast %325 : vector<1x16xf32> to vector<4x16xf32>
    %328 = arith.mulf %326, %327 : vector<4x16xf32>
    %329 = vector.extract_strided_slice %292 {offsets = [0, 1], sizes = [4, 1], strides = [1, 1]} : vector<4x2xf32> to vector<4x1xf32>
    %330 = vector.extract_strided_slice %288 {offsets = [1, 0], sizes = [1, 16], strides = [1, 1]} : vector<2x16xf32> to vector<1x16xf32>
    %331 = vector.broadcast %329 : vector<4x1xf32> to vector<4x16xf32>
    %332 = vector.broadcast %330 : vector<1x16xf32> to vector<4x16xf32>
    %333 = arith.mulf %331, %332 : vector<4x16xf32>
    %334 = arith.addf %328, %333 : vector<4x16xf32>
    %cst_88 = arith.constant 0.000000e+00 : f32
    %335 = vector.broadcast %cst_88 : f32 to vector<4x3xf32>
    %336 = tpu.concatenate %335, %323 in 1 : vector<4x3xf32>, vector<4x16xf32> -> vector<4x19xf32>
    %337 = vector.extract_strided_slice %294 {offsets = [0, 0], sizes = [4, 1], strides = [1, 1]} : vector<4x4xf32> to vector<4x1xf32>
    %338 = vector.extract_strided_slice %336 {offsets = [0, 0], sizes = [4, 16], strides = [1, 1]} : vector<4x19xf32> to vector<4x16xf32>
    %339 = vector.broadcast %337 : vector<4x1xf32> to vector<4x16xf32>
    %340 = arith.mulf %339, %338 : vector<4x16xf32>
    %341 = vector.extract_strided_slice %294 {offsets = [0, 1], sizes = [4, 1], strides = [1, 1]} : vector<4x4xf32> to vector<4x1xf32>
    %342 = vector.extract_strided_slice %336 {offsets = [0, 1], sizes = [4, 16], strides = [1, 1]} : vector<4x19xf32> to vector<4x16xf32>
    %343 = vector.broadcast %341 : vector<4x1xf32> to vector<4x16xf32>
    %344 = arith.mulf %343, %342 : vector<4x16xf32>
    %345 = arith.addf %340, %344 : vector<4x16xf32>
    %346 = vector.extract_strided_slice %294 {offsets = [0, 2], sizes = [4, 1], strides = [1, 1]} : vector<4x4xf32> to vector<4x1xf32>
    %347 = vector.extract_strided_slice %336 {offsets = [0, 2], sizes = [4, 16], strides = [1, 1]} : vector<4x19xf32> to vector<4x16xf32>
    %348 = vector.broadcast %346 : vector<4x1xf32> to vector<4x16xf32>
    %349 = arith.mulf %348, %347 : vector<4x16xf32>
    %350 = arith.addf %345, %349 : vector<4x16xf32>
    %351 = vector.extract_strided_slice %294 {offsets = [0, 3], sizes = [4, 1], strides = [1, 1]} : vector<4x4xf32> to vector<4x1xf32>
    %352 = vector.extract_strided_slice %336 {offsets = [0, 3], sizes = [4, 16], strides = [1, 1]} : vector<4x19xf32> to vector<4x16xf32>
    %353 = vector.broadcast %351 : vector<4x1xf32> to vector<4x16xf32>
    %354 = arith.mulf %353, %352 : vector<4x16xf32>
    %355 = arith.addf %350, %354 : vector<4x16xf32>
    %356 = vector.broadcast %296 : vector<4x1xf32> to vector<4x16xf32>
    %357 = arith.addf %355, %356 : vector<4x16xf32>
    %358 = math.absf %357 : vector<4x16xf32>
    %cst_89 = arith.constant 0.000000e+00 : f32
    %359 = vector.broadcast %cst_89 : f32 to vector<4x16xf32>
    %360 = arith.subf %359, %358 : vector<4x16xf32>
    %361 = math.exp %360 : vector<4x16xf32>
    %cst_90 = arith.constant 0.000000e+00 : f32
    %362 = vector.broadcast %cst_90 : f32 to vector<4x16xf32>
    %363 = arith.cmpf oge, %357, %362 : vector<4x16xf32>
    %cst_91 = arith.constant 1.000000e+00 : f32
    %364 = vector.broadcast %cst_91 : f32 to vector<4x16xf32>
    %365 = arith.addf %364, %361 : vector<4x16xf32>
    %cst_92 = arith.constant 1.000000e+00 : f32
    %366 = vector.broadcast %cst_92 : f32 to vector<4x16xf32>
    %367 = arith.divf %366, %365 : vector<4x16xf32>
    %cst_93 = arith.constant 1.000000e+00 : f32
    %368 = vector.broadcast %cst_93 : f32 to vector<4x16xf32>
    %369 = arith.addf %368, %361 : vector<4x16xf32>
    %370 = arith.divf %361, %369 : vector<4x16xf32>
    %371 = arith.select %363, %367, %370 : vector<4x16xi1>, vector<4x16xf32>
    %372 = arith.mulf %357, %371 : vector<4x16xf32>
    %373 = vector.extract_strided_slice %298 {offsets = [0, 0], sizes = [1, 1], strides = [1, 1]} : vector<1x4xf32> to vector<1x1xf32>
    %374 = vector.extract_strided_slice %372 {offsets = [0, 0], sizes = [1, 16], strides = [1, 1]} : vector<4x16xf32> to vector<1x16xf32>
    %375 = vector.broadcast %373 : vector<1x1xf32> to vector<1x16xf32>
    %376 = arith.mulf %375, %374 : vector<1x16xf32>
    %377 = vector.extract_strided_slice %298 {offsets = [0, 1], sizes = [1, 1], strides = [1, 1]} : vector<1x4xf32> to vector<1x1xf32>
    %378 = vector.extract_strided_slice %372 {offsets = [1, 0], sizes = [1, 16], strides = [1, 1]} : vector<4x16xf32> to vector<1x16xf32>
    %379 = vector.broadcast %377 : vector<1x1xf32> to vector<1x16xf32>
    %380 = arith.mulf %379, %378 : vector<1x16xf32>
    %381 = arith.addf %376, %380 : vector<1x16xf32>
    %382 = vector.extract_strided_slice %298 {offsets = [0, 2], sizes = [1, 1], strides = [1, 1]} : vector<1x4xf32> to vector<1x1xf32>
    %383 = vector.extract_strided_slice %372 {offsets = [2, 0], sizes = [1, 16], strides = [1, 1]} : vector<4x16xf32> to vector<1x16xf32>
    %384 = vector.broadcast %382 : vector<1x1xf32> to vector<1x16xf32>
    %385 = arith.mulf %384, %383 : vector<1x16xf32>
    %386 = arith.addf %381, %385 : vector<1x16xf32>
    %387 = vector.extract_strided_slice %298 {offsets = [0, 3], sizes = [1, 1], strides = [1, 1]} : vector<1x4xf32> to vector<1x1xf32>
    %388 = vector.extract_strided_slice %372 {offsets = [3, 0], sizes = [1, 16], strides = [1, 1]} : vector<4x16xf32> to vector<1x16xf32>
    %389 = vector.broadcast %387 : vector<1x1xf32> to vector<1x16xf32>
    %390 = arith.mulf %389, %388 : vector<1x16xf32>
    %391 = arith.addf %386, %390 : vector<1x16xf32>
    %392 = vector.extract_strided_slice %300 {offsets = [0, 0], sizes = [8, 1], strides = [1, 1]} : vector<8x4xf32> to vector<8x1xf32>
    %393 = vector.extract_strided_slice %372 {offsets = [0, 0], sizes = [1, 16], strides = [1, 1]} : vector<4x16xf32> to vector<1x16xf32>
    %394 = vector.broadcast %392 : vector<8x1xf32> to vector<8x16xf32>
    %395 = vector.broadcast %393 : vector<1x16xf32> to vector<8x16xf32>
    %396 = arith.mulf %394, %395 : vector<8x16xf32>
    %397 = vector.extract_strided_slice %300 {offsets = [0, 1], sizes = [8, 1], strides = [1, 1]} : vector<8x4xf32> to vector<8x1xf32>
    %398 = vector.extract_strided_slice %372 {offsets = [1, 0], sizes = [1, 16], strides = [1, 1]} : vector<4x16xf32> to vector<1x16xf32>
    %399 = vector.broadcast %397 : vector<8x1xf32> to vector<8x16xf32>
    %400 = vector.broadcast %398 : vector<1x16xf32> to vector<8x16xf32>
    %401 = arith.mulf %399, %400 : vector<8x16xf32>
    %402 = arith.addf %396, %401 : vector<8x16xf32>
    %403 = vector.extract_strided_slice %300 {offsets = [0, 2], sizes = [8, 1], strides = [1, 1]} : vector<8x4xf32> to vector<8x1xf32>
    %404 = vector.extract_strided_slice %372 {offsets = [2, 0], sizes = [1, 16], strides = [1, 1]} : vector<4x16xf32> to vector<1x16xf32>
    %405 = vector.broadcast %403 : vector<8x1xf32> to vector<8x16xf32>
    %406 = vector.broadcast %404 : vector<1x16xf32> to vector<8x16xf32>
    %407 = arith.mulf %405, %406 : vector<8x16xf32>
    %408 = arith.addf %402, %407 : vector<8x16xf32>
    %409 = vector.extract_strided_slice %300 {offsets = [0, 3], sizes = [8, 1], strides = [1, 1]} : vector<8x4xf32> to vector<8x1xf32>
    %410 = vector.extract_strided_slice %372 {offsets = [3, 0], sizes = [1, 16], strides = [1, 1]} : vector<4x16xf32> to vector<1x16xf32>
    %411 = vector.broadcast %409 : vector<8x1xf32> to vector<8x16xf32>
    %412 = vector.broadcast %410 : vector<1x16xf32> to vector<8x16xf32>
    %413 = arith.mulf %411, %412 : vector<8x16xf32>
    %414 = arith.addf %408, %413 : vector<8x16xf32>
    %415 = vector.extract_strided_slice %302 {offsets = [0, 0], sizes = [8, 1], strides = [1, 1]} : vector<8x4xf32> to vector<8x1xf32>
    %416 = vector.extract_strided_slice %372 {offsets = [0, 0], sizes = [1, 16], strides = [1, 1]} : vector<4x16xf32> to vector<1x16xf32>
    %417 = vector.broadcast %415 : vector<8x1xf32> to vector<8x16xf32>
    %418 = vector.broadcast %416 : vector<1x16xf32> to vector<8x16xf32>
    %419 = arith.mulf %417, %418 : vector<8x16xf32>
    %420 = vector.extract_strided_slice %302 {offsets = [0, 1], sizes = [8, 1], strides = [1, 1]} : vector<8x4xf32> to vector<8x1xf32>
    %421 = vector.extract_strided_slice %372 {offsets = [1, 0], sizes = [1, 16], strides = [1, 1]} : vector<4x16xf32> to vector<1x16xf32>
    %422 = vector.broadcast %420 : vector<8x1xf32> to vector<8x16xf32>
    %423 = vector.broadcast %421 : vector<1x16xf32> to vector<8x16xf32>
    %424 = arith.mulf %422, %423 : vector<8x16xf32>
    %425 = arith.addf %419, %424 : vector<8x16xf32>
    %426 = vector.extract_strided_slice %302 {offsets = [0, 2], sizes = [8, 1], strides = [1, 1]} : vector<8x4xf32> to vector<8x1xf32>
    %427 = vector.extract_strided_slice %372 {offsets = [2, 0], sizes = [1, 16], strides = [1, 1]} : vector<4x16xf32> to vector<1x16xf32>
    %428 = vector.broadcast %426 : vector<8x1xf32> to vector<8x16xf32>
    %429 = vector.broadcast %427 : vector<1x16xf32> to vector<8x16xf32>
    %430 = arith.mulf %428, %429 : vector<8x16xf32>
    %431 = arith.addf %425, %430 : vector<8x16xf32>
    %432 = vector.extract_strided_slice %302 {offsets = [0, 3], sizes = [8, 1], strides = [1, 1]} : vector<8x4xf32> to vector<8x1xf32>
    %433 = vector.extract_strided_slice %372 {offsets = [3, 0], sizes = [1, 16], strides = [1, 1]} : vector<4x16xf32> to vector<1x16xf32>
    %434 = vector.broadcast %432 : vector<8x1xf32> to vector<8x16xf32>
    %435 = vector.broadcast %433 : vector<1x16xf32> to vector<8x16xf32>
    %436 = arith.mulf %434, %435 : vector<8x16xf32>
    %437 = arith.addf %431, %436 : vector<8x16xf32>
    %438 = vector.broadcast %304 : vector<4x1xf32> to vector<4x16xf32>
    %439 = vector.broadcast %391 : vector<1x16xf32> to vector<4x16xf32>
    %440 = arith.mulf %438, %439 : vector<4x16xf32>
    %441 = vector.broadcast %306 : vector<4x1xf32> to vector<4x16xf32>
    %442 = arith.addf %440, %441 : vector<4x16xf32>
    %cst_94 = arith.constant 2.000000e+01 : f32
    %443 = vector.broadcast %cst_94 : f32 to vector<4x16xf32>
    %444 = arith.minimumf %442, %443 : vector<4x16xf32>
    %cst_95 = arith.constant 2.000000e+01 : f32
    %445 = vector.broadcast %cst_95 : f32 to vector<4x16xf32>
    %446 = arith.cmpf ogt, %442, %445 : vector<4x16xf32>
    %447 = math.exp %444 : vector<4x16xf32>
    %cst_96 = arith.constant 1.000000e+00 : f32
    %448 = vector.broadcast %cst_96 : f32 to vector<4x16xf32>
    %449 = arith.addf %448, %447 : vector<4x16xf32>
    %450 = math.log %449 : vector<4x16xf32>
    %451 = arith.select %446, %442, %450 : vector<4x16xi1>, vector<4x16xf32>
    %452 = vector.shape_cast %451 : vector<4x16xf32> to vector<4x1x16xf32>
    %453 = vector.shape_cast %308 : vector<4x8xf32> to vector<4x8x1xf32>
    %454 = vector.broadcast %452 : vector<4x1x16xf32> to vector<4x8x16xf32>
    %455 = vector.broadcast %453 : vector<4x8x1xf32> to vector<4x8x16xf32>
    %456 = arith.mulf %454, %455 : vector<4x8x16xf32>
    %457 = math.exp %456 : vector<4x8x16xf32>
    %458 = arith.mulf %451, %372 : vector<4x16xf32>
    %459 = vector.shape_cast %458 : vector<4x16xf32> to vector<4x1x16xf32>
    %460 = vector.shape_cast %414 : vector<8x16xf32> to vector<1x8x16xf32>
    %461 = vector.broadcast %459 : vector<4x1x16xf32> to vector<4x8x16xf32>
    %462 = vector.broadcast %460 : vector<1x8x16xf32> to vector<4x8x16xf32>
    %463 = arith.mulf %461, %462 : vector<4x8x16xf32>
    %cst_97 = arith.constant 0.000000e+00 : f32
    %464 = vector.broadcast %cst_97 : f32 to vector<4x8x1xf32>
    %465 = vector.extract_strided_slice %457 {offsets = [0, 0, 0], sizes = [4, 8, 1], strides = [1, 1, 1]} : vector<4x8x16xf32> to vector<4x8x1xf32>
    %466 = arith.mulf %465, %464 : vector<4x8x1xf32>
    %467 = vector.extract_strided_slice %463 {offsets = [0, 0, 0], sizes = [4, 8, 1], strides = [1, 1, 1]} : vector<4x8x16xf32> to vector<4x8x1xf32>
    %468 = arith.addf %466, %467 : vector<4x8x1xf32>
    %469 = vector.extract_strided_slice %457 {offsets = [0, 0, 1], sizes = [4, 8, 1], strides = [1, 1, 1]} : vector<4x8x16xf32> to vector<4x8x1xf32>
    %470 = arith.mulf %469, %468 : vector<4x8x1xf32>
    %471 = vector.extract_strided_slice %463 {offsets = [0, 0, 1], sizes = [4, 8, 1], strides = [1, 1, 1]} : vector<4x8x16xf32> to vector<4x8x1xf32>
    %472 = arith.addf %470, %471 : vector<4x8x1xf32>
    %473 = vector.extract_strided_slice %457 {offsets = [0, 0, 2], sizes = [4, 8, 1], strides = [1, 1, 1]} : vector<4x8x16xf32> to vector<4x8x1xf32>
    %474 = arith.mulf %473, %472 : vector<4x8x1xf32>
    %475 = vector.extract_strided_slice %463 {offsets = [0, 0, 2], sizes = [4, 8, 1], strides = [1, 1, 1]} : vector<4x8x16xf32> to vector<4x8x1xf32>
    %476 = arith.addf %474, %475 : vector<4x8x1xf32>
    %477 = vector.extract_strided_slice %457 {offsets = [0, 0, 3], sizes = [4, 8, 1], strides = [1, 1, 1]} : vector<4x8x16xf32> to vector<4x8x1xf32>
    %478 = arith.mulf %477, %476 : vector<4x8x1xf32>
    %479 = vector.extract_strided_slice %463 {offsets = [0, 0, 3], sizes = [4, 8, 1], strides = [1, 1, 1]} : vector<4x8x16xf32> to vector<4x8x1xf32>
    %480 = arith.addf %478, %479 : vector<4x8x1xf32>
    %481 = vector.extract_strided_slice %457 {offsets = [0, 0, 4], sizes = [4, 8, 1], strides = [1, 1, 1]} : vector<4x8x16xf32> to vector<4x8x1xf32>
    %482 = arith.mulf %481, %480 : vector<4x8x1xf32>
    %483 = vector.extract_strided_slice %463 {offsets = [0, 0, 4], sizes = [4, 8, 1], strides = [1, 1, 1]} : vector<4x8x16xf32> to vector<4x8x1xf32>
    %484 = arith.addf %482, %483 : vector<4x8x1xf32>
    %485 = vector.extract_strided_slice %457 {offsets = [0, 0, 5], sizes = [4, 8, 1], strides = [1, 1, 1]} : vector<4x8x16xf32> to vector<4x8x1xf32>
    %486 = arith.mulf %485, %484 : vector<4x8x1xf32>
    %487 = vector.extract_strided_slice %463 {offsets = [0, 0, 5], sizes = [4, 8, 1], strides = [1, 1, 1]} : vector<4x8x16xf32> to vector<4x8x1xf32>
    %488 = arith.addf %486, %487 : vector<4x8x1xf32>
    %489 = vector.extract_strided_slice %457 {offsets = [0, 0, 6], sizes = [4, 8, 1], strides = [1, 1, 1]} : vector<4x8x16xf32> to vector<4x8x1xf32>
    %490 = arith.mulf %489, %488 : vector<4x8x1xf32>
    %491 = vector.extract_strided_slice %463 {offsets = [0, 0, 6], sizes = [4, 8, 1], strides = [1, 1, 1]} : vector<4x8x16xf32> to vector<4x8x1xf32>
    %492 = arith.addf %490, %491 : vector<4x8x1xf32>
    %493 = vector.extract_strided_slice %457 {offsets = [0, 0, 7], sizes = [4, 8, 1], strides = [1, 1, 1]} : vector<4x8x16xf32> to vector<4x8x1xf32>
    %494 = arith.mulf %493, %492 : vector<4x8x1xf32>
    %495 = vector.extract_strided_slice %463 {offsets = [0, 0, 7], sizes = [4, 8, 1], strides = [1, 1, 1]} : vector<4x8x16xf32> to vector<4x8x1xf32>
    %496 = arith.addf %494, %495 : vector<4x8x1xf32>
    %497 = vector.extract_strided_slice %457 {offsets = [0, 0, 8], sizes = [4, 8, 1], strides = [1, 1, 1]} : vector<4x8x16xf32> to vector<4x8x1xf32>
    %498 = arith.mulf %497, %496 : vector<4x8x1xf32>
    %499 = vector.extract_strided_slice %463 {offsets = [0, 0, 8], sizes = [4, 8, 1], strides = [1, 1, 1]} : vector<4x8x16xf32> to vector<4x8x1xf32>
    %500 = arith.addf %498, %499 : vector<4x8x1xf32>
    %501 = vector.extract_strided_slice %457 {offsets = [0, 0, 9], sizes = [4, 8, 1], strides = [1, 1, 1]} : vector<4x8x16xf32> to vector<4x8x1xf32>
    %502 = arith.mulf %501, %500 : vector<4x8x1xf32>
    %503 = vector.extract_strided_slice %463 {offsets = [0, 0, 9], sizes = [4, 8, 1], strides = [1, 1, 1]} : vector<4x8x16xf32> to vector<4x8x1xf32>
    %504 = arith.addf %502, %503 : vector<4x8x1xf32>
    %505 = vector.extract_strided_slice %457 {offsets = [0, 0, 10], sizes = [4, 8, 1], strides = [1, 1, 1]} : vector<4x8x16xf32> to vector<4x8x1xf32>
    %506 = arith.mulf %505, %504 : vector<4x8x1xf32>
    %507 = vector.extract_strided_slice %463 {offsets = [0, 0, 10], sizes = [4, 8, 1], strides = [1, 1, 1]} : vector<4x8x16xf32> to vector<4x8x1xf32>
    %508 = arith.addf %506, %507 : vector<4x8x1xf32>
    %509 = vector.extract_strided_slice %457 {offsets = [0, 0, 11], sizes = [4, 8, 1], strides = [1, 1, 1]} : vector<4x8x16xf32> to vector<4x8x1xf32>
    %510 = arith.mulf %509, %508 : vector<4x8x1xf32>
    %511 = vector.extract_strided_slice %463 {offsets = [0, 0, 11], sizes = [4, 8, 1], strides = [1, 1, 1]} : vector<4x8x16xf32> to vector<4x8x1xf32>
    %512 = arith.addf %510, %511 : vector<4x8x1xf32>
    %513 = vector.extract_strided_slice %457 {offsets = [0, 0, 12], sizes = [4, 8, 1], strides = [1, 1, 1]} : vector<4x8x16xf32> to vector<4x8x1xf32>
    %514 = arith.mulf %513, %512 : vector<4x8x1xf32>
    %515 = vector.extract_strided_slice %463 {offsets = [0, 0, 12], sizes = [4, 8, 1], strides = [1, 1, 1]} : vector<4x8x16xf32> to vector<4x8x1xf32>
    %516 = arith.addf %514, %515 : vector<4x8x1xf32>
    %517 = vector.extract_strided_slice %457 {offsets = [0, 0, 13], sizes = [4, 8, 1], strides = [1, 1, 1]} : vector<4x8x16xf32> to vector<4x8x1xf32>
    %518 = arith.mulf %517, %516 : vector<4x8x1xf32>
    %519 = vector.extract_strided_slice %463 {offsets = [0, 0, 13], sizes = [4, 8, 1], strides = [1, 1, 1]} : vector<4x8x16xf32> to vector<4x8x1xf32>
    %520 = arith.addf %518, %519 : vector<4x8x1xf32>
    %521 = vector.extract_strided_slice %457 {offsets = [0, 0, 14], sizes = [4, 8, 1], strides = [1, 1, 1]} : vector<4x8x16xf32> to vector<4x8x1xf32>
    %522 = arith.mulf %521, %520 : vector<4x8x1xf32>
    %523 = vector.extract_strided_slice %463 {offsets = [0, 0, 14], sizes = [4, 8, 1], strides = [1, 1, 1]} : vector<4x8x16xf32> to vector<4x8x1xf32>
    %524 = arith.addf %522, %523 : vector<4x8x1xf32>
    %525 = vector.extract_strided_slice %457 {offsets = [0, 0, 15], sizes = [4, 8, 1], strides = [1, 1, 1]} : vector<4x8x16xf32> to vector<4x8x1xf32>
    %526 = arith.mulf %525, %524 : vector<4x8x1xf32>
    %527 = vector.extract_strided_slice %463 {offsets = [0, 0, 15], sizes = [4, 8, 1], strides = [1, 1, 1]} : vector<4x8x16xf32> to vector<4x8x1xf32>
    %528 = arith.addf %526, %527 : vector<4x8x1xf32>
    %529 = tpu.concatenate %468, %472, %476, %480, %484, %488, %492, %496, %500, %504, %508, %512, %516, %520, %524, %528 in 2 : vector<4x8x1xf32>, vector<4x8x1xf32>, vector<4x8x1xf32>, vector<4x8x1xf32>, vector<4x8x1xf32>, vector<4x8x1xf32>, vector<4x8x1xf32>, vector<4x8x1xf32>, vector<4x8x1xf32>, vector<4x8x1xf32>, vector<4x8x1xf32>, vector<4x8x1xf32>, vector<4x8x1xf32>, vector<4x8x1xf32>, vector<4x8x1xf32>, vector<4x8x1xf32> -> vector<4x8x16xf32>
    %530 = vector.shape_cast %437 : vector<8x16xf32> to vector<1x8x16xf32>
    %531 = vector.broadcast %530 : vector<1x8x16xf32> to vector<4x8x16xf32>
    %532 = arith.mulf %529, %531 : vector<4x8x16xf32>
    %cst_98 = arith.constant dense<0.000000e+00> : vector<4x16xf32>
    %533 = vector.multi_reduction <add>, %532, %cst_98 [1] : vector<4x8x16xf32> to vector<4x16xf32>
    %534 = vector.broadcast %310 : vector<4x1xf32> to vector<4x16xf32>
    %535 = arith.mulf %534, %372 : vector<4x16xf32>
    %536 = arith.addf %533, %535 : vector<4x16xf32>
    %537 = math.absf %334 : vector<4x16xf32>
    %cst_99 = arith.constant 0.000000e+00 : f32
    %538 = vector.broadcast %cst_99 : f32 to vector<4x16xf32>
    %539 = arith.subf %538, %537 : vector<4x16xf32>
    %540 = math.exp %539 : vector<4x16xf32>
    %cst_100 = arith.constant 0.000000e+00 : f32
    %541 = vector.broadcast %cst_100 : f32 to vector<4x16xf32>
    %542 = arith.cmpf oge, %334, %541 : vector<4x16xf32>
    %cst_101 = arith.constant 1.000000e+00 : f32
    %543 = vector.broadcast %cst_101 : f32 to vector<4x16xf32>
    %544 = arith.addf %543, %540 : vector<4x16xf32>
    %cst_102 = arith.constant 1.000000e+00 : f32
    %545 = vector.broadcast %cst_102 : f32 to vector<4x16xf32>
    %546 = arith.divf %545, %544 : vector<4x16xf32>
    %cst_103 = arith.constant 1.000000e+00 : f32
    %547 = vector.broadcast %cst_103 : f32 to vector<4x16xf32>
    %548 = arith.addf %547, %540 : vector<4x16xf32>
    %549 = arith.divf %540, %548 : vector<4x16xf32>
    %550 = arith.select %542, %546, %549 : vector<4x16xi1>, vector<4x16xf32>
    %551 = arith.mulf %334, %550 : vector<4x16xf32>
    %552 = arith.mulf %536, %551 : vector<4x16xf32>
    %553 = vector.extract_strided_slice %312 {offsets = [0, 0], sizes = [2, 1], strides = [1, 1]} : vector<2x4xf32> to vector<2x1xf32>
    %554 = vector.extract_strided_slice %552 {offsets = [0, 0], sizes = [1, 16], strides = [1, 1]} : vector<4x16xf32> to vector<1x16xf32>
    %555 = vector.broadcast %553 : vector<2x1xf32> to vector<2x16xf32>
    %556 = vector.broadcast %554 : vector<1x16xf32> to vector<2x16xf32>
    %557 = arith.mulf %555, %556 : vector<2x16xf32>
    %558 = vector.extract_strided_slice %312 {offsets = [0, 1], sizes = [2, 1], strides = [1, 1]} : vector<2x4xf32> to vector<2x1xf32>
    %559 = vector.extract_strided_slice %552 {offsets = [1, 0], sizes = [1, 16], strides = [1, 1]} : vector<4x16xf32> to vector<1x16xf32>
    %560 = vector.broadcast %558 : vector<2x1xf32> to vector<2x16xf32>
    %561 = vector.broadcast %559 : vector<1x16xf32> to vector<2x16xf32>
    %562 = arith.mulf %560, %561 : vector<2x16xf32>
    %563 = arith.addf %557, %562 : vector<2x16xf32>
    %564 = vector.extract_strided_slice %312 {offsets = [0, 2], sizes = [2, 1], strides = [1, 1]} : vector<2x4xf32> to vector<2x1xf32>
    %565 = vector.extract_strided_slice %552 {offsets = [2, 0], sizes = [1, 16], strides = [1, 1]} : vector<4x16xf32> to vector<1x16xf32>
    %566 = vector.broadcast %564 : vector<2x1xf32> to vector<2x16xf32>
    %567 = vector.broadcast %565 : vector<1x16xf32> to vector<2x16xf32>
    %568 = arith.mulf %566, %567 : vector<2x16xf32>
    %569 = arith.addf %563, %568 : vector<2x16xf32>
    %570 = vector.extract_strided_slice %312 {offsets = [0, 3], sizes = [2, 1], strides = [1, 1]} : vector<2x4xf32> to vector<2x1xf32>
    %571 = vector.extract_strided_slice %552 {offsets = [3, 0], sizes = [1, 16], strides = [1, 1]} : vector<4x16xf32> to vector<1x16xf32>
    %572 = vector.broadcast %570 : vector<2x1xf32> to vector<2x16xf32>
    %573 = vector.broadcast %571 : vector<1x16xf32> to vector<2x16xf32>
    %574 = arith.mulf %572, %573 : vector<2x16xf32>
    %575 = arith.addf %569, %574 : vector<2x16xf32>
    %cst_104 = arith.constant 0.000000e+00 : f32
    %576 = vector.broadcast %cst_104 : f32 to vector<2x1xf32>
    %cst_105 = arith.constant 0.000000e+00 : f32
    %577 = vector.broadcast %cst_105 : f32 to vector<2x1xf32>
    %578 = tpu.concatenate %576, %575, %577 in 1 : vector<2x1xf32>, vector<2x16xf32>, vector<2x1xf32> -> vector<2x18xf32>
    %cst_106 = arith.constant 0.000000e+00 : f32
    %579 = vector.broadcast %cst_106 : f32 to vector<8x16xf32>
    %580 = vector.extract_strided_slice %578 {offsets = [0, 0], sizes = [2, 16], strides = [1, 1]} : vector<2x18xf32> to vector<2x16xf32>
    %c0_107 = arith.constant 0 : index
    %c0_108 = arith.constant 0 : index
    %c0_109 = arith.constant 0 : index
    %581 = vector.load %arg14[%c0_107, %c0_108, %c0_109] : memref<3x8x2xf32, #tpu.memory_space<vmem>>, vector<1x8x2xf32>
    %582 = vector.shape_cast %581 : vector<1x8x2xf32> to vector<8x2xf32>
    %583 = vector.extract_strided_slice %582 {offsets = [0, 0], sizes = [8, 1], strides = [1, 1]} : vector<8x2xf32> to vector<8x1xf32>
    %584 = vector.extract_strided_slice %580 {offsets = [0, 0], sizes = [1, 16], strides = [1, 1]} : vector<2x16xf32> to vector<1x16xf32>
    %585 = vector.broadcast %583 : vector<8x1xf32> to vector<8x16xf32>
    %586 = vector.broadcast %584 : vector<1x16xf32> to vector<8x16xf32>
    %587 = arith.mulf %585, %586 : vector<8x16xf32>
    %588 = arith.addf %579, %587 : vector<8x16xf32>
    %589 = vector.extract_strided_slice %582 {offsets = [0, 1], sizes = [8, 1], strides = [1, 1]} : vector<8x2xf32> to vector<8x1xf32>
    %590 = vector.extract_strided_slice %580 {offsets = [1, 0], sizes = [1, 16], strides = [1, 1]} : vector<2x16xf32> to vector<1x16xf32>
    %591 = vector.broadcast %589 : vector<8x1xf32> to vector<8x16xf32>
    %592 = vector.broadcast %590 : vector<1x16xf32> to vector<8x16xf32>
    %593 = arith.mulf %591, %592 : vector<8x16xf32>
    %594 = arith.addf %588, %593 : vector<8x16xf32>
    %595 = vector.extract_strided_slice %578 {offsets = [0, 1], sizes = [2, 16], strides = [1, 1]} : vector<2x18xf32> to vector<2x16xf32>
    %c1_110 = arith.constant 1 : index
    %c0_111 = arith.constant 0 : index
    %c0_112 = arith.constant 0 : index
    %596 = vector.load %arg14[%c1_110, %c0_111, %c0_112] : memref<3x8x2xf32, #tpu.memory_space<vmem>>, vector<1x8x2xf32>
    %597 = vector.shape_cast %596 : vector<1x8x2xf32> to vector<8x2xf32>
    %598 = vector.extract_strided_slice %597 {offsets = [0, 0], sizes = [8, 1], strides = [1, 1]} : vector<8x2xf32> to vector<8x1xf32>
    %599 = vector.extract_strided_slice %595 {offsets = [0, 0], sizes = [1, 16], strides = [1, 1]} : vector<2x16xf32> to vector<1x16xf32>
    %600 = vector.broadcast %598 : vector<8x1xf32> to vector<8x16xf32>
    %601 = vector.broadcast %599 : vector<1x16xf32> to vector<8x16xf32>
    %602 = arith.mulf %600, %601 : vector<8x16xf32>
    %603 = arith.addf %594, %602 : vector<8x16xf32>
    %604 = vector.extract_strided_slice %597 {offsets = [0, 1], sizes = [8, 1], strides = [1, 1]} : vector<8x2xf32> to vector<8x1xf32>
    %605 = vector.extract_strided_slice %595 {offsets = [1, 0], sizes = [1, 16], strides = [1, 1]} : vector<2x16xf32> to vector<1x16xf32>
    %606 = vector.broadcast %604 : vector<8x1xf32> to vector<8x16xf32>
    %607 = vector.broadcast %605 : vector<1x16xf32> to vector<8x16xf32>
    %608 = arith.mulf %606, %607 : vector<8x16xf32>
    %609 = arith.addf %603, %608 : vector<8x16xf32>
    %610 = vector.extract_strided_slice %578 {offsets = [0, 2], sizes = [2, 16], strides = [1, 1]} : vector<2x18xf32> to vector<2x16xf32>
    %c2 = arith.constant 2 : index
    %c0_113 = arith.constant 0 : index
    %c0_114 = arith.constant 0 : index
    %611 = vector.load %arg14[%c2, %c0_113, %c0_114] : memref<3x8x2xf32, #tpu.memory_space<vmem>>, vector<1x8x2xf32>
    %612 = vector.shape_cast %611 : vector<1x8x2xf32> to vector<8x2xf32>
    %613 = vector.extract_strided_slice %612 {offsets = [0, 0], sizes = [8, 1], strides = [1, 1]} : vector<8x2xf32> to vector<8x1xf32>
    %614 = vector.extract_strided_slice %610 {offsets = [0, 0], sizes = [1, 16], strides = [1, 1]} : vector<2x16xf32> to vector<1x16xf32>
    %615 = vector.broadcast %613 : vector<8x1xf32> to vector<8x16xf32>
    %616 = vector.broadcast %614 : vector<1x16xf32> to vector<8x16xf32>
    %617 = arith.mulf %615, %616 : vector<8x16xf32>
    %618 = arith.addf %609, %617 : vector<8x16xf32>
    %619 = vector.extract_strided_slice %612 {offsets = [0, 1], sizes = [8, 1], strides = [1, 1]} : vector<8x2xf32> to vector<8x1xf32>
    %620 = vector.extract_strided_slice %610 {offsets = [1, 0], sizes = [1, 16], strides = [1, 1]} : vector<2x16xf32> to vector<1x16xf32>
    %621 = vector.broadcast %619 : vector<8x1xf32> to vector<8x16xf32>
    %622 = vector.broadcast %620 : vector<1x16xf32> to vector<8x16xf32>
    %623 = arith.mulf %621, %622 : vector<8x16xf32>
    %624 = arith.addf %618, %623 : vector<8x16xf32>
    %c0_115 = arith.constant 0 : index
    %c0_116 = arith.constant 0 : index
    %625 = vector.load %arg15[%c0_115, %c0_116] : memref<8x1xf32, #tpu.memory_space<vmem>>, vector<8x1xf32>
    %626 = vector.broadcast %625 : vector<8x1xf32> to vector<8x16xf32>
    %627 = arith.addf %624, %626 : vector<8x16xf32>
    %cst_117 = arith.constant 0.000000e+00 : f32
    %628 = vector.broadcast %cst_117 : f32 to vector<8x16xf32>
    %629 = arith.maximumf %627, %628 : vector<8x16xf32>
    %cst_118 = arith.constant 0.000000e+00 : f32
    %630 = vector.broadcast %cst_118 : f32 to vector<8x1xf32>
    %cst_119 = arith.constant 0.000000e+00 : f32
    %631 = vector.broadcast %cst_119 : f32 to vector<8x1xf32>
    %632 = tpu.concatenate %630, %629, %631 in 1 : vector<8x1xf32>, vector<8x16xf32>, vector<8x1xf32> -> vector<8x18xf32>
    %cst_120 = arith.constant 0.000000e+00 : f32
    %633 = vector.broadcast %cst_120 : f32 to vector<8x16xf32>
    %634 = vector.extract_strided_slice %632 {offsets = [0, 0], sizes = [8, 16], strides = [1, 1]} : vector<8x18xf32> to vector<8x16xf32>
    %c0_121 = arith.constant 0 : index
    %c0_122 = arith.constant 0 : index
    %c0_123 = arith.constant 0 : index
    %635 = vector.load %arg16[%c0_121, %c0_122, %c0_123] : memref<3x8x8xf32, #tpu.memory_space<vmem>>, vector<1x8x8xf32>
    %636 = vector.shape_cast %635 : vector<1x8x8xf32> to vector<8x8xf32>
    %637 = vector.extract_strided_slice %636 {offsets = [0, 0], sizes = [8, 1], strides = [1, 1]} : vector<8x8xf32> to vector<8x1xf32>
    %638 = vector.extract_strided_slice %634 {offsets = [0, 0], sizes = [1, 16], strides = [1, 1]} : vector<8x16xf32> to vector<1x16xf32>
    %639 = vector.broadcast %637 : vector<8x1xf32> to vector<8x16xf32>
    %640 = vector.broadcast %638 : vector<1x16xf32> to vector<8x16xf32>
    %641 = arith.mulf %639, %640 : vector<8x16xf32>
    %642 = arith.addf %633, %641 : vector<8x16xf32>
    %643 = vector.extract_strided_slice %636 {offsets = [0, 1], sizes = [8, 1], strides = [1, 1]} : vector<8x8xf32> to vector<8x1xf32>
    %644 = vector.extract_strided_slice %634 {offsets = [1, 0], sizes = [1, 16], strides = [1, 1]} : vector<8x16xf32> to vector<1x16xf32>
    %645 = vector.broadcast %643 : vector<8x1xf32> to vector<8x16xf32>
    %646 = vector.broadcast %644 : vector<1x16xf32> to vector<8x16xf32>
    %647 = arith.mulf %645, %646 : vector<8x16xf32>
    %648 = arith.addf %642, %647 : vector<8x16xf32>
    %649 = vector.extract_strided_slice %636 {offsets = [0, 2], sizes = [8, 1], strides = [1, 1]} : vector<8x8xf32> to vector<8x1xf32>
    %650 = vector.extract_strided_slice %634 {offsets = [2, 0], sizes = [1, 16], strides = [1, 1]} : vector<8x16xf32> to vector<1x16xf32>
    %651 = vector.broadcast %649 : vector<8x1xf32> to vector<8x16xf32>
    %652 = vector.broadcast %650 : vector<1x16xf32> to vector<8x16xf32>
    %653 = arith.mulf %651, %652 : vector<8x16xf32>
    %654 = arith.addf %648, %653 : vector<8x16xf32>
    %655 = vector.extract_strided_slice %636 {offsets = [0, 3], sizes = [8, 1], strides = [1, 1]} : vector<8x8xf32> to vector<8x1xf32>
    %656 = vector.extract_strided_slice %634 {offsets = [3, 0], sizes = [1, 16], strides = [1, 1]} : vector<8x16xf32> to vector<1x16xf32>
    %657 = vector.broadcast %655 : vector<8x1xf32> to vector<8x16xf32>
    %658 = vector.broadcast %656 : vector<1x16xf32> to vector<8x16xf32>
    %659 = arith.mulf %657, %658 : vector<8x16xf32>
    %660 = arith.addf %654, %659 : vector<8x16xf32>
    %661 = vector.extract_strided_slice %636 {offsets = [0, 4], sizes = [8, 1], strides = [1, 1]} : vector<8x8xf32> to vector<8x1xf32>
    %662 = vector.extract_strided_slice %634 {offsets = [4, 0], sizes = [1, 16], strides = [1, 1]} : vector<8x16xf32> to vector<1x16xf32>
    %663 = vector.broadcast %661 : vector<8x1xf32> to vector<8x16xf32>
    %664 = vector.broadcast %662 : vector<1x16xf32> to vector<8x16xf32>
    %665 = arith.mulf %663, %664 : vector<8x16xf32>
    %666 = arith.addf %660, %665 : vector<8x16xf32>
    %667 = vector.extract_strided_slice %636 {offsets = [0, 5], sizes = [8, 1], strides = [1, 1]} : vector<8x8xf32> to vector<8x1xf32>
    %668 = vector.extract_strided_slice %634 {offsets = [5, 0], sizes = [1, 16], strides = [1, 1]} : vector<8x16xf32> to vector<1x16xf32>
    %669 = vector.broadcast %667 : vector<8x1xf32> to vector<8x16xf32>
    %670 = vector.broadcast %668 : vector<1x16xf32> to vector<8x16xf32>
    %671 = arith.mulf %669, %670 : vector<8x16xf32>
    %672 = arith.addf %666, %671 : vector<8x16xf32>
    %673 = vector.extract_strided_slice %636 {offsets = [0, 6], sizes = [8, 1], strides = [1, 1]} : vector<8x8xf32> to vector<8x1xf32>
    %674 = vector.extract_strided_slice %634 {offsets = [6, 0], sizes = [1, 16], strides = [1, 1]} : vector<8x16xf32> to vector<1x16xf32>
    %675 = vector.broadcast %673 : vector<8x1xf32> to vector<8x16xf32>
    %676 = vector.broadcast %674 : vector<1x16xf32> to vector<8x16xf32>
    %677 = arith.mulf %675, %676 : vector<8x16xf32>
    %678 = arith.addf %672, %677 : vector<8x16xf32>
    %679 = vector.extract_strided_slice %636 {offsets = [0, 7], sizes = [8, 1], strides = [1, 1]} : vector<8x8xf32> to vector<8x1xf32>
    %680 = vector.extract_strided_slice %634 {offsets = [7, 0], sizes = [1, 16], strides = [1, 1]} : vector<8x16xf32> to vector<1x16xf32>
    %681 = vector.broadcast %679 : vector<8x1xf32> to vector<8x16xf32>
    %682 = vector.broadcast %680 : vector<1x16xf32> to vector<8x16xf32>
    %683 = arith.mulf %681, %682 : vector<8x16xf32>
    %684 = arith.addf %678, %683 : vector<8x16xf32>
    %685 = vector.extract_strided_slice %632 {offsets = [0, 1], sizes = [8, 16], strides = [1, 1]} : vector<8x18xf32> to vector<8x16xf32>
    %c1_124 = arith.constant 1 : index
    %c0_125 = arith.constant 0 : index
    %c0_126 = arith.constant 0 : index
    %686 = vector.load %arg16[%c1_124, %c0_125, %c0_126] : memref<3x8x8xf32, #tpu.memory_space<vmem>>, vector<1x8x8xf32>
    %687 = vector.shape_cast %686 : vector<1x8x8xf32> to vector<8x8xf32>
    %688 = vector.extract_strided_slice %687 {offsets = [0, 0], sizes = [8, 1], strides = [1, 1]} : vector<8x8xf32> to vector<8x1xf32>
    %689 = vector.extract_strided_slice %685 {offsets = [0, 0], sizes = [1, 16], strides = [1, 1]} : vector<8x16xf32> to vector<1x16xf32>
    %690 = vector.broadcast %688 : vector<8x1xf32> to vector<8x16xf32>
    %691 = vector.broadcast %689 : vector<1x16xf32> to vector<8x16xf32>
    %692 = arith.mulf %690, %691 : vector<8x16xf32>
    %693 = arith.addf %684, %692 : vector<8x16xf32>
    %694 = vector.extract_strided_slice %687 {offsets = [0, 1], sizes = [8, 1], strides = [1, 1]} : vector<8x8xf32> to vector<8x1xf32>
    %695 = vector.extract_strided_slice %685 {offsets = [1, 0], sizes = [1, 16], strides = [1, 1]} : vector<8x16xf32> to vector<1x16xf32>
    %696 = vector.broadcast %694 : vector<8x1xf32> to vector<8x16xf32>
    %697 = vector.broadcast %695 : vector<1x16xf32> to vector<8x16xf32>
    %698 = arith.mulf %696, %697 : vector<8x16xf32>
    %699 = arith.addf %693, %698 : vector<8x16xf32>
    %700 = vector.extract_strided_slice %687 {offsets = [0, 2], sizes = [8, 1], strides = [1, 1]} : vector<8x8xf32> to vector<8x1xf32>
    %701 = vector.extract_strided_slice %685 {offsets = [2, 0], sizes = [1, 16], strides = [1, 1]} : vector<8x16xf32> to vector<1x16xf32>
    %702 = vector.broadcast %700 : vector<8x1xf32> to vector<8x16xf32>
    %703 = vector.broadcast %701 : vector<1x16xf32> to vector<8x16xf32>
    %704 = arith.mulf %702, %703 : vector<8x16xf32>
    %705 = arith.addf %699, %704 : vector<8x16xf32>
    %706 = vector.extract_strided_slice %687 {offsets = [0, 3], sizes = [8, 1], strides = [1, 1]} : vector<8x8xf32> to vector<8x1xf32>
    %707 = vector.extract_strided_slice %685 {offsets = [3, 0], sizes = [1, 16], strides = [1, 1]} : vector<8x16xf32> to vector<1x16xf32>
    %708 = vector.broadcast %706 : vector<8x1xf32> to vector<8x16xf32>
    %709 = vector.broadcast %707 : vector<1x16xf32> to vector<8x16xf32>
    %710 = arith.mulf %708, %709 : vector<8x16xf32>
    %711 = arith.addf %705, %710 : vector<8x16xf32>
    %712 = vector.extract_strided_slice %687 {offsets = [0, 4], sizes = [8, 1], strides = [1, 1]} : vector<8x8xf32> to vector<8x1xf32>
    %713 = vector.extract_strided_slice %685 {offsets = [4, 0], sizes = [1, 16], strides = [1, 1]} : vector<8x16xf32> to vector<1x16xf32>
    %714 = vector.broadcast %712 : vector<8x1xf32> to vector<8x16xf32>
    %715 = vector.broadcast %713 : vector<1x16xf32> to vector<8x16xf32>
    %716 = arith.mulf %714, %715 : vector<8x16xf32>
    %717 = arith.addf %711, %716 : vector<8x16xf32>
    %718 = vector.extract_strided_slice %687 {offsets = [0, 5], sizes = [8, 1], strides = [1, 1]} : vector<8x8xf32> to vector<8x1xf32>
    %719 = vector.extract_strided_slice %685 {offsets = [5, 0], sizes = [1, 16], strides = [1, 1]} : vector<8x16xf32> to vector<1x16xf32>
    %720 = vector.broadcast %718 : vector<8x1xf32> to vector<8x16xf32>
    %721 = vector.broadcast %719 : vector<1x16xf32> to vector<8x16xf32>
    %722 = arith.mulf %720, %721 : vector<8x16xf32>
    %723 = arith.addf %717, %722 : vector<8x16xf32>
    %724 = vector.extract_strided_slice %687 {offsets = [0, 6], sizes = [8, 1], strides = [1, 1]} : vector<8x8xf32> to vector<8x1xf32>
    %725 = vector.extract_strided_slice %685 {offsets = [6, 0], sizes = [1, 16], strides = [1, 1]} : vector<8x16xf32> to vector<1x16xf32>
    %726 = vector.broadcast %724 : vector<8x1xf32> to vector<8x16xf32>
    %727 = vector.broadcast %725 : vector<1x16xf32> to vector<8x16xf32>
    %728 = arith.mulf %726, %727 : vector<8x16xf32>
    %729 = arith.addf %723, %728 : vector<8x16xf32>
    %730 = vector.extract_strided_slice %687 {offsets = [0, 7], sizes = [8, 1], strides = [1, 1]} : vector<8x8xf32> to vector<8x1xf32>
    %731 = vector.extract_strided_slice %685 {offsets = [7, 0], sizes = [1, 16], strides = [1, 1]} : vector<8x16xf32> to vector<1x16xf32>
    %732 = vector.broadcast %730 : vector<8x1xf32> to vector<8x16xf32>
    %733 = vector.broadcast %731 : vector<1x16xf32> to vector<8x16xf32>
    %734 = arith.mulf %732, %733 : vector<8x16xf32>
    %735 = arith.addf %729, %734 : vector<8x16xf32>
    %736 = vector.extract_strided_slice %632 {offsets = [0, 2], sizes = [8, 16], strides = [1, 1]} : vector<8x18xf32> to vector<8x16xf32>
    %c2_127 = arith.constant 2 : index
    %c0_128 = arith.constant 0 : index
    %c0_129 = arith.constant 0 : index
    %737 = vector.load %arg16[%c2_127, %c0_128, %c0_129] : memref<3x8x8xf32, #tpu.memory_space<vmem>>, vector<1x8x8xf32>
    %738 = vector.shape_cast %737 : vector<1x8x8xf32> to vector<8x8xf32>
    %739 = vector.extract_strided_slice %738 {offsets = [0, 0], sizes = [8, 1], strides = [1, 1]} : vector<8x8xf32> to vector<8x1xf32>
    %740 = vector.extract_strided_slice %736 {offsets = [0, 0], sizes = [1, 16], strides = [1, 1]} : vector<8x16xf32> to vector<1x16xf32>
    %741 = vector.broadcast %739 : vector<8x1xf32> to vector<8x16xf32>
    %742 = vector.broadcast %740 : vector<1x16xf32> to vector<8x16xf32>
    %743 = arith.mulf %741, %742 : vector<8x16xf32>
    %744 = arith.addf %735, %743 : vector<8x16xf32>
    %745 = vector.extract_strided_slice %738 {offsets = [0, 1], sizes = [8, 1], strides = [1, 1]} : vector<8x8xf32> to vector<8x1xf32>
    %746 = vector.extract_strided_slice %736 {offsets = [1, 0], sizes = [1, 16], strides = [1, 1]} : vector<8x16xf32> to vector<1x16xf32>
    %747 = vector.broadcast %745 : vector<8x1xf32> to vector<8x16xf32>
    %748 = vector.broadcast %746 : vector<1x16xf32> to vector<8x16xf32>
    %749 = arith.mulf %747, %748 : vector<8x16xf32>
    %750 = arith.addf %744, %749 : vector<8x16xf32>
    %751 = vector.extract_strided_slice %738 {offsets = [0, 2], sizes = [8, 1], strides = [1, 1]} : vector<8x8xf32> to vector<8x1xf32>
    %752 = vector.extract_strided_slice %736 {offsets = [2, 0], sizes = [1, 16], strides = [1, 1]} : vector<8x16xf32> to vector<1x16xf32>
    %753 = vector.broadcast %751 : vector<8x1xf32> to vector<8x16xf32>
    %754 = vector.broadcast %752 : vector<1x16xf32> to vector<8x16xf32>
    %755 = arith.mulf %753, %754 : vector<8x16xf32>
    %756 = arith.addf %750, %755 : vector<8x16xf32>
    %757 = vector.extract_strided_slice %738 {offsets = [0, 3], sizes = [8, 1], strides = [1, 1]} : vector<8x8xf32> to vector<8x1xf32>
    %758 = vector.extract_strided_slice %736 {offsets = [3, 0], sizes = [1, 16], strides = [1, 1]} : vector<8x16xf32> to vector<1x16xf32>
    %759 = vector.broadcast %757 : vector<8x1xf32> to vector<8x16xf32>
    %760 = vector.broadcast %758 : vector<1x16xf32> to vector<8x16xf32>
    %761 = arith.mulf %759, %760 : vector<8x16xf32>
    %762 = arith.addf %756, %761 : vector<8x16xf32>
    %763 = vector.extract_strided_slice %738 {offsets = [0, 4], sizes = [8, 1], strides = [1, 1]} : vector<8x8xf32> to vector<8x1xf32>
    %764 = vector.extract_strided_slice %736 {offsets = [4, 0], sizes = [1, 16], strides = [1, 1]} : vector<8x16xf32> to vector<1x16xf32>
    %765 = vector.broadcast %763 : vector<8x1xf32> to vector<8x16xf32>
    %766 = vector.broadcast %764 : vector<1x16xf32> to vector<8x16xf32>
    %767 = arith.mulf %765, %766 : vector<8x16xf32>
    %768 = arith.addf %762, %767 : vector<8x16xf32>
    %769 = vector.extract_strided_slice %738 {offsets = [0, 5], sizes = [8, 1], strides = [1, 1]} : vector<8x8xf32> to vector<8x1xf32>
    %770 = vector.extract_strided_slice %736 {offsets = [5, 0], sizes = [1, 16], strides = [1, 1]} : vector<8x16xf32> to vector<1x16xf32>
    %771 = vector.broadcast %769 : vector<8x1xf32> to vector<8x16xf32>
    %772 = vector.broadcast %770 : vector<1x16xf32> to vector<8x16xf32>
    %773 = arith.mulf %771, %772 : vector<8x16xf32>
    %774 = arith.addf %768, %773 : vector<8x16xf32>
    %775 = vector.extract_strided_slice %738 {offsets = [0, 6], sizes = [8, 1], strides = [1, 1]} : vector<8x8xf32> to vector<8x1xf32>
    %776 = vector.extract_strided_slice %736 {offsets = [6, 0], sizes = [1, 16], strides = [1, 1]} : vector<8x16xf32> to vector<1x16xf32>
    %777 = vector.broadcast %775 : vector<8x1xf32> to vector<8x16xf32>
    %778 = vector.broadcast %776 : vector<1x16xf32> to vector<8x16xf32>
    %779 = arith.mulf %777, %778 : vector<8x16xf32>
    %780 = arith.addf %774, %779 : vector<8x16xf32>
    %781 = vector.extract_strided_slice %738 {offsets = [0, 7], sizes = [8, 1], strides = [1, 1]} : vector<8x8xf32> to vector<8x1xf32>
    %782 = vector.extract_strided_slice %736 {offsets = [7, 0], sizes = [1, 16], strides = [1, 1]} : vector<8x16xf32> to vector<1x16xf32>
    %783 = vector.broadcast %781 : vector<8x1xf32> to vector<8x16xf32>
    %784 = vector.broadcast %782 : vector<1x16xf32> to vector<8x16xf32>
    %785 = arith.mulf %783, %784 : vector<8x16xf32>
    %786 = arith.addf %780, %785 : vector<8x16xf32>
    %c0_130 = arith.constant 0 : index
    %c0_131 = arith.constant 0 : index
    %787 = vector.load %arg17[%c0_130, %c0_131] : memref<8x1xf32, #tpu.memory_space<vmem>>, vector<8x1xf32>
    %788 = vector.broadcast %787 : vector<8x1xf32> to vector<8x16xf32>
    %789 = arith.addf %786, %788 : vector<8x16xf32>
    %c0_132 = arith.constant 0 : index
    %c0_133 = arith.constant 0 : index
    %790 = vector.load %arg18[%c0_132, %c0_133] : memref<8x2xf32, #tpu.memory_space<vmem>>, vector<8x2xf32>
    %791 = vector.extract_strided_slice %790 {offsets = [0, 0], sizes = [8, 1], strides = [1, 1]} : vector<8x2xf32> to vector<8x1xf32>
    %792 = vector.extract_strided_slice %575 {offsets = [0, 0], sizes = [1, 16], strides = [1, 1]} : vector<2x16xf32> to vector<1x16xf32>
    %793 = vector.broadcast %791 : vector<8x1xf32> to vector<8x16xf32>
    %794 = vector.broadcast %792 : vector<1x16xf32> to vector<8x16xf32>
    %795 = arith.mulf %793, %794 : vector<8x16xf32>
    %796 = vector.extract_strided_slice %790 {offsets = [0, 1], sizes = [8, 1], strides = [1, 1]} : vector<8x2xf32> to vector<8x1xf32>
    %797 = vector.extract_strided_slice %575 {offsets = [1, 0], sizes = [1, 16], strides = [1, 1]} : vector<2x16xf32> to vector<1x16xf32>
    %798 = vector.broadcast %796 : vector<8x1xf32> to vector<8x16xf32>
    %799 = vector.broadcast %797 : vector<1x16xf32> to vector<8x16xf32>
    %800 = arith.mulf %798, %799 : vector<8x16xf32>
    %801 = arith.addf %795, %800 : vector<8x16xf32>
    %c0_134 = arith.constant 0 : index
    %c0_135 = arith.constant 0 : index
    %802 = vector.load %arg19[%c0_134, %c0_135] : memref<8x1xf32, #tpu.memory_space<vmem>>, vector<8x1xf32>
    %803 = vector.broadcast %802 : vector<8x1xf32> to vector<8x16xf32>
    %804 = arith.addf %801, %803 : vector<8x16xf32>
    %805 = arith.addf %789, %804 : vector<8x16xf32>
    %cst_136 = arith.constant 0.000000e+00 : f32
    %806 = vector.broadcast %cst_136 : f32 to vector<8x16xf32>
    %807 = arith.maximumf %805, %806 : vector<8x16xf32>
    %c0_137 = arith.constant 0 : index
    %c0_138 = arith.constant 0 : index
    %c0_139 = arith.constant 0 : index
    %808 = vector.load %arg20[%c0_137, %c0_138, %c0_139] : memref<1x8x16xf32, #tpu.memory_space<vmem>>, vector<1x8x16xf32>
    %809 = vector.shape_cast %808 : vector<1x8x16xf32> to vector<8x16xf32>
    %810 = vector.shape_cast %807 : vector<8x16xf32> to vector<1x8x16xf32>
    tpu.vector_store %arg20[%c0_137, %c0_138, %c0_139], %810 {strides = array<i32>} : memref<1x8x16xf32, #tpu.memory_space<vmem>>, vector<1x8x16xf32>,
    return
  }
  func.func @transform_0(%arg0: i32) -> (i32, i32, i32) {
    %c0_i32 = arith.constant 0 : i32
    %c0_i32_0 = arith.constant 0 : i32
    %c0_i32_1 = arith.constant 0 : i32
    return %arg0, %c0_i32, %c0_i32_0 : i32, i32, i32
  }
  func.func @transform_1(%arg0: i32) -> (i32, i32, i32) {
    %c0_i32 = arith.constant 0 : i32
    %c0_i32_0 = arith.constant 0 : i32
    %c0_i32_1 = arith.constant 0 : i32
    %c0_i32_2 = arith.constant 0 : i32
    return %c0_i32, %c0_i32_0, %c0_i32_1 : i32, i32, i32
  }
  func.func @transform_2(%arg0: i32) -> (i32, i32, i32) {
    %c0_i32 = arith.constant 0 : i32
    %c0_i32_0 = arith.constant 0 : i32
    %c0_i32_1 = arith.constant 0 : i32
    %c0_i32_2 = arith.constant 0 : i32
    return %c0_i32, %c0_i32_0, %c0_i32_1 : i32, i32, i32
  }
  func.func @transform_3(%arg0: i32) -> (i32, i32, i32) {
    %c0_i32 = arith.constant 0 : i32
    %c0_i32_0 = arith.constant 0 : i32
    %c0_i32_1 = arith.constant 0 : i32
    %c0_i32_2 = arith.constant 0 : i32
    return %c0_i32, %c0_i32_0, %c0_i32_1 : i32, i32, i32
  }
  func.func @transform_4(%arg0: i32) -> (i32, i32, i32) {
    %c0_i32 = arith.constant 0 : i32
    %c0_i32_0 = arith.constant 0 : i32
    %c0_i32_1 = arith.constant 0 : i32
    %c0_i32_2 = arith.constant 0 : i32
    return %c0_i32, %c0_i32_0, %c0_i32_1 : i32, i32, i32
  }
  func.func @transform_5(%arg0: i32) -> (i32, i32, i32) {
    %c0_i32 = arith.constant 0 : i32
    %c0_i32_0 = arith.constant 0 : i32
    %c0_i32_1 = arith.constant 0 : i32
    %c0_i32_2 = arith.constant 0 : i32
    return %c0_i32, %c0_i32_0, %c0_i32_1 : i32, i32, i32
  }
  func.func @transform_6(%arg0: i32) -> (i32, i32, i32) {
    %c0_i32 = arith.constant 0 : i32
    %c0_i32_0 = arith.constant 0 : i32
    %c0_i32_1 = arith.constant 0 : i32
    %c0_i32_2 = arith.constant 0 : i32
    return %c0_i32, %c0_i32_0, %c0_i32_1 : i32, i32, i32
  }
  func.func @transform_7(%arg0: i32) -> (i32, i32, i32) {
    %c0_i32 = arith.constant 0 : i32
    %c0_i32_0 = arith.constant 0 : i32
    %c0_i32_1 = arith.constant 0 : i32
    %c0_i32_2 = arith.constant 0 : i32
    return %c0_i32, %c0_i32_0, %c0_i32_1 : i32, i32, i32
  }
  func.func @transform_8(%arg0: i32) -> (i32, i32, i32) {
    %c0_i32 = arith.constant 0 : i32
    %c0_i32_0 = arith.constant 0 : i32
    %c0_i32_1 = arith.constant 0 : i32
    %c0_i32_2 = arith.constant 0 : i32
    return %c0_i32, %c0_i32_0, %c0_i32_1 : i32, i32, i32
  }
  func.func @transform_9(%arg0: i32) -> (i32, i32, i32) {
    %c0_i32 = arith.constant 0 : i32
    %c0_i32_0 = arith.constant 0 : i32
    %c0_i32_1 = arith.constant 0 : i32
    %c0_i32_2 = arith.constant 0 : i32
    return %c0_i32, %c0_i32_0, %c0_i32_1 : i32, i32, i32
  }
  func.func @transform_10(%arg0: i32) -> (i32, i32, i32) {
    %c0_i32 = arith.constant 0 : i32
    %c0_i32_0 = arith.constant 0 : i32
    %c0_i32_1 = arith.constant 0 : i32
    %c0_i32_2 = arith.constant 0 : i32
    return %c0_i32, %c0_i32_0, %c0_i32_1 : i32, i32, i32
  }
  func.func @transform_11(%arg0: i32) -> (i32, i32, i32) {
    %c0_i32 = arith.constant 0 : i32
    %c0_i32_0 = arith.constant 0 : i32
    %c0_i32_1 = arith.constant 0 : i32
    %c0_i32_2 = arith.constant 0 : i32
    return %c0_i32, %c0_i32_0, %c0_i32_1 : i32, i32, i32
  }
  func.func @transform_12(%arg0: i32) -> (i32, i32, i32) {
    %c0_i32 = arith.constant 0 : i32
    %c0_i32_0 = arith.constant 0 : i32
    %c0_i32_1 = arith.constant 0 : i32
    %c0_i32_2 = arith.constant 0 : i32
    return %c0_i32, %c0_i32_0, %c0_i32_1 : i32, i32, i32
  }
  func.func @transform_13(%arg0: i32) -> (i32, i32, i32) {
    %c0_i32 = arith.constant 0 : i32
    %c0_i32_0 = arith.constant 0 : i32
    %c0_i32_1 = arith.constant 0 : i32
    %c0_i32_2 = arith.constant 0 : i32
    return %c0_i32, %c0_i32_0, %c0_i32_1 : i32, i32, i32
  }
  func.func @transform_14(%arg0: i32) -> (i32, i32) {
    %c0_i32 = arith.constant 0 : i32
    %c0_i32_0 = arith.constant 0 : i32
    %c0_i32_1 = arith.constant 0 : i32
    return %c0_i32, %c0_i32_0 : i32, i32
  }
  func.func @transform_15(%arg0: i32) -> (i32, i32, i32) {
    %c0_i32 = arith.constant 0 : i32
    %c0_i32_0 = arith.constant 0 : i32
    %c0_i32_1 = arith.constant 0 : i32
    %c0_i32_2 = arith.constant 0 : i32
    return %c0_i32, %c0_i32_0, %c0_i32_1 : i32, i32, i32
  }
  func.func @transform_16(%arg0: i32) -> (i32, i32) {
    %c0_i32 = arith.constant 0 : i32
    %c0_i32_0 = arith.constant 0 : i32
    %c0_i32_1 = arith.constant 0 : i32
    return %c0_i32, %c0_i32_0 : i32, i32
  }
  func.func @transform_17(%arg0: i32) -> (i32, i32) {
    %c0_i32 = arith.constant 0 : i32
    %c0_i32_0 = arith.constant 0 : i32
    %c0_i32_1 = arith.constant 0 : i32
    return %c0_i32, %c0_i32_0 : i32, i32
  }
  func.func @transform_18(%arg0: i32) -> (i32, i32) {
    %c0_i32 = arith.constant 0 : i32
    %c0_i32_0 = arith.constant 0 : i32
    %c0_i32_1 = arith.constant 0 : i32
    return %c0_i32, %c0_i32_0 : i32, i32
  }
  func.func @transform_19(%arg0: i32) -> (i32, i32, i32) {
    %c0_i32 = arith.constant 0 : i32
    %c0_i32_0 = arith.constant 0 : i32
    %c0_i32_1 = arith.constant 0 : i32
    return %arg0, %c0_i32, %c0_i32_0 : i32, i32, i32
  }
}

</mosaic_0001>

<bundles_post_ra>
// kernel: explorer_v2_forward.1
= control target key start
LH: loop header
LB: loop body
LE: loop exit
PB: predicated region body
PF: predicated region fallthrough
CT: control target
= control target key end

     0   :  { %s4348_s0 = inlined_call_operand.vmem [shape: f32[2,2,16], index: 0, kind: input, shape index: {}]   ;;  %s4349_s1 = inlined_call_operand.vmem [shape: f32[2,4,2], index: 1, kind: input, shape index: {}]   ;;  %s4350_s2 = inlined_call_operand.vmem [shape: f32[2,4,2], index: 2, kind: input, shape index: {}]   ;;  %s4351_s3 = inlined_call_operand.vmem [shape: f32[2,4,4], index: 3, kind: input, shape index: {}]   ;;  %s4352_s4 = inlined_call_operand.vmem [shape: f32[2,4,1], index: 4, kind: input, shape index: {}]   ;;  %s4353_s5 = inlined_call_operand.vmem [shape: f32[2,1,4], index: 5, kind: input, shape index: {}]   ;;  %s4354_s6 = inlined_call_operand.vmem [shape: f32[2,8,4], index: 6, kind: input, shape index: {}]   ;;  %s4355_s7 = inlined_call_operand.vmem [shape: f32[2,8,4], index: 7, kind: input, shape index: {}]   ;;  %s4356_s8 = inlined_call_operand.vmem [shape: f32[2,4,1], index: 8, kind: input, shape index: {}]   ;;  %s4357_s9 = inlined_call_operand.vmem [shape: f32[2,4,1], index: 9, kind: input, shape index: {}]   ;;  %s4358_s10 = inlined_call_operand.vmem [shape: f32[2,4,8], index: 10, kind: input, shape index: {}]   ;;  %s4359_s11 = inlined_call_operand.vmem [shape: f32[2,4,1], index: 11, kind: input, shape index: {}]   ;;  %s4360_s12 = inlined_call_operand.vmem [shape: f32[2,2,4], index: 12, kind: input, shape index: {}]   ;;  %s4361_s13 = inlined_call_operand.vmem [shape: f32[3,8,2], index: 13, kind: input, shape index: {}]   ;;  %s4362_s14 = inlined_call_operand.vmem [shape: f32[8,1], index: 14, kind: input, shape index: {}]   ;;  %s4363_s15 = inlined_call_operand.vmem [shape: f32[3,8,8], index: 15, kind: input, shape index: {}]   ;;  %s4364_s16 = inlined_call_operand.vmem [shape: f32[8,1], index: 16, kind: input, shape index: {}]   ;;  %s4365_s17 = inlined_call_operand.vmem [shape: f32[8,2], index: 17, kind: input, shape index: {}]   ;;  %s4366_s18 = inlined_call_operand.vmem [shape: f32[8,1], index: 18, kind: input, shape index: {}]   ;;  %s4367_s19 = inlined_call_operand.hbm [shape: f32[2,8,16], index: 19, kind: output, shape index: {}]  }
   0x1   :  { %4384 = sst [smem:[#allocation8_spill]] %s4348_s0 }
   0x2   :  { %4385 = sst [smem:[#allocation9_spill]] %s4349_s1 }
   0x3   :  { %4386 = sst [smem:[#allocation10_spill]] %s4350_s2 }
   0x4   :  { %4387 = sst [smem:[#allocation11_spill]] %s4351_s3 }
   0x5   :  { %4388 = sst [smem:[#allocation12_spill]] %s4352_s4 }
   0x6   :  { %4389 = sst [smem:[#allocation13_spill]] %s4353_s5 }
   0x7   :  { %4390 = sst [smem:[#allocation14_spill]] %s4354_s6 }
   0x8   :  { %4391 = sst [smem:[#allocation15_spill]] %s4355_s7 }
   0x9   :  { %24 = vsyncpa [#allocation3], 0 }
   0xa   :  { %26 = vsyncpa [#allocation3 + $0x1], 0  ;;  %s3284_s0 = smov 0   ;;  %s3286_s30 = smov 0  }
   0xb   :  { %s3288_s20 = smov 0   ;;  %s3290_s21 = smov 0  }
   0xc LB: > { %4392 = sst [smem:[#allocation5_spill]] %s3163_s20  ;;  %s3305_s1 = sadd.s32 4294967295, %s3167_s21   ;;  %s3167_s21 = sphi %s3290_s21, %s4414_s21   ;;  %s3163_s20 = sphi %s3288_s20, %s4416_s20   ;;  %s3159_s30 = sphi %s3286_s30, %s4418_s30   ;;  %s3155_s0 = sphi %s3284_s0, %s4417_s0  }
   0xd   : > { %s2905_s22 = sadd.s32 4294967294, %s3167_s21   ;;  %s3309_s2 = sadd.s32 1, %s3167_s21  }
   0xe   : > { %4393 = sst [smem:[#allocation6_spill]] %s3309_s2  ;;  %s443_s23 = sadd.s32 1, %s3163_s20 }
   0xf   : > { %s440_s24 = ssub.s32 %s3167_s21, %s3309_s2  ;;  %p453_p0 = scmp.ne.s32.totalorder %s3163_s20, %s3159_s30 }
  0x10   : > { %p441_p1 = scmp.eq.s32.totalorder %s440_s24, 0  ;;  %p454_p2 = scmp.eq.s32.totalorder %s3305_s1, 1 }
  0x11   : > { %p459_p3 = scmp.ne.s32.totalorder %s3159_s30, %s3155_s0  ;;  %p460_p4 = scmp.eq.s32.totalorder %s2905_s22, 1 }
  0x12   : > { %s3320_s25 = scalar_select %p441_p1, %s3163_s20, %s443_s23  }
  0x13   : > { %p3322_p5 = por %p454_p2, %p453_p0  ;;  %p3326_p6 = por %p460_p4, %p459_p3 }
  0x14   : > { %4394 = sst [smem:[#allocation7_spill]] %s3320_s25  ;;  %p2908_p7 = scmp.ge.s32.totalorder %s3167_s21, 1 }
  0x15   : > { %p539_p8 = scmp.lt.s32.totalorder %s3167_s21, 3 }
  0x17   : > { %p540_p9 = pnand %p2908_p7, %p539_p8 }
  0x18   : > { %s4397_s29 = sld [smem:[#allocation9_spill]] (!%p540_p9)  ;;  %s4398_s23 = sld [smem:[#allocation11_spill]] (!%p540_p9)  ;;  %v3169_v2 = vmov (!%p540_p9), 0   ;;  %v3170_v3 = vmov (!%p540_p9), 1   ;;  %v3171_v4 = vmov (!%p540_p9), 2   ;;  %v3172_v5 = vmov (!%p540_p9), 3  }
  0x19   : > { %543 = sbr.rel (%p540_p9) target bundleno = 5083 (0x13db), region = 96  ;;  %2984 = vset.pattern.permute.xlu0 (!%p540_p9), %v3169_v2  ;;  %2986 = vset.pattern.permute.xlu1 (!%p540_p9), %v3170_v3  ;;  %p594_p10 = scmp.lt.s32.totalorder (!%p540_p9), %s3305_s1, 1  ;;  %v616_v6 = vlaneseq (!%p540_p9)  ;;  %vm647_vm0 = vcmask (!%p540_p9), 23552   ;;  %v608_v29 = vld [vmem:[%s4358_s10] sm:$0xf] (!%p540_p9)  ;;  %vm1342_vm3 = vcmask (!%p540_p9), 7168  }
  0x1a   : > { %s4399_s25 = sld [smem:[#allocation8_spill]] (!%p540_p9)  ;;  %s4400_s4 = sld [smem:[#allocation12_spill]] (!%p540_p9)  ;;  %v606_v32 = vld [vmem:[%s4356_s8] sm:$0xf] (!%p540_p9)  ;;  %vm1347_vm4 = vcmask (!%p540_p9), 15360   ;;  %vm1356_vm5 = vcmask (!%p540_p9), 31744  }
  0x1b   : > { %v3348_v7 = vshrl.u32 (!%p540_p9), %v616_v6, 7  ;;  %s4374_s24 = smov (!%p540_p9), 127   ;;  %s4401_s5 = sld [smem:[#allocation13_spill]] (!%p540_p9)  ;;  %v607_v35 = vld [vmem:[%s4357_s9] sm:$0xf] (!%p540_p9)  ;;  %vm1361_vm6 = vcmask (!%p540_p9), 39936  }
  0x1c   : > { %s4402_s6 = sld [smem:[#allocation14_spill]] (!%p540_p9)  ;;  %vm1366_vm7 = vcmask (!%p540_p9), 48128   ;;  %vm1371_vm8 = vcmask (!%p540_p9), 56320   ;;  %vm1376_vm9 = vcmask (!%p540_p9), 64512   ;;  %vm1381_vm10 = vcmask (!%p540_p9), 72704   ;;  %s4403_s22 = sld [smem:[#allocation10_spill]] (!%p540_p9) }
  0x1d   : > { %v3354_v8 = vsub.s32 (!%p540_p9), 0, %v3348_v7  ;;  %v3357_v9 = vsub.s32 (!%p540_p9), 1, %v3348_v7  ;;  %v3389_v31 = vsub.s32 (!%p540_p9), 2, %v3348_v7  ;;  %v3397_v34 = vsub.s32 (!%p540_p9), 3, %v3348_v7  ;;  %s4404_s7 = sld [smem:[#allocation15_spill]] (!%p540_p9)  ;;  %s2928_s2 = sshll.u32 (!%p540_p9), %s3305_s1, 7 }
  0x1e   : > { %v599_v0 = vld [vmem:[%s4397_s29] sm:$0xf] (!%p540_p9)  ;;  %vm1386_vm11 = vcmask (!%p540_p9), 80896   ;;  %vm1391_vm12 = vcmask (!%p540_p9), 89088   ;;  %vm1396_vm13 = vcmask (!%p540_p9), 97280   ;;  %vm1401_vm14 = vcmask (!%p540_p9), 105472  }
  0x1f   : > { %v601_v1 = vld [vmem:[%s4398_s23] sm:$0xf] (!%p540_p9)  ;;  %613 = vperm.xlu0 (!%p540_p9), %2984, %v599_v0   ;;  %v874_v30 = vrot.slane (!%p540_p9), %v608_v29, %v3357_v9  ;;  %v881_v33 = vrot.slane (!%p540_p9), %v608_v29, %v3389_v31  ;;  %v888_v36 = vrot.slane (!%p540_p9), %v608_v29, %v3397_v34  ;;  %v867_v37 = vrot.slane (!%p540_p9), %v608_v29, %v3354_v8 }
  0x20   : > { %656 = vperm.xlu1 %2986, %v601_v1   ;;  %s595_s27 = scalar_select %p594_p10, %s3305_s1, 1  ;;  %v602_v18 = vld [vmem:[%s4400_s4] sm:$0xf]  ;;  %v3177_v29 = vmov 1966171168   ;;  %vm4382_vm15 = vcmask 113664  }
  0x21   : > { %v603_v26 = vld [vmem:[%s4401_s5] sm:$0x1]  ;;  %s3183_s1 = smov [#allocation2]  }
  0x22   : > { %s2910_s28 = sshll.u32 %s595_s27, 1  ;;  %s4380_s27 = smov 126   ;;  %v604_v28 = vld [vmem:[%s4402_s6] sm:$0xff] }
  0x23   : > { %2985 = vset.pattern.permute.xlu0 %v3170_v3  ;;  %s597_s20 = scalar_lea.vmem %s4399_s25, %s2910_s28  ;;  %s4372_s25 = smov 3  }
  0x24   : > { %2987 = vset.pattern.permute.xlu1 %v3171_v4  ;;  %622 = vperm.xlu0 %2985, %v599_v0   ;;  %v598_v10 = vld [vmem:[%s597_s20] sm:$0x3]  ;;  %s4373_s20 = smov 125   ;;  %s4407_s28 = smov 127  }
  0x25   : > { %666 = vperm.xlu1 %2987, %v601_v1   ;;  %v3360_v12 = vrot.slane %v598_v10, %v3354_v8  ;;  %v3363_v13 = vrot.slane %v598_v10, %v3357_v9 }
  0x28   : > { %2990 = vset.pattern.permute.xlu0 %v3169_v2 }
  0x29   : > { %2988 = vset.pattern.permute.xlu1 %v3172_v5 }
  0x2a   : > { %676 = vperm.xlu1 %2988, %v601_v1  }
  0x2e   : > { %2989 = vset.pattern.permute.xlu1 %v3169_v2 }
  0x2f   : > { %651 = vperm.xlu1 %2989, %v601_v1  }
  0x33   : > { %2991 = vset.pattern.permute.xlu1 %v3170_v3 }
  0x9e   : > { %v614_v11 = vpop.permute.xlu0 %613 }
  0x9f   : > { %v620_v15 = vmul.f32 %v3360_v12, %v614_v11  ;;  %v657_v19 = vpop.permute.xlu1 %656 }
  0xa3   : > { %v623_v14 = vpop.permute.xlu0 %622 }
  0xa4   : > { %v629_v16 = vmul.f32 %v3363_v13, %v623_v14  ;;  %v667_v20 = vpop.permute.xlu1 %666 }
  0xa6   : > { %v630_v17 = vadd.f32 %v629_v16, %v620_v15 }
  0xa8   : > { %644 = vrot.lane.b32.xlu0 %v630_v17, %s4372_s25  ;;  %s4305_s25 = scalar_lea.hbm %s4367_s19, %s2928_s2 }
  0xa9   : > { %v677_v22 = vpop.permute.xlu1 %676 }
  0xac   : > { %687 = vperm.xlu0 %2990, %v602_v18  }
  0xae   : > { %v652_v38 = vpop.permute.xlu1 %651 }
 0x11a   : > { %v645_v21 = vpop.permute.xlu0 %644 }
 0x11b   : > { %v648_v23 = vsel %vm647_vm0, 0.0, %v645_v21 }
 0x11c   : > { %v679_v24 = vmul.f32 %v677_v22, %v648_v23  ;;  %v659_v25 = vmul.f32 %v657_v19, %v648_v23  ;;  %v669_v27 = vmul.f32 %v667_v20, %v648_v23  ;;  %v654_v41 = vmul.f32 %v652_v38, %v648_v23 }
 0x11e   : > { %681 = vrot.lane.b32.xlu0 %v679_v24, %s4373_s20  ;;  %661 = vrot.lane.b32.xlu1 %v659_v25, %s4374_s24  ;;  %s4378_s24 = smov 1   ;;  %s4406_s20 = smov 125  }
 0x122   : > { %704 = vperm.xlu0 %2990, %v603_v26   ;;  %671 = vrot.lane.b32.xlu1 %v669_v27, %s4380_s27  ;;  %s4405_s27 = smov 3  }
 0x126   : > { %713 = vperm.xlu1 %2991, %v603_v26   ;;  %2993 = vset.pattern.permute.xlu0 %v3172_v5 }
 0x127   : > { %739 = vperm.xlu0 %2993, %v603_v26  }
 0x12a   : > { %2992 = vset.pattern.permute.xlu1 %v3171_v4 }
 0x12b   : > { %726 = vperm.xlu1 %2992, %v603_v26   ;;  %2995 = vset.pattern.permute.xlu0 %v3169_v2  ;;  %v688_v39 = vpop.permute.xlu0 %687 }
 0x12c   : > { %753 = vperm.xlu0 %2995, %v604_v28  }
 0x12f   : > { %2994 = vset.pattern.permute.xlu1 %v3169_v2 }
 0x130   : > { %817 = vperm.xlu1 %2994, %v606_v32   ;;  %876 = vbcast.lane.b32.xlu0 %v874_v30, 256  ;;  %v841_v30 = vunpack.c.l.s4 %v3177_v29 }
 0x131   : > { %3000 = vset.pattern.permute.xlu0 %v3170_v3 }
 0x132   : > { %v842_v32 = vunpack.c.0.s8 %v841_v30 }
 0x134   : > { %827 = vperm.xlu1 %2994, %v607_v35   ;;  %883 = vbcast.lane.b32.xlu0 %v881_v33, 256 }
 0x138   : > { %2996 = vset.pattern.permute.xlu1 %v3170_v3  ;;  %890 = vbcast.lane.b32.xlu0 %v888_v36, 256 }
 0x139   : > { %762 = vperm.xlu1 %2996, %v604_v28  }
 0x13d   : > { %869 = vbcast.lane.b32.xlu1 %v867_v37, 256  ;;  %v3421_v37 = vsub.s32 %v842_v32, %v3348_v7 }
 0x13e   : > { %2997 = vset.pattern.permute.xlu1 %v3171_v4 }
 0x141   : > { %772 = vperm.xlu1 %2997, %v604_v28  }
 0x145   : > { %2998 = vset.pattern.permute.xlu1 %v3172_v5 }
 0x146   : > { %782 = vperm.xlu1 %2998, %v604_v28  }
 0x14a   : > { %2999 = vset.pattern.permute.xlu1 %v3169_v2 }
 0x190   : > { %v662_v40 = vpop.permute.xlu1 %661  ;;  %v682_v45 = vpop.permute.xlu0 %681 }
 0x191   : > { %v664_v42 = vadd.f32 %v662_v40, %v654_v41 }
 0x194   : > { %v672_v43 = vpop.permute.xlu1 %671 }
 0x195   : > { %v674_v44 = vadd.f32 %v672_v43, %v664_v42 }
 0x197   : > { %v684_v46 = vadd.f32 %v682_v45, %v674_v44 }
 0x199   : > { %v690_v47 = vadd.f32 %v688_v39, %v684_v46 }
 0x19b   : > { %v691_v48 = vand.u32 2147483647, %v690_v47  ;;  %vm695_vm1 = vcmp.ge.f32.partialorder %v690_v47, 0.0 }
 0x19d   : > { %v692_v49 = vsub.f32 0.0, %v691_v48 }
 0x19f   : > { %v693_v50 = vmul.f32 1.442695, %v692_v49 }
 0x1a1   : > { %3065 = vpow2.f32 %v693_v50  ;;  %v705_v54 = vpop.permute.xlu0 %704 }
 0x1a2   : > { %v710_v0 = vrot.slane %v705_v54, %v3354_v8 }
 0x1a5   : > { %v714_v53 = vpop.permute.xlu1 %713 }
 0x1a6   : > { %v740_v58 = vpop.permute.xlu0 %739  ;;  %v719_v62 = vrot.slane %v714_v53, %v3354_v8 }
 0x1a7   : > { %v745_v63 = vrot.slane %v740_v58, %v3354_v8 }
 0x1aa   : > { %v727_v57 = vpop.permute.xlu1 %726 }
 0x1ab   : > { %v3066_v51 = vpop.eup %3065  ;;  %v732_v59 = vrot.slane %v727_v57, %v3354_v8  ;;  %v754_v33 = vpop.permute.xlu0 %753 }
 0x1ac   : > { %v696_v52 = vadd.f32 1.0, %v3066_v51 }
 0x1ae   : > { %3067 = vrcp.f32 %v696_v52 }
 0x1af   : > { %v818_v19 = vpop.permute.xlu1 %817  ;;  %v877_v38 = vpop.permute.xlu0 %876 }
 0x1b3   : > { %v828_v23 = vpop.permute.xlu1 %827  ;;  %v884_v45 = vpop.permute.xlu0 %883 }
 0x1b8   : > { %v3068_v55 = vpop.eup %3067  ;;  %v763_v35 = vpop.permute.xlu1 %762 }
 0x1b9   : > { %v699_v56 = vmul.f32 %v3068_v55, %v3066_v51 }
 0x1bb   : > { %v700_v60 = vsel %vm695_vm1, %v3068_v55, %v699_v56  ;;  %vm1411_vm1 = vcmask 121856  }
 0x1bc   : > { %v3410_v61 = vmul.f32 %v700_v60, %v690_v47  ;;  %v870_v41 = vpop.permute.xlu1 %869 }
 0x1be   : > { %v720_v1 = vmul.f32 %v719_v62, %v3410_v61  ;;  %v733_v6 = vmul.f32 %v732_v59, %v3410_v61  ;;  %v711_v10 = vmul.f32 %v710_v0, %v3410_v61  ;;  %v746_v14 = vmul.f32 %v745_v63, %v3410_v61  ;;  %v891_v62 = vpop.permute.xlu0 %890 }
 0x1bf   : > { %v3427_v46 = vrot.slane %v3410_v61, %v3357_v9  ;;  %v3434_v50 = vrot.slane %v3410_v61, %v3354_v8  ;;  %v3442_v60 = vrot.slane %v3410_v61, %v3389_v31 }
 0x1c0   : > { %v722_v11 = vrot.slane %v720_v1, 1  ;;  %v735_v16 = vrot.slane %v733_v6, 2  ;;  %v748_v18 = vrot.slane %v746_v14, 3  ;;  %v773_v53 = vpop.permute.xlu1 %772 }
 0x1c1   : > { %v769_v57 = vmul.f32 %v3427_v46, %v763_v35  ;;  %v760_v63 = vmul.f32 %v3434_v50, %v754_v33 }
 0x1c2   : > { %v724_v15 = vadd.f32 %v722_v11, %v711_v10 }
 0x1c4   : > { %v737_v17 = vadd.f32 %v735_v16, %v724_v15  ;;  %v779_v16 = vmul.f32 %v3442_v60, %v773_v53 }
 0x1c6   : > { %v750_v20 = vadd.f32 %v748_v18, %v737_v17  ;;  %v783_v17 = vpop.permute.xlu1 %782  ;;  %v3449_v18 = vrot.slane %v3410_v61, %v3397_v34 }
 0x1c8   : > { %v823_v21 = vrot.slane %v750_v20, %v3354_v8  ;;  %v770_v20 = vadd.f32 %v769_v57, %v760_v63 }
 0x1ca   : > { %v824_v22 = vmul.f32 %v823_v21, %v818_v19 }
 0x1cc   : > { %v830_v24 = vadd.f32 %v828_v23, %v824_v22  ;;  %v789_v22 = vmul.f32 %v3449_v18, %v783_v17 }
 0x1ce   : > { %v831_v25 = vmin.f32 %v830_v24, 20.0  ;;  %vm832_vm2 = vcmp.gt.f32.partialorder %v830_v24, 20.0 }
 0x1d0   : > { %v833_v26 = vmul.f32 1.442695, %v831_v25 }
 0x1d2   : > { %3069 = vpow2.f32 %v833_v26  ;;  %v780_v26 = vadd.f32 %v779_v16, %v770_v20 }
 0x1dc   : > { %v3070_v27 = vpop.eup %3069 }
 0x1dd   : > { %v835_v28 = vadd.f32 1.0, %v3070_v27  ;;  %v790_v27 = vadd.f32 %v789_v22, %v780_v26 }
 0x1df   : > { %3071 = vlog2.f32 %v835_v28 }
 0x1e9   : > { %v3072_v36 = vpop.eup %3071 }
 0x1ea   : > { %v837_v39 = vmul.f32 0.6931472, %v3072_v36 }
 0x1ec   : > { %v838_v40 = vsel %vm832_vm2, %v830_v24, %v837_v39  ;;  %vm1420_vm2 = vcmask 130048  }
 0x1ed   : > { %v846_v42 = vrot.slane %v838_v40, %v3421_v37  ;;  %v924_v48 = vmul.f32 %v838_v40, %v3410_v61 }
 0x1ef   : > { %v854_v43 = vrot.slane %v846_v42, %v3421_v37  ;;  %v847_v44 = vcombine.high %v846_v42, %v846_v42  ;;  %v932_v59 = vrot.slane %v924_v48, %v3421_v37 }
 0x1f1   : > { %v895_v47 = vrot.slane %v854_v43, %v3354_v8  ;;  %v861_v49 = vrot.slane %v847_v44, %v3421_v37  ;;  %v862_v51 = vcombine.high %v854_v43, %v854_v43  ;;  %v933_v15 = vcombine.high %v932_v59, %v932_v59 }
 0x1f2   : > { %v940_v19 = vrot.slane %v932_v59, %v3421_v37 }
 0x1f3   : > { %v912_v52 = vmul.f32 %v895_v47, %v870_v41  ;;  %v899_v54 = vrot.slane %v861_v49, %v3354_v8  ;;  %v903_v55 = vrot.slane %v862_v51, %v3354_v8  ;;  %v863_v56 = vcombine.high %v861_v49, %v861_v49 }
 0x1f4   : > { %v947_v23 = vrot.slane %v933_v15, %v3421_v37  ;;  %v948_v24 = vcombine.high %v940_v19, %v940_v19  ;;  %v953_v25 = vrot.slane %v940_v19, %v3354_v8 }
 0x1f5   : > { %v916_v58 = vmul.f32 1.442695, %v912_v52  ;;  %v913_v0 = vmul.f32 %v899_v54, %v877_v38  ;;  %v914_v1 = vmul.f32 %v903_v55, %v884_v45  ;;  %v907_v6 = vrot.slane %v863_v56, %v3354_v8 }
 0x1f6   : > { %v949_v29 = vcombine.high %v947_v23, %v947_v23  ;;  %v957_v30 = vrot.slane %v947_v23, %v3354_v8  ;;  %v961_v32 = vrot.slane %v948_v24, %v3354_v8  ;;  %v3459_v33 = vmul.f32 %v953_v25, %v790_v27 }
 0x1f7   : > { %3073 = vpow2.f32 %v916_v58  ;;  %v918_v10 = vmul.f32 1.442695, %v913_v0  ;;  %v920_v11 = vmul.f32 1.442695, %v914_v1  ;;  %v915_v14 = vmul.f32 %v907_v6, %v891_v62 }
 0x1f8   : > { %v965_v40 = vrot.slane %v949_v29, %v3354_v8  ;;  %v3468_v41 = vmul.f32 %v957_v30, %v790_v27  ;;  %v3473_v44 = vmul.f32 %v961_v32, %v790_v27 }
 0x1f9   : > { %3075 = vpow2.f32 %v918_v10  ;;  %v922_v21 = vmul.f32 1.442695, %v915_v14 }
 0x1fa   : > { %3077 = vpow2.f32 %v920_v11  ;;  %v3480_v51 = vmul.f32 %v965_v40, %v790_v27 }
 0x1fb   : > { %3079 = vpow2.f32 %v922_v21 }
 0x201   : > { %v3455_v28 = vpop.eup %3073 }
 0x202   : > { %v974_v35 = vmul.f32 0.0, %v3455_v28 }
 0x203   : > { %v3462_v36 = vpop.eup %3075 }
 0x204   : > { %v978_v38 = vadd.f32 %v974_v35, %v3459_v33  ;;  %v3465_v39 = vpop.eup %3077  ;;  %v975_v42 = vmul.f32 0.0, %v3462_v36 }
 0x205   : > { %v3471_v43 = vpop.eup %3079  ;;  %v976_v45 = vmul.f32 0.0, %v3465_v39 }
 0x206   : > { %986 = vrot.lane.b32.xlu1 %v978_v38, %s4378_s24  ;;  %v979_v47 = vadd.f32 %v975_v42, %v3468_v41  ;;  %v977_v48 = vmul.f32 0.0, %v3471_v43 }
 0x207   : > { %v980_v49 = vadd.f32 %v976_v45, %v3473_v44 }
 0x208   : > { %988 = vrot.lane.b32.xlu0 %v979_v47, %s4378_s24  ;;  %v981_v52 = vadd.f32 %v977_v48, %v3480_v51 }
 0x20a   : > { %990 = vrot.lane.b32.xlu1 %v980_v49, %s4378_s24 }
 0x20c   : > { %992 = vrot.lane.b32.xlu0 %v981_v52, %s4378_s24 }
 0x278   : > { %v987_v53 = vpop.permute.xlu1 %986 }
 0x279   : > { %v998_v54 = vmul.f32 %v3455_v28, %v987_v53 }
 0x27a   : > { %v989_v56 = vpop.permute.xlu0 %988 }
 0x27b   : > { %v1002_v55 = vadd.f32 %v998_v54, %v3459_v33  ;;  %v999_v57 = vmul.f32 %v3462_v36, %v989_v56 }
 0x27c   : > { %v991_v58 = vpop.permute.xlu1 %990 }
 0x27d   : > { %v1000_v59 = vmul.f32 %v3465_v39, %v991_v58  ;;  %1010 = vrot.lane.b32.xlu1 %v1002_v55, %s4378_s24  ;;  %v1003_v62 = vadd.f32 %v999_v57, %v3468_v41  ;;  %v1343_v16 = vsel %vm1342_vm3, %v978_v38, %v1002_v55 }
 0x27e   : > { %v993_v0 = vpop.permute.xlu0 %992 }
 0x27f   : > { %v1004_v63 = vadd.f32 %v1000_v59, %v3473_v44  ;;  %v1001_v1 = vmul.f32 %v3471_v43, %v993_v0  ;;  %1012 = vrot.lane.b32.xlu0 %v1003_v62, %s4378_s24  ;;  %v1344_v23 = vsel %vm1342_vm3, %v979_v47, %v1003_v62 }
 0x281   : > { %1014 = vrot.lane.b32.xlu1 %v1004_v63, %s4378_s24  ;;  %v1005_v6 = vadd.f32 %v1001_v1, %v3480_v51  ;;  %v1345_v26 = vsel %vm1342_vm3, %v980_v49, %v1004_v63 }
 0x283   : > { %1016 = vrot.lane.b32.xlu0 %v1005_v6, %s4378_s24  ;;  %v1346_v35 = vsel %vm1342_vm3, %v981_v52, %v1005_v6 }
 0x2ef   : > { %v1011_v10 = vpop.permute.xlu1 %1010 }
 0x2f0   : > { %v1022_v11 = vmul.f32 %v3455_v28, %v1011_v10 }
 0x2f1   : > { %v1013_v15 = vpop.permute.xlu0 %1012 }
 0x2f2   : > { %v1026_v14 = vadd.f32 %v1022_v11, %v3459_v33  ;;  %v1023_v17 = vmul.f32 %v3462_v36, %v1013_v15 }
 0x2f3   : > { %v1015_v19 = vpop.permute.xlu1 %1014 }
 0x2f4   : > { %v1348_v20 = vsel %vm1347_vm4, %v1343_v16, %v1026_v14  ;;  %v1024_v21 = vmul.f32 %v3465_v39, %v1015_v19  ;;  %1034 = vrot.lane.b32.xlu1 %v1026_v14, %s4378_s24  ;;  %v1027_v22 = vadd.f32 %v1023_v17, %v3468_v41 }
 0x2f5   : > { %v1017_v25 = vpop.permute.xlu0 %1016 }
 0x2f6   : > { %v1028_v24 = vadd.f32 %v1024_v21, %v3473_v44  ;;  %v1349_v27 = vsel %vm1347_vm4, %v1344_v23, %v1027_v22  ;;  %v1025_v29 = vmul.f32 %v3471_v43, %v1017_v25  ;;  %1036 = vrot.lane.b32.xlu0 %v1027_v22, %s4378_s24 }
 0x2f8   : > { %v1350_v30 = vsel %vm1347_vm4, %v1345_v26, %v1028_v24  ;;  %1038 = vrot.lane.b32.xlu1 %v1028_v24, %s4378_s24  ;;  %v1029_v32 = vadd.f32 %v1025_v29, %v3480_v51 }
 0x2fa   : > { %v1351_v38 = vsel %vm1347_vm4, %v1346_v35, %v1029_v32  ;;  %1040 = vrot.lane.b32.xlu0 %v1029_v32, %s4378_s24 }
 0x366   : > { %v1035_v40 = vpop.permute.xlu1 %1034 }
 0x367   : > { %v1046_v42 = vmul.f32 %v3455_v28, %v1035_v40 }
 0x368   : > { %v1037_v47 = vpop.permute.xlu0 %1036 }
 0x369   : > { %v1050_v45 = vadd.f32 %v1046_v42, %v3459_v33  ;;  %v1047_v48 = vmul.f32 %v3462_v36, %v1037_v47 }
 0x36a   : > { %v1039_v49 = vpop.permute.xlu1 %1038 }
 0x36b   : > { %v1352_v53 = vsel %vm647_vm0, %v1348_v20, %v1050_v45  ;;  %v1048_v54 = vmul.f32 %v3465_v39, %v1039_v49  ;;  %1058 = vrot.lane.b32.xlu1 %v1050_v45, %s4378_s24  ;;  %v1051_v52 = vadd.f32 %v1047_v48, %v3468_v41 }
 0x36c   : > { %v1041_v56 = vpop.permute.xlu0 %1040 }
 0x36d   : > { %v1052_v55 = vadd.f32 %v1048_v54, %v3473_v44  ;;  %v1353_v57 = vsel %vm647_vm0, %v1349_v27, %v1051_v52  ;;  %v1049_v58 = vmul.f32 %v3471_v43, %v1041_v56  ;;  %1060 = vrot.lane.b32.xlu0 %v1051_v52, %s4378_s24 }
 0x36f   : > { %v1354_v59 = vsel %vm647_vm0, %v1350_v30, %v1052_v55  ;;  %1062 = vrot.lane.b32.xlu1 %v1052_v55, %s4378_s24  ;;  %v1053_v62 = vadd.f32 %v1049_v58, %v3480_v51 }
 0x371   : > { %v1355_v63 = vsel %vm647_vm0, %v1351_v38, %v1053_v62  ;;  %1064 = vrot.lane.b32.xlu0 %v1053_v62, %s4378_s24 }
 0x3dd   : > { %v1059_v0 = vpop.permute.xlu1 %1058 }
 0x3de   : > { %v1070_v1 = vmul.f32 %v3455_v28, %v1059_v0 }
 0x3df   : > { %v1061_v10 = vpop.permute.xlu0 %1060 }
 0x3e0   : > { %v1074_v6 = vadd.f32 %v1070_v1, %v3459_v33  ;;  %v1071_v11 = vmul.f32 %v3462_v36, %v1061_v10 }
 0x3e1   : > { %v1063_v14 = vpop.permute.xlu1 %1062 }
 0x3e2   : > { %v1357_v15 = vsel %vm1356_vm5, %v1352_v53, %v1074_v6  ;;  %v1072_v16 = vmul.f32 %v3465_v39, %v1063_v14  ;;  %1082 = vrot.lane.b32.xlu1 %v1074_v6, %s4378_s24  ;;  %v1075_v17 = vadd.f32 %v1071_v11, %v3468_v41 }
 0x3e3   : > { %v1065_v20 = vpop.permute.xlu0 %1064 }
 0x3e4   : > { %v1076_v19 = vadd.f32 %v1072_v16, %v3473_v44  ;;  %v1358_v21 = vsel %vm1356_vm5, %v1353_v57, %v1075_v17  ;;  %v1073_v22 = vmul.f32 %v3471_v43, %v1065_v20  ;;  %1084 = vrot.lane.b32.xlu0 %v1075_v17, %s4378_s24 }
 0x3e6   : > { %v1359_v23 = vsel %vm1356_vm5, %v1354_v59, %v1076_v19  ;;  %1086 = vrot.lane.b32.xlu1 %v1076_v19, %s4378_s24  ;;  %v1077_v24 = vadd.f32 %v1073_v22, %v3480_v51 }
 0x3e8   : > { %v1360_v25 = vsel %vm1356_vm5, %v1355_v63, %v1077_v24  ;;  %1088 = vrot.lane.b32.xlu0 %v1077_v24, %s4378_s24 }
 0x454   : > { %v1083_v26 = vpop.permute.xlu1 %1082 }
 0x455   : > { %v1094_v27 = vmul.f32 %v3455_v28, %v1083_v26 }
 0x456   : > { %v1085_v30 = vpop.permute.xlu0 %1084 }
 0x457   : > { %v1098_v29 = vadd.f32 %v1094_v27, %v3459_v33  ;;  %v1095_v32 = vmul.f32 %v3462_v36, %v1085_v30 }
 0x458   : > { %v1087_v35 = vpop.permute.xlu1 %1086 }
 0x459   : > { %v1362_v38 = vsel %vm1361_vm6, %v1357_v15, %v1098_v29  ;;  %v1096_v40 = vmul.f32 %v3465_v39, %v1087_v35  ;;  %1106 = vrot.lane.b32.xlu1 %v1098_v29, %s4378_s24  ;;  %v1099_v42 = vadd.f32 %v1095_v32, %v3468_v41 }
 0x45a   : > { %v1089_v47 = vpop.permute.xlu0 %1088 }
 0x45b   : > { %v1100_v45 = vadd.f32 %v1096_v40, %v3473_v44  ;;  %v1363_v48 = vsel %vm1361_vm6, %v1358_v21, %v1099_v42  ;;  %v1097_v49 = vmul.f32 %v3471_v43, %v1089_v47  ;;  %1108 = vrot.lane.b32.xlu0 %v1099_v42, %s4378_s24 }
 0x45d   : > { %v1364_v53 = vsel %vm1361_vm6, %v1359_v23, %v1100_v45  ;;  %1110 = vrot.lane.b32.xlu1 %v1100_v45, %s4378_s24  ;;  %v1101_v54 = vadd.f32 %v1097_v49, %v3480_v51 }
 0x45f   : > { %v1365_v52 = vsel %vm1361_vm6, %v1360_v25, %v1101_v54  ;;  %1112 = vrot.lane.b32.xlu0 %v1101_v54, %s4378_s24 }
 0x4cb   : > { %v1107_v55 = vpop.permute.xlu1 %1106 }
 0x4cc   : > { %v1118_v56 = vmul.f32 %v3455_v28, %v1107_v55 }
 0x4cd   : > { %v1109_v58 = vpop.permute.xlu0 %1108 }
 0x4ce   : > { %v1122_v57 = vadd.f32 %v1118_v56, %v3459_v33  ;;  %v1119_v59 = vmul.f32 %v3462_v36, %v1109_v58 }
 0x4cf   : > { %v1111_v62 = vpop.permute.xlu1 %1110 }
 0x4d0   : > { %v1367_v63 = vsel %vm1366_vm7, %v1362_v38, %v1122_v57  ;;  %v1120_v0 = vmul.f32 %v3465_v39, %v1111_v62  ;;  %1130 = vrot.lane.b32.xlu1 %v1122_v57, %s4378_s24  ;;  %v1123_v1 = vadd.f32 %v1119_v59, %v3468_v41 }
 0x4d1   : > { %v1113_v10 = vpop.permute.xlu0 %1112 }
 0x4d2   : > { %v1124_v6 = vadd.f32 %v1120_v0, %v3473_v44  ;;  %v1368_v11 = vsel %vm1366_vm7, %v1363_v48, %v1123_v1  ;;  %v1121_v14 = vmul.f32 %v3471_v43, %v1113_v10  ;;  %1132 = vrot.lane.b32.xlu0 %v1123_v1, %s4378_s24 }
 0x4d4   : > { %v1369_v15 = vsel %vm1366_vm7, %v1364_v53, %v1124_v6  ;;  %1134 = vrot.lane.b32.xlu1 %v1124_v6, %s4378_s24  ;;  %v1125_v16 = vadd.f32 %v1121_v14, %v3480_v51 }
 0x4d6   : > { %v1370_v17 = vsel %vm1366_vm7, %v1365_v52, %v1125_v16  ;;  %1136 = vrot.lane.b32.xlu0 %v1125_v16, %s4378_s24 }
 0x542   : > { %v1131_v19 = vpop.permute.xlu1 %1130 }
 0x543   : > { %v1142_v20 = vmul.f32 %v3455_v28, %v1131_v19 }
 0x544   : > { %v1133_v22 = vpop.permute.xlu0 %1132 }
 0x545   : > { %v1146_v21 = vadd.f32 %v1142_v20, %v3459_v33  ;;  %v1143_v23 = vmul.f32 %v3462_v36, %v1133_v22 }
 0x546   : > { %v1135_v24 = vpop.permute.xlu1 %1134 }
 0x547   : > { %v1372_v25 = vsel %vm1371_vm8, %v1367_v63, %v1146_v21  ;;  %v1144_v26 = vmul.f32 %v3465_v39, %v1135_v24  ;;  %1154 = vrot.lane.b32.xlu1 %v1146_v21, %s4378_s24  ;;  %v1147_v27 = vadd.f32 %v1143_v23, %v3468_v41 }
 0x548   : > { %v1137_v30 = vpop.permute.xlu0 %1136 }
 0x549   : > { %v1148_v29 = vadd.f32 %v1144_v26, %v3473_v44  ;;  %v1373_v32 = vsel %vm1371_vm8, %v1368_v11, %v1147_v27  ;;  %v1145_v35 = vmul.f32 %v3471_v43, %v1137_v30  ;;  %1156 = vrot.lane.b32.xlu0 %v1147_v27, %s4378_s24 }
 0x54b   : > { %v1374_v38 = vsel %vm1371_vm8, %v1369_v15, %v1148_v29  ;;  %1158 = vrot.lane.b32.xlu1 %v1148_v29, %s4378_s24  ;;  %v1149_v40 = vadd.f32 %v1145_v35, %v3480_v51 }
 0x54d   : > { %v1375_v42 = vsel %vm1371_vm8, %v1370_v17, %v1149_v40  ;;  %1160 = vrot.lane.b32.xlu0 %v1149_v40, %s4378_s24 }
 0x5b9   : > { %v1155_v45 = vpop.permute.xlu1 %1154 }
 0x5ba   : > { %v1166_v47 = vmul.f32 %v3455_v28, %v1155_v45 }
 0x5bb   : > { %v1157_v49 = vpop.permute.xlu0 %1156 }
 0x5bc   : > { %v1170_v48 = vadd.f32 %v1166_v47, %v3459_v33  ;;  %v1167_v53 = vmul.f32 %v3462_v36, %v1157_v49 }
 0x5bd   : > { %v1159_v54 = vpop.permute.xlu1 %1158 }
 0x5be   : > { %v1377_v52 = vsel %vm1376_vm9, %v1372_v25, %v1170_v48  ;;  %v1168_v55 = vmul.f32 %v3465_v39, %v1159_v54  ;;  %1178 = vrot.lane.b32.xlu1 %v1170_v48, %s4378_s24  ;;  %v1171_v56 = vadd.f32 %v1167_v53, %v3468_v41 }
 0x5bf   : > { %v1161_v58 = vpop.permute.xlu0 %1160 }
 0x5c0   : > { %v1172_v57 = vadd.f32 %v1168_v55, %v3473_v44  ;;  %v1378_v59 = vsel %vm1376_vm9, %v1373_v32, %v1171_v56  ;;  %v1169_v62 = vmul.f32 %v3471_v43, %v1161_v58  ;;  %1180 = vrot.lane.b32.xlu0 %v1171_v56, %s4378_s24 }
 0x5c2   : > { %v1379_v63 = vsel %vm1376_vm9, %v1374_v38, %v1172_v57  ;;  %1182 = vrot.lane.b32.xlu1 %v1172_v57, %s4378_s24  ;;  %v1173_v0 = vadd.f32 %v1169_v62, %v3480_v51 }
 0x5c4   : > { %v1380_v1 = vsel %vm1376_vm9, %v1375_v42, %v1173_v0  ;;  %1184 = vrot.lane.b32.xlu0 %v1173_v0, %s4378_s24 }
 0x630   : > { %v1179_v6 = vpop.permute.xlu1 %1178 }
 0x631   : > { %v1190_v10 = vmul.f32 %v3455_v28, %v1179_v6 }
 0x632   : > { %v1181_v14 = vpop.permute.xlu0 %1180 }
 0x633   : > { %v1194_v11 = vadd.f32 %v1190_v10, %v3459_v33  ;;  %v1191_v15 = vmul.f32 %v3462_v36, %v1181_v14 }
 0x634   : > { %v1183_v16 = vpop.permute.xlu1 %1182 }
 0x635   : > { %v1382_v17 = vsel %vm1381_vm10, %v1377_v52, %v1194_v11  ;;  %v1192_v19 = vmul.f32 %v3465_v39, %v1183_v16  ;;  %1202 = vrot.lane.b32.xlu1 %v1194_v11, %s4378_s24  ;;  %v1195_v20 = vadd.f32 %v1191_v15, %v3468_v41 }
 0x636   : > { %v1185_v22 = vpop.permute.xlu0 %1184 }
 0x637   : > { %v1196_v21 = vadd.f32 %v1192_v19, %v3473_v44  ;;  %v1383_v23 = vsel %vm1381_vm10, %v1378_v59, %v1195_v20  ;;  %v1193_v24 = vmul.f32 %v3471_v43, %v1185_v22  ;;  %1204 = vrot.lane.b32.xlu0 %v1195_v20, %s4378_s24 }
 0x639   : > { %v1384_v25 = vsel %vm1381_vm10, %v1379_v63, %v1196_v21  ;;  %1206 = vrot.lane.b32.xlu1 %v1196_v21, %s4378_s24  ;;  %v1197_v26 = vadd.f32 %v1193_v24, %v3480_v51 }
 0x63b   : > { %v1385_v27 = vsel %vm1381_vm10, %v1380_v1, %v1197_v26  ;;  %1208 = vrot.lane.b32.xlu0 %v1197_v26, %s4378_s24 }
 0x6a7   : > { %v1203_v29 = vpop.permute.xlu1 %1202 }
 0x6a8   : > { %v1214_v30 = vmul.f32 %v3455_v28, %v1203_v29 }
 0x6a9   : > { %v1205_v35 = vpop.permute.xlu0 %1204 }
 0x6aa   : > { %v1218_v32 = vadd.f32 %v1214_v30, %v3459_v33  ;;  %v1215_v38 = vmul.f32 %v3462_v36, %v1205_v35 }
 0x6ab   : > { %v1207_v40 = vpop.permute.xlu1 %1206 }
 0x6ac   : > { %v1387_v42 = vsel %vm1386_vm11, %v1382_v17, %v1218_v32  ;;  %v1216_v45 = vmul.f32 %v3465_v39, %v1207_v40  ;;  %1226 = vrot.lane.b32.xlu1 %v1218_v32, %s4378_s24  ;;  %v1219_v47 = vadd.f32 %v1215_v38, %v3468_v41 }
 0x6ad   : > { %v1209_v49 = vpop.permute.xlu0 %1208 }
 0x6ae   : > { %v1220_v48 = vadd.f32 %v1216_v45, %v3473_v44  ;;  %v1388_v53 = vsel %vm1386_vm11, %v1383_v23, %v1219_v47  ;;  %v1217_v54 = vmul.f32 %v3471_v43, %v1209_v49  ;;  %1228 = vrot.lane.b32.xlu0 %v1219_v47, %s4378_s24 }
 0x6b0   : > { %v1389_v52 = vsel %vm1386_vm11, %v1384_v25, %v1220_v48  ;;  %1230 = vrot.lane.b32.xlu1 %v1220_v48, %s4378_s24  ;;  %v1221_v55 = vadd.f32 %v1217_v54, %v3480_v51 }
 0x6b2   : > { %v1390_v56 = vsel %vm1386_vm11, %v1385_v27, %v1221_v55  ;;  %1232 = vrot.lane.b32.xlu0 %v1221_v55, %s4378_s24 }
 0x71e   : > { %v1227_v57 = vpop.permute.xlu1 %1226 }
 0x71f   : > { %v1238_v58 = vmul.f32 %v3455_v28, %v1227_v57 }
 0x720   : > { %v1229_v62 = vpop.permute.xlu0 %1228 }
 0x721   : > { %v1242_v59 = vadd.f32 %v1238_v58, %v3459_v33  ;;  %v1239_v63 = vmul.f32 %v3462_v36, %v1229_v62 }
 0x722   : > { %v1231_v0 = vpop.permute.xlu1 %1230 }
 0x723   : > { %v1392_v1 = vsel %vm1391_vm12, %v1387_v42, %v1242_v59  ;;  %v1240_v6 = vmul.f32 %v3465_v39, %v1231_v0  ;;  %1250 = vrot.lane.b32.xlu1 %v1242_v59, %s4378_s24  ;;  %v1243_v10 = vadd.f32 %v1239_v63, %v3468_v41 }
 0x724   : > { %v1233_v14 = vpop.permute.xlu0 %1232 }
 0x725   : > { %v1244_v11 = vadd.f32 %v1240_v6, %v3473_v44  ;;  %v1393_v15 = vsel %vm1391_vm12, %v1388_v53, %v1243_v10  ;;  %v1241_v16 = vmul.f32 %v3471_v43, %v1233_v14  ;;  %1252 = vrot.lane.b32.xlu0 %v1243_v10, %s4378_s24  ;;  %v600_v10 = vld [vmem:[%s4403_s22] sm:$0xf] }
 0x726   : > { %v605_v14 = vld [vmem:[%s4404_s7] sm:$0xff] }
 0x727   : > { %v1394_v17 = vsel %vm1391_vm12, %v1389_v52, %v1244_v11  ;;  %1254 = vrot.lane.b32.xlu1 %v1244_v11, %s4378_s24  ;;  %v1245_v19 = vadd.f32 %v1241_v16, %v3480_v51 }
 0x729   : > { %v1395_v20 = vsel %vm1391_vm12, %v1390_v56, %v1245_v19  ;;  %1256 = vrot.lane.b32.xlu0 %v1245_v19, %s4378_s24 }
 0x795   : > { %v1251_v21 = vpop.permute.xlu1 %1250 }
 0x796   : > { %v1262_v22 = vmul.f32 %v3455_v28, %v1251_v21 }
 0x797   : > { %v1253_v24 = vpop.permute.xlu0 %1252 }
 0x798   : > { %v1266_v23 = vadd.f32 %v1262_v22, %v3459_v33  ;;  %v1263_v25 = vmul.f32 %v3462_v36, %v1253_v24 }
 0x799   : > { %v1255_v26 = vpop.permute.xlu1 %1254 }
 0x79a   : > { %v1397_v27 = vsel %vm1396_vm13, %v1392_v1, %v1266_v23  ;;  %v1264_v29 = vmul.f32 %v3465_v39, %v1255_v26  ;;  %1274 = vrot.lane.b32.xlu1 %v1266_v23, %s4378_s24  ;;  %v1267_v30 = vadd.f32 %v1263_v25, %v3468_v41 }
 0x79b   : > { %v1257_v35 = vpop.permute.xlu0 %1256 }
 0x79c   : > { %v1268_v32 = vadd.f32 %v1264_v29, %v3473_v44  ;;  %v1398_v38 = vsel %vm1396_vm13, %v1393_v15, %v1267_v30  ;;  %v1265_v40 = vmul.f32 %v3471_v43, %v1257_v35  ;;  %1276 = vrot.lane.b32.xlu0 %v1267_v30, %s4378_s24  ;;  %v609_v35 = vld [vmem:[%s4359_s11] sm:$0xf] }
 0x79e   : > { %v1399_v42 = vsel %vm1396_vm13, %v1394_v17, %v1268_v32  ;;  %1278 = vrot.lane.b32.xlu1 %v1268_v32, %s4378_s24  ;;  %v1269_v45 = vadd.f32 %v1265_v40, %v3480_v51  ;;  %v610_v40 = vld [vmem:[%s4360_s12] sm:$0x3] }
 0x7a0   : > { %v1400_v47 = vsel %vm1396_vm13, %v1395_v20, %v1269_v45  ;;  %1280 = vrot.lane.b32.xlu0 %v1269_v45, %s4378_s24  ;;  %v2913_v45 = vld [vmem:[%s4398_s23 + $0x4] sm:$0xf] }
 0x80c   : > { %v1275_v48 = vpop.permute.xlu1 %1274 }
 0x80d   : > { %v1286_v49 = vmul.f32 %v3455_v28, %v1275_v48 }
 0x80e   : > { %v1277_v54 = vpop.permute.xlu0 %1276 }
 0x80f   : > { %v1290_v53 = vadd.f32 %v1286_v49, %v3459_v33  ;;  %v1287_v52 = vmul.f32 %v3462_v36, %v1277_v54 }
 0x810   : > { %v1279_v55 = vpop.permute.xlu1 %1278 }
 0x811   : > { %v1402_v56 = vsel %vm1401_vm14, %v1397_v27, %v1290_v53  ;;  %v1288_v57 = vmul.f32 %v3465_v39, %v1279_v55  ;;  %1298 = vrot.lane.b32.xlu1 %v1290_v53, %s4378_s24  ;;  %v1291_v58 = vadd.f32 %v1287_v52, %v3468_v41 }
 0x812   : > { %v1281_v62 = vpop.permute.xlu0 %1280 }
 0x813   : > { %v1292_v59 = vadd.f32 %v1288_v57, %v3473_v44  ;;  %v1403_v63 = vsel %vm1401_vm14, %v1398_v38, %v1291_v58  ;;  %v1289_v0 = vmul.f32 %v3471_v43, %v1281_v62  ;;  %1300 = vrot.lane.b32.xlu0 %v1291_v58, %s4378_s24 }
 0x815   : > { %v1404_v1 = vsel %vm1401_vm14, %v1399_v42, %v1292_v59  ;;  %1302 = vrot.lane.b32.xlu1 %v1292_v59, %s4378_s24  ;;  %v1293_v6 = vadd.f32 %v1289_v0, %v3480_v51  ;;  %v2911_v42 = vld [vmem:[%s4397_s29 + $0x4] sm:$0xf] }
 0x817   : > { %v1405_v11 = vsel %vm1401_vm14, %v1400_v47, %v1293_v6  ;;  %1304 = vrot.lane.b32.xlu0 %v1293_v6, %s4378_s24 }
 0x819   : > { %633 = vperm.xlu1 %2999, %v600_v10  }
 0x81b   : > { %638 = vperm.xlu0 %3000, %v600_v10  }
 0x81d   : > { %793 = vperm.xlu1 %2999, %v605_v14  }
 0x81f   : > { %3002 = vset.pattern.permute.xlu0 %v3171_v4 }
 0x820   : > { %804 = vperm.xlu0 %3002, %v605_v14  }
 0x821   : > { %3001 = vset.pattern.permute.xlu1 %v3170_v3 }
 0x822   : > { %798 = vperm.xlu1 %3001, %v605_v14  }
 0x824   : > { %3005 = vset.pattern.permute.xlu0 %v3169_v2 }
 0x826   : > { %3003 = vset.pattern.permute.xlu1 %v3172_v5 }
 0x827   : > { %810 = vperm.xlu1 %3003, %v605_v14  }
 0x82b   : > { %3004 = vset.pattern.permute.xlu1 %v3169_v2 }
 0x883   : > { %v1299_v15 = vpop.permute.xlu1 %1298 }
 0x884   : > { %v1310_v16 = vmul.f32 %v3455_v28, %v1299_v15 }
 0x885   : > { %v1301_v19 = vpop.permute.xlu0 %1300 }
 0x886   : > { %v1314_v17 = vadd.f32 %v1310_v16, %v3459_v33  ;;  %v1311_v20 = vmul.f32 %v3462_v36, %v1301_v19 }
 0x887   : > { %v1303_v21 = vpop.permute.xlu1 %1302 }
 0x888   : > { %v3709_v22 = vsel %vm4382_vm15, %v1402_v56, %v1314_v17  ;;  %v1312_v23 = vmul.f32 %v3465_v39, %v1303_v21  ;;  %1322 = vrot.lane.b32.xlu1 %v1314_v17, %s4378_s24  ;;  %v1315_v24 = vadd.f32 %v1311_v20, %v3468_v41 }
 0x889   : > { %v1305_v26 = vpop.permute.xlu0 %1304 }
 0x88a   : > { %v1316_v25 = vadd.f32 %v1312_v23, %v3473_v44  ;;  %v3716_v27 = vsel %vm4382_vm15, %v1403_v63, %v1315_v24  ;;  %v1313_v29 = vmul.f32 %v3471_v43, %v1305_v26  ;;  %1324 = vrot.lane.b32.xlu0 %v1315_v24, %s4378_s24 }
 0x88c   : > { %v3721_v30 = vsel %vm4382_vm15, %v1404_v1, %v1316_v25  ;;  %1326 = vrot.lane.b32.xlu1 %v1316_v25, %s4378_s24  ;;  %v1317_v32 = vadd.f32 %v1313_v29, %v3480_v51 }
 0x88e   : > { %v3729_v38 = vsel %vm4382_vm15, %v1405_v11, %v1317_v32  ;;  %1328 = vrot.lane.b32.xlu0 %v1317_v32, %s4378_s24 }
 0x890   : > { %1451 = vperm.xlu1 %3004, %v609_v35  }
 0x892   : > { %1492 = vperm.xlu0 %3005, %v610_v40  }
 0x894   : > { %3006 = vset.pattern.permute.xlu1 %v3170_v3 }
 0x895   : > { %1501 = vperm.xlu1 %3006, %v610_v40  }
 0x896   : > { %3008 = vset.pattern.permute.xlu0 %v3172_v5 }
 0x897   : > { %1521 = vperm.xlu0 %3008, %v610_v40  }
 0x898   : > { %v634_v47 = vpop.permute.xlu1 %633 }
 0x899   : > { %3007 = vset.pattern.permute.xlu1 %v3171_v4  ;;  %v636_v49 = vmul.f32 %v634_v47, %v3360_v12 }
 0x89a   : > { %1511 = vperm.xlu1 %3007, %v610_v40   ;;  %v639_v48 = vpop.permute.xlu0 %638 }
 0x89b   : > { %3011 = vset.pattern.permute.xlu0 %v3170_v3  ;;  %v641_v53 = vmul.f32 %v639_v48, %v3363_v13 }
 0x89c   : > { %1598 = vperm.xlu0 %3011, %v2913_v45   ;;  %v794_v57 = vpop.permute.xlu1 %793 }
 0x89d   : > { %v3754_v54 = vadd.f32 %v641_v53, %v636_v49  ;;  %v796_v63 = vmul.f32 %v794_v57, %v3434_v50 }
 0x89e   : > { %3009 = vset.pattern.permute.xlu1 %v3169_v2 }
 0x89f   : > { %1556 = vperm.xlu1 %3009, %v2911_v42   ;;  %v1467_v52 = vand.u32 2147483647, %v3754_v54  ;;  %v805_v0 = vpop.permute.xlu0 %804  ;;  %vm1471_vm15 = vcmp.ge.f32.partialorder %v3754_v54, 0.0 }
 0x8a0   : > { %3015 = vset.pattern.permute.xlu0 %v3169_v2  ;;  %v807_v13 = vmul.f32 %v805_v0, %v3442_v60 }
 0x8a1   : > { %v1468_v55 = vsub.f32 0.0, %v1467_v52  ;;  %v799_v58 = vpop.permute.xlu1 %798 }
 0x8a2   : > { %v801_v59 = vmul.f32 %v799_v58, %v3427_v46 }
 0x8a3   : > { %3010 = vset.pattern.permute.xlu1 %v3170_v3  ;;  %v1469_v56 = vmul.f32 1.442695, %v1468_v55 }
 0x8a4   : > { %1565 = vperm.xlu1 %3010, %v2911_v42   ;;  %v802_v1 = vadd.f32 %v801_v59, %v796_v63 }
 0x8a5   : > { %3081 = vpow2.f32 %v1469_v56 }
 0x8a6   : > { %v811_v6 = vpop.permute.xlu1 %810  ;;  %v808_v10 = vadd.f32 %v807_v13, %v802_v1 }
 0x8a7   : > { %v813_v11 = vmul.f32 %v811_v6, %v3449_v18 }
 0x8a8   : > { %3012 = vset.pattern.permute.xlu1 %v3171_v4 }
 0x8a9   : > { %1608 = vperm.xlu1 %3012, %v2913_v45   ;;  %v814_v17 = vadd.f32 %v813_v11, %v808_v10 }
 0x8ad   : > { %3013 = vset.pattern.permute.xlu1 %v3172_v5 }
 0x8ae   : > { %1618 = vperm.xlu1 %3013, %v2913_v45  }
 0x8af   : > { %v3082_v62 = vpop.eup %3081 }
 0x8b0   : > { %v1472_v12 = vadd.f32 1.0, %v3082_v62 }
 0x8b2   : > { %3014 = vset.pattern.permute.xlu1 %v3169_v2  ;;  %3083 = vrcp.f32 %v1472_v12 }
 0x8b3   : > { %1593 = vperm.xlu1 %3014, %v2913_v45  }
 0x8b7   : > { %3016 = vset.pattern.permute.xlu1 %v3170_v3 }
 0x8bc   : > { %v3084_v32 = vpop.eup %3083 }
 0x8bd   : > { %v1475_v47 = vmul.f32 %v3084_v32, %v3082_v62 }
 0x8bf   : > { %v1476_v56 = vsel %vm1471_vm15, %v3084_v32, %v1475_v47 }
 0x8c0   : > { %v1477_v1 = vmul.f32 %v1476_v56, %v3754_v54 }
 0x8fa   : > { %v1323_v14 = vpop.permute.xlu1 %1322 }
 0x8fb   : > { %v1334_v15 = vmul.f32 %v3455_v28, %v1323_v14 }
 0x8fc   : > { %v1325_v46 = vpop.permute.xlu0 %1324 }
 0x8fd   : > { %v1338_v16 = vadd.f32 %v1334_v15, %v3459_v33  ;;  %v1335_v50 = vmul.f32 %v3462_v36, %v1325_v46 }
 0x8fe   : > { %v1327_v19 = vpop.permute.xlu1 %1326 }
 0x8ff   : > { %v1412_v20 = vsel %vm1411_vm1, %v3709_v22, %v1338_v16  ;;  %v1336_v60 = vmul.f32 %v3465_v39, %v1327_v19  ;;  %v1339_v18 = vadd.f32 %v1335_v50, %v3468_v41  ;;  %v1479_v50 = vrot.slane %v1477_v1, 1 }
 0x900   : > { %v1416_v21 = vmul.f32 %v1412_v20, %v814_v17  ;;  %v1329_v28 = vpop.permute.xlu0 %1328  ;;  %v1480_v19 = vrot.slane %v1477_v1, 2 }
 0x901   : > { %v1340_v23 = vadd.f32 %v1336_v60, %v3473_v44  ;;  %v1413_v33 = vsel %vm1411_vm1, %v3716_v27, %v1339_v18  ;;  %v1337_v36 = vmul.f32 %v3471_v43, %v1329_v28 }
 0x902   : > { %v1421_v24 = vsel %vm1420_vm2, %v1416_v21, 0.0  ;;  %v1417_v26 = vmul.f32 %v1413_v33, %v814_v17 }
 0x903   : > { %v1422_v25 = vrot.slane %v1421_v24, 4  ;;  %v1414_v22 = vsel %vm1411_vm1, %v3721_v30, %v1340_v23  ;;  %v1341_v39 = vadd.f32 %v1337_v36, %v3480_v51 }
 0x904   : > { %v1418_v29 = vmul.f32 %v1414_v22, %v814_v17  ;;  %v1428_v44 = vsel %vm1420_vm2, %v1417_v26, 0.0 }
 0x905   : > { %v1423_v41 = vadd.f32 %v1422_v25, %v1421_v24  ;;  %v1429_v35 = vrot.slane %v1428_v44, 4  ;;  %v1415_v27 = vsel %vm1411_vm1, %v3729_v38, %v1341_v39  ;;  %v1481_v24 = vrot.slane %v1477_v1, 3 }
 0x906   : > { %v1435_v40 = vsel %vm1420_vm2, %v1418_v29, 0.0  ;;  %v1419_v43 = vmul.f32 %v1415_v27, %v814_v17 }
 0x907   : > { %v1436_v42 = vrot.slane %v1435_v40, 4  ;;  %v1424_v45 = vrot.slane %v1423_v41, 2  ;;  %v1430_v48 = vadd.f32 %v1429_v35, %v1428_v44 }
 0x908   : > { %v1442_v51 = vsel %vm1420_vm2, %v1419_v43, 0.0 }
 0x909   : > { %v1437_v30 = vadd.f32 %v1436_v42, %v1435_v40  ;;  %v1425_v49 = vadd.f32 %v1424_v45, %v1423_v41  ;;  %v1443_v53 = vrot.slane %v1442_v51, 4  ;;  %v1431_v52 = vrot.slane %v1430_v48, 2 }
 0x90b   : > { %v1438_v55 = vrot.slane %v1437_v30, 2  ;;  %v1444_v57 = vadd.f32 %v1443_v53, %v1442_v51  ;;  %v1432_v58 = vadd.f32 %v1431_v52, %v1430_v48  ;;  %v1426_v59 = vrot.slane %v1425_v49, 1 }
 0x90d   : > { %v1439_v63 = vadd.f32 %v1438_v55, %v1437_v30  ;;  %v1433_v38 = vrot.slane %v1432_v58, 1  ;;  %v1445_v0 = vrot.slane %v1444_v57, 2  ;;  %v1427_v13 = vadd.f32 %v1426_v59, %v1425_v49  ;;  %v2914_v55 = vld [vmem:[%s4400_s4 + $0x4] sm:$0xf]  ;;  %s4409_s4 = smov 1  }
 0x90f   : > { %v1452_v62 = vpop.permute.xlu1 %1451  ;;  %v1440_v6 = vrot.slane %v1439_v63, 1  ;;  %v1446_v10 = vadd.f32 %v1445_v0, %v1444_v57  ;;  %v1434_v11 = vadd.f32 %v1433_v38, %v1432_v58 }
 0x910   : > { %v1454_v12 = vmul.f32 %v1452_v62, %v3410_v61 }
 0x911   : > { %v1441_v14 = vadd.f32 %v1440_v6, %v1439_v63  ;;  %v1447_v17 = vrot.slane %v1446_v10, 1  ;;  %v1493_v28 = vpop.permute.xlu0 %1492  ;;  %v2916_v6 = vld [vmem:[%s4402_s6 + $0x8] sm:$0xff] }
 0x912   : > { %v1456_v15 = vrot.slane %v1454_v12, 1  ;;  %v1463_v16 = vadd.f32 %v1454_v12, %v1427_v13  ;;  %v1457_v46 = vrot.slane %v1454_v12, 2  ;;  %v1458_v20 = vrot.slane %v1454_v12, 3  ;;  %v2920_v12 = vld [vmem:[%s4358_s10 + $0x4] sm:$0xf] }
 0x913   : > { %v1448_v54 = vadd.f32 %v1447_v17, %v1446_v10  ;;  %v1816_v13 = vrot.slane %v2920_v12, %v3357_v9  ;;  %v2918_v10 = vld [vmem:[%s4356_s8 + $0x4] sm:$0xf] }
 0x914   : > { %v1502_v60 = vpop.permute.xlu1 %1501  ;;  %v1464_v21 = vadd.f32 %v1456_v15, %v1434_v11  ;;  %v1486_v18 = vmul.f32 %v1477_v1, %v1463_v16  ;;  %v1465_v23 = vadd.f32 %v1457_v46, %v1441_v14  ;;  %v2915_v1 = vld [vmem:[%s4401_s5 + $0x1] sm:$0x1]  ;;  %v1823_v11 = vrot.slane %v2920_v12, %v3389_v31  ;;  %v2919_v14 = vld [vmem:[%s4357_s9 + $0x4] sm:$0xf] }
 0x915   : > { %v1466_v25 = vadd.f32 %v1458_v20, %v1448_v54  ;;  %v1830_v15 = vrot.slane %v2920_v12, %v3397_v34  ;;  %v1809_v16 = vrot.slane %v2920_v12, %v3354_v8 }
 0x916   : > { %v1487_v33 = vmul.f32 %v1479_v50, %v1464_v21  ;;  %v1498_v61 = vrot.slane %v1486_v18, %v3354_v8  ;;  %v1488_v36 = vmul.f32 %v1480_v19, %v1465_v23  ;;  %v1522_v35 = vpop.permute.xlu0 %1521 }
 0x917   : > { %v1489_v29 = vmul.f32 %v1481_v24, %v1466_v25 }
 0x918   : > { %v1507_v26 = vrot.slane %v1487_v33, %v3354_v8  ;;  %v1517_v22 = vrot.slane %v1488_v36, %v3354_v8  ;;  %v1499_v41 = vmul.f32 %v1498_v61, %v1493_v28 }
 0x919   : > { %v1512_v39 = vpop.permute.xlu1 %1511  ;;  %v1527_v44 = vrot.slane %v1489_v29, %v3354_v8 }
 0x91a   : > { %v1508_v32 = vmul.f32 %v1507_v26, %v1502_v60  ;;  %v1518_v27 = vmul.f32 %v1517_v22, %v1512_v39 }
 0x91b   : > { %v1528_v43 = vmul.f32 %v1527_v44, %v1522_v35  ;;  %v1599_v56 = vpop.permute.xlu0 %1598 }
 0x91c   : > { %v1509_v40 = vadd.f32 %v1508_v32, %v1499_v41 }
 0x91e   : > { %v1519_v42 = vadd.f32 %v1518_v27, %v1509_v40  ;;  %v1557_v45 = vpop.permute.xlu1 %1556 }
 0x920   : > { %v1529_v47 = vadd.f32 %v1528_v43, %v1519_v42 }
 0x922   : > { %v3789_v48 = vrot.slane %v1529_v47, %v3354_v8  ;;  %v3792_v30 = vrot.slane %v1529_v47, %v3357_v9 }
 0x923   : > { %v1566_v51 = vpop.permute.xlu1 %1565 }
 0x924   : > { %v1563_v49 = vmul.f32 %v3789_v48, %v1557_v45  ;;  %v1572_v53 = vmul.f32 %v3792_v30, %v1566_v51 }
 0x926   : > { %v1573_v52 = vadd.f32 %v1572_v53, %v1563_v49 }
 0x928   : > { %1587 = vrot.lane.b32.xlu0 %v1573_v52, %s4405_s27  ;;  %v1609_v57 = vpop.permute.xlu1 %1608  ;;  %s4408_s27 = smov 126  }
 0x92c   : > { %1629 = vperm.xlu0 %3015, %v2914_v55  }
 0x92d   : > { %v1619_v59 = vpop.permute.xlu1 %1618 }
 0x932   : > { %v1594_v46 = vpop.permute.xlu1 %1593 }
 0x99a   : > { %v1588_v58 = vpop.permute.xlu0 %1587 }
 0x99b   : > { %v1590_v63 = vsel %vm647_vm0, 0.0, %v1588_v58 }
 0x99c   : > { %v1601_v38 = vmul.f32 %v1599_v56, %v1590_v63  ;;  %v1621_v0 = vmul.f32 %v1619_v59, %v1590_v63  ;;  %v1611_v62 = vmul.f32 %v1609_v57, %v1590_v63  ;;  %v1596_v19 = vmul.f32 %v1594_v46, %v1590_v63 }
 0x99e   : > { %1623 = vrot.lane.b32.xlu0 %v1621_v0, %s4406_s20  ;;  %1603 = vrot.lane.b32.xlu1 %v1601_v38, %s4407_s28 }
 0x9a2   : > { %1646 = vperm.xlu0 %3015, %v2915_v1   ;;  %1613 = vrot.lane.b32.xlu1 %v1611_v62, %s4408_s27 }
 0x9a6   : > { %1655 = vperm.xlu1 %3016, %v2915_v1   ;;  %3018 = vset.pattern.permute.xlu0 %v3172_v5 }
 0x9a7   : > { %1681 = vperm.xlu0 %3018, %v2915_v1  }
 0x9aa   : > { %3017 = vset.pattern.permute.xlu1 %v3171_v4 }
 0x9ab   : > { %1668 = vperm.xlu1 %3017, %v2915_v1   ;;  %3020 = vset.pattern.permute.xlu0 %v3169_v2  ;;  %v1630_v17 = vpop.permute.xlu0 %1629 }
 0x9ac   : > { %1695 = vperm.xlu0 %3020, %v2916_v6  }
 0x9af   : > { %3019 = vset.pattern.permute.xlu1 %v3169_v2 }
 0x9b0   : > { %1759 = vperm.xlu1 %3019, %v2918_v10   ;;  %1818 = vbcast.lane.b32.xlu0 %v1816_v13, 256 }
 0x9b1   : > { %3025 = vset.pattern.permute.xlu0 %v3170_v3 }
 0x9b4   : > { %1769 = vperm.xlu1 %3019, %v2919_v14   ;;  %1825 = vbcast.lane.b32.xlu0 %v1823_v11, 256 }
 0x9b8   : > { %3021 = vset.pattern.permute.xlu1 %v3170_v3  ;;  %1832 = vbcast.lane.b32.xlu0 %v1830_v15, 256 }
 0x9b9   : > { %1704 = vperm.xlu1 %3021, %v2916_v6  }
 0x9bd   : > { %1811 = vbcast.lane.b32.xlu1 %v1809_v16, 256 }
 0x9be   : > { %3022 = vset.pattern.permute.xlu1 %v3171_v4 }
 0x9c1   : > { %1714 = vperm.xlu1 %3022, %v2916_v6  }
 0x9c5   : > { %3023 = vset.pattern.permute.xlu1 %v3172_v5 }
 0x9c6   : > { %1724 = vperm.xlu1 %3023, %v2916_v6  }
 0x9ca   : > { %3024 = vset.pattern.permute.xlu1 %v3169_v2 }
 0xa10   : > { %v1604_v50 = vpop.permute.xlu1 %1603  ;;  %v1624_v18 = vpop.permute.xlu0 %1623 }
 0xa11   : > { %v1606_v20 = vadd.f32 %v1604_v50, %v1596_v19 }
 0xa14   : > { %v1614_v60 = vpop.permute.xlu1 %1613 }
 0xa15   : > { %v1616_v21 = vadd.f32 %v1614_v60, %v1606_v20 }
 0xa17   : > { %v1626_v23 = vadd.f32 %v1624_v18, %v1616_v21 }
 0xa19   : > { %v1632_v54 = vadd.f32 %v1630_v17, %v1626_v23 }
 0xa1b   : > { %v1633_v28 = vand.u32 2147483647, %v1632_v54  ;;  %vm1637_vm15 = vcmp.ge.f32.partialorder %v1632_v54, 0.0 }
 0xa1d   : > { %v1634_v24 = vsub.f32 0.0, %v1633_v28 }
 0xa1f   : > { %v1635_v33 = vmul.f32 1.442695, %v1634_v24 }
 0xa21   : > { %3085 = vpow2.f32 %v1635_v33  ;;  %v1647_v26 = vpop.permute.xlu0 %1646 }
 0xa22   : > { %v1652_v42 = vrot.slane %v1647_v26, %v3354_v8 }
 0xa25   : > { %v1656_v25 = vpop.permute.xlu1 %1655 }
 0xa26   : > { %v1682_v32 = vpop.permute.xlu0 %1681  ;;  %v1661_v40 = vrot.slane %v1656_v25, %v3354_v8 }
 0xa27   : > { %v1687_v27 = vrot.slane %v1682_v32, %v3354_v8 }
 0xa2a   : > { %v1669_v39 = vpop.permute.xlu1 %1668 }
 0xa2b   : > { %v3086_v61 = vpop.eup %3085  ;;  %v1674_v41 = vrot.slane %v1669_v39, %v3354_v8  ;;  %v1696_v13 = vpop.permute.xlu0 %1695 }
 0xa2c   : > { %v1638_v36 = vadd.f32 1.0, %v3086_v61 }
 0xa2e   : > { %3087 = vrcp.f32 %v1638_v36 }
 0xa2f   : > { %v1760_v57 = vpop.permute.xlu1 %1759  ;;  %v1819_v14 = vpop.permute.xlu0 %1818 }
 0xa33   : > { %v1770_v38 = vpop.permute.xlu1 %1769  ;;  %v1826_v20 = vpop.permute.xlu0 %1825 }
 0xa37   : > { %v1833_v32 = vpop.permute.xlu0 %1832 }
 0xa38   : > { %v3088_v22 = vpop.eup %3087  ;;  %v1705_v10 = vpop.permute.xlu1 %1704 }
 0xa39   : > { %v1641_v29 = vmul.f32 %v3088_v22, %v3086_v61 }
 0xa3b   : > { %v1642_v44 = vsel %vm1637_vm15, %v3088_v22, %v1641_v29 }
 0xa3c   : > { %v3833_v35 = vmul.f32 %v1642_v44, %v1632_v54  ;;  %v1812_v46 = vpop.permute.xlu1 %1811 }
 0xa3e   : > { %v1662_v43 = vmul.f32 %v1661_v40, %v3833_v35  ;;  %v1675_v45 = vmul.f32 %v1674_v41, %v3833_v35  ;;  %v1653_v47 = vmul.f32 %v1652_v42, %v3833_v35  ;;  %v1688_v49 = vmul.f32 %v1687_v27, %v3833_v35 }
 0xa3f   : > { %v3847_v60 = vrot.slane %v3833_v35, %v3357_v9  ;;  %v3854_v54 = vrot.slane %v3833_v35, %v3354_v8  ;;  %v3862_v39 = vrot.slane %v3833_v35, %v3389_v31 }
 0xa40   : > { %v1664_v51 = vrot.slane %v1662_v43, 1  ;;  %v1677_v52 = vrot.slane %v1675_v45, 2  ;;  %v1690_v56 = vrot.slane %v1688_v49, 3  ;;  %v1715_v33 = vpop.permute.xlu1 %1714 }
 0xa41   : > { %v1711_v26 = vmul.f32 %v3847_v60, %v1705_v10  ;;  %v1702_v41 = vmul.f32 %v3854_v54, %v1696_v13 }
 0xa42   : > { %v1666_v53 = vadd.f32 %v1664_v51, %v1653_v47  ;;  %v1721_v51 = vmul.f32 %v3862_v39, %v1715_v33 }
 0xa44   : > { %v1679_v55 = vadd.f32 %v1677_v52, %v1666_v53  ;;  %v3869_v53 = vrot.slane %v3833_v35, %v3397_v34 }
 0xa45   : > { %v1725_v49 = vpop.permute.xlu1 %1724 }
 0xa46   : > { %v1692_v58 = vadd.f32 %v1690_v56, %v1679_v55  ;;  %v1712_v55 = vadd.f32 %v1711_v26, %v1702_v41 }
 0xa48   : > { %v1765_v59 = vrot.slane %v1692_v58, %v3354_v8 }
 0xa4a   : > { %v1766_v63 = vmul.f32 %v1765_v59, %v1760_v57  ;;  %v1731_v57 = vmul.f32 %v3869_v53, %v1725_v49 }
 0xa4c   : > { %v1772_v0 = vadd.f32 %v1770_v38, %v1766_v63  ;;  %v1722_v38 = vadd.f32 %v1721_v51, %v1712_v55 }
 0xa4e   : > { %v1773_v1 = vmin.f32 %v1772_v0, 20.0  ;;  %vm1774_vm15 = vcmp.gt.f32.partialorder %v1772_v0, 20.0 }
 0xa50   : > { %v1775_v62 = vmul.f32 1.442695, %v1773_v1 }
 0xa52   : > { %3089 = vpow2.f32 %v1775_v62 }
 0xa5c   : > { %v3090_v6 = vpop.eup %3089 }
 0xa5d   : > { %v1777_v12 = vadd.f32 1.0, %v3090_v6 }
 0xa5f   : > { %3091 = vlog2.f32 %v1777_v12 }
 0xa69   : > { %v3092_v11 = vpop.eup %3091 }
 0xa6a   : > { %v1779_v15 = vmul.f32 0.6931472, %v3092_v11 }
 0xa6c   : > { %v1780_v16 = vsel %vm1774_vm15, %v1772_v0, %v1779_v15  ;;  %v1732_v0 = vadd.f32 %v1731_v57, %v1722_v38 }
 0xa6d   : > { %v1788_v17 = vrot.slane %v1780_v16, %v3421_v37  ;;  %v1866_v18 = vmul.f32 %v1780_v16, %v3833_v35 }
 0xa6f   : > { %v1796_v50 = vrot.slane %v1788_v17, %v3421_v37  ;;  %v1789_v19 = vcombine.high %v1788_v17, %v1788_v17  ;;  %v1874_v29 = vrot.slane %v1866_v18, %v3421_v37 }
 0xa71   : > { %v1837_v21 = vrot.slane %v1796_v50, %v3354_v8  ;;  %v1803_v23 = vrot.slane %v1789_v19, %v3421_v37  ;;  %v1804_v28 = vcombine.high %v1796_v50, %v1796_v50  ;;  %v1875_v47 = vcombine.high %v1874_v29, %v1874_v29 }
 0xa72   : > { %v1882_v52 = vrot.slane %v1874_v29, %v3421_v37 }
 0xa73   : > { %v1854_v24 = vmul.f32 %v1837_v21, %v1812_v46  ;;  %v1841_v61 = vrot.slane %v1803_v23, %v3354_v8  ;;  %v1845_v36 = vrot.slane %v1804_v28, %v3354_v8  ;;  %v1805_v25 = vcombine.high %v1803_v23, %v1803_v23 }
 0xa74   : > { %v1889_v58 = vrot.slane %v1875_v47, %v3421_v37  ;;  %v1890_v59 = vcombine.high %v1882_v52, %v1882_v52  ;;  %v1895_v63 = vrot.slane %v1882_v52, %v3354_v8 }
 0xa75   : > { %v1858_v22 = vmul.f32 1.442695, %v1854_v24  ;;  %v1855_v44 = vmul.f32 %v1841_v61, %v1819_v14  ;;  %v1856_v40 = vmul.f32 %v1845_v36, %v1826_v20  ;;  %v1849_v27 = vrot.slane %v1805_v25, %v3354_v8 }
 0xa76   : > { %v1891_v62 = vcombine.high %v1889_v58, %v1889_v58  ;;  %v1899_v6 = vrot.slane %v1889_v58, %v3354_v8  ;;  %v1903_v12 = vrot.slane %v1890_v59, %v3354_v8  ;;  %v3879_v13 = vmul.f32 %v1895_v63, %v1732_v0 }
 0xa77   : > { %3093 = vpow2.f32 %v1858_v22  ;;  %v1860_v42 = vmul.f32 1.442695, %v1855_v44  ;;  %v1862_v43 = vmul.f32 1.442695, %v1856_v40  ;;  %v1857_v45 = vmul.f32 %v1849_v27, %v1833_v32 }
 0xa78   : > { %v1907_v15 = vrot.slane %v1891_v62, %v3354_v8  ;;  %v3888_v16 = vmul.f32 %v1899_v6, %v1732_v0  ;;  %v3893_v50 = vmul.f32 %v1903_v12, %v1732_v0 }
 0xa79   : > { %3095 = vpow2.f32 %v1860_v42  ;;  %v1864_v56 = vmul.f32 1.442695, %v1857_v45 }
 0xa7a   : > { %3097 = vpow2.f32 %v1862_v43  ;;  %v3900_v23 = vmul.f32 %v1907_v15, %v1732_v0 }
 0xa7b   : > { %3099 = vpow2.f32 %v1864_v56 }
 0xa81   : > { %v3875_v1 = vpop.eup %3093 }
 0xa82   : > { %v1916_v10 = vmul.f32 0.0, %v3875_v1 }
 0xa83   : > { %v3882_v11 = vpop.eup %3095 }
 0xa84   : > { %v1920_v37 = vadd.f32 %v1916_v10, %v3879_v13  ;;  %v3885_v14 = vpop.eup %3097  ;;  %v1917_v46 = vmul.f32 0.0, %v3882_v11 }
 0xa85   : > { %v3891_v17 = vpop.eup %3099  ;;  %v1918_v19 = vmul.f32 0.0, %v3885_v14 }
 0xa86   : > { %1928 = vrot.lane.b32.xlu1 %v1920_v37, %s4409_s4  ;;  %v1921_v20 = vadd.f32 %v1917_v46, %v3888_v16  ;;  %v1919_v21 = vmul.f32 0.0, %v3891_v17 }
 0xa87   : > { %v1922_v18 = vadd.f32 %v1918_v19, %v3893_v50 }
 0xa88   : > { %1930 = vrot.lane.b32.xlu0 %v1921_v20, %s4409_s4  ;;  %v1923_v28 = vadd.f32 %v1919_v21, %v3900_v23 }
 0xa8a   : > { %1932 = vrot.lane.b32.xlu1 %v1922_v18, %s4409_s4 }
 0xa8c   : > { %1934 = vrot.lane.b32.xlu0 %v1923_v28, %s4409_s4 }
 0xaf8   : > { %v1929_v24 = vpop.permute.xlu1 %1928 }
 0xaf9   : > { %v1940_v33 = vmul.f32 %v3875_v1, %v1929_v24 }
 0xafa   : > { %v1931_v36 = vpop.permute.xlu0 %1930 }
 0xafb   : > { %v1944_v61 = vadd.f32 %v1940_v33, %v3879_v13  ;;  %v1941_v25 = vmul.f32 %v3882_v11, %v1931_v36 }
 0xafc   : > { %v1933_v26 = vpop.permute.xlu1 %1932 }
 0xafd   : > { %v1942_v22 = vmul.f32 %v3885_v14, %v1933_v26  ;;  %1952 = vrot.lane.b32.xlu1 %v1944_v61, %s4409_s4  ;;  %v1945_v29 = vadd.f32 %v1941_v25, %v3888_v16  ;;  %v2284_v47 = vsel %vm1342_vm3, %v1920_v37, %v1944_v61 }
 0xafe   : > { %v1935_v41 = vpop.permute.xlu0 %1934 }
 0xaff   : > { %v1946_v32 = vadd.f32 %v1942_v22, %v3893_v50  ;;  %v1943_v44 = vmul.f32 %v3891_v17, %v1935_v41  ;;  %1954 = vrot.lane.b32.xlu0 %v1945_v29, %s4409_s4  ;;  %v2285_v57 = vsel %vm1342_vm3, %v1921_v20, %v1945_v29 }
 0xb01   : > { %1956 = vrot.lane.b32.xlu1 %v1946_v32, %s4409_s4  ;;  %v1947_v40 = vadd.f32 %v1943_v44, %v3900_v23  ;;  %v2286_v63 = vsel %vm1342_vm3, %v1922_v18, %v1946_v32 }
 0xb03   : > { %1958 = vrot.lane.b32.xlu0 %v1947_v40, %s4409_s4  ;;  %v2287_v12 = vsel %vm1342_vm3, %v1923_v28, %v1947_v40 }
 0xb6f   : > { %v1953_v27 = vpop.permute.xlu1 %1952 }
 0xb70   : > { %v1964_v42 = vmul.f32 %v3875_v1, %v1953_v27 }
 0xb71   : > { %v1955_v45 = vpop.permute.xlu0 %1954 }
 0xb72   : > { %v1968_v43 = vadd.f32 %v1964_v42, %v3879_v13  ;;  %v1965_v51 = vmul.f32 %v3882_v11, %v1955_v45 }
 0xb73   : > { %v1957_v49 = vpop.permute.xlu1 %1956 }
 0xb74   : > { %v2288_v52 = vsel %vm1347_vm4, %v2284_v47, %v1968_v43  ;;  %v1966_v55 = vmul.f32 %v3885_v14, %v1957_v49  ;;  %1976 = vrot.lane.b32.xlu1 %v1968_v43, %s4409_s4  ;;  %v1969_v56 = vadd.f32 %v1965_v51, %v3888_v16 }
 0xb75   : > { %v1959_v59 = vpop.permute.xlu0 %1958 }
 0xb76   : > { %v1970_v58 = vadd.f32 %v1966_v55, %v3893_v50  ;;  %v2289_v38 = vsel %vm1347_vm4, %v2285_v57, %v1969_v56  ;;  %v1967_v0 = vmul.f32 %v3891_v17, %v1959_v59  ;;  %1978 = vrot.lane.b32.xlu0 %v1969_v56, %s4409_s4 }
 0xb78   : > { %v2290_v62 = vsel %vm1347_vm4, %v2286_v63, %v1970_v58  ;;  %1980 = vrot.lane.b32.xlu1 %v1970_v58, %s4409_s4  ;;  %v1971_v6 = vadd.f32 %v1967_v0, %v3900_v23 }
 0xb7a   : > { %v2291_v10 = vsel %vm1347_vm4, %v2287_v12, %v1971_v6  ;;  %1982 = vrot.lane.b32.xlu0 %v1971_v6, %s4409_s4 }
 0xbe6   : > { %v1977_v37 = vpop.permute.xlu1 %1976 }
 0xbe7   : > { %v1988_v15 = vmul.f32 %v3875_v1, %v1977_v37 }
 0xbe8   : > { %v1979_v19 = vpop.permute.xlu0 %1978 }
 0xbe9   : > { %v1992_v46 = vadd.f32 %v1988_v15, %v3879_v13  ;;  %v1989_v20 = vmul.f32 %v3882_v11, %v1979_v19 }
 0xbea   : > { %v1981_v21 = vpop.permute.xlu1 %1980 }
 0xbeb   : > { %v2292_v18 = vsel %vm647_vm0, %v2288_v52, %v1992_v46  ;;  %v1990_v24 = vmul.f32 %v3885_v14, %v1981_v21  ;;  %2000 = vrot.lane.b32.xlu1 %v1992_v46, %s4409_s4  ;;  %v1993_v28 = vadd.f32 %v1989_v20, %v3888_v16 }
 0xbec   : > { %v1983_v61 = vpop.permute.xlu0 %1982 }
 0xbed   : > { %v1994_v33 = vadd.f32 %v1990_v24, %v3893_v50  ;;  %v2293_v36 = vsel %vm647_vm0, %v2289_v38, %v1993_v28  ;;  %v1991_v25 = vmul.f32 %v3891_v17, %v1983_v61  ;;  %2002 = vrot.lane.b32.xlu0 %v1993_v28, %s4409_s4 }
 0xbef   : > { %v2294_v26 = vsel %vm647_vm0, %v2290_v62, %v1994_v33  ;;  %2004 = vrot.lane.b32.xlu1 %v1994_v33, %s4409_s4  ;;  %v1995_v22 = vadd.f32 %v1991_v25, %v3900_v23 }
 0xbf1   : > { %v2295_v29 = vsel %vm647_vm0, %v2291_v10, %v1995_v22  ;;  %2006 = vrot.lane.b32.xlu0 %v1995_v22, %s4409_s4  ;;  %vm4410_vm0 = vcmask 113664  }
 0xbf2   : > { %vm4411_vm4 = vmmov %vm4410_vm0 }
 0xc5d   : > { %v2001_v32 = vpop.permute.xlu1 %2000 }
 0xc5e   : > { %v2012_v41 = vmul.f32 %v3875_v1, %v2001_v32 }
 0xc5f   : > { %v2003_v40 = vpop.permute.xlu0 %2002 }
 0xc60   : > { %v2016_v44 = vadd.f32 %v2012_v41, %v3879_v13  ;;  %v2013_v27 = vmul.f32 %v3882_v11, %v2003_v40 }
 0xc61   : > { %v2005_v42 = vpop.permute.xlu1 %2004 }
 0xc62   : > { %v2296_v43 = vsel %vm1356_vm5, %v2292_v18, %v2016_v44  ;;  %v2014_v45 = vmul.f32 %v3885_v14, %v2005_v42  ;;  %2024 = vrot.lane.b32.xlu1 %v2016_v44, %s4409_s4  ;;  %v2017_v47 = vadd.f32 %v2013_v27, %v3888_v16 }
 0xc63   : > { %v2007_v49 = vpop.permute.xlu0 %2006 }
 0xc64   : > { %v2018_v51 = vadd.f32 %v2014_v45, %v3893_v50  ;;  %v2297_v52 = vsel %vm1356_vm5, %v2293_v36, %v2017_v47  ;;  %v2015_v55 = vmul.f32 %v3891_v17, %v2007_v49  ;;  %2026 = vrot.lane.b32.xlu0 %v2017_v47, %s4409_s4 }
 0xc66   : > { %v2298_v56 = vsel %vm1356_vm5, %v2294_v26, %v2018_v51  ;;  %2028 = vrot.lane.b32.xlu1 %v2018_v51, %s4409_s4  ;;  %v2019_v57 = vadd.f32 %v2015_v55, %v3900_v23 }
 0xc68   : > { %v2299_v58 = vsel %vm1356_vm5, %v2295_v29, %v2019_v57  ;;  %2030 = vrot.lane.b32.xlu0 %v2019_v57, %s4409_s4  ;;  %vm4412_vm5 = vmmov %vm4410_vm0 }
 0xcd4   : > { %v2025_v59 = vpop.permute.xlu1 %2024 }
 0xcd5   : > { %v2036_v63 = vmul.f32 %v3875_v1, %v2025_v59 }
 0xcd6   : > { %v2027_v0 = vpop.permute.xlu0 %2026 }
 0xcd7   : > { %v2040_v38 = vadd.f32 %v2036_v63, %v3879_v13  ;;  %v2037_v62 = vmul.f32 %v3882_v11, %v2027_v0 }
 0xcd8   : > { %v2029_v6 = vpop.permute.xlu1 %2028 }
 0xcd9   : > { %v2300_v12 = vsel %vm1361_vm6, %v2296_v43, %v2040_v38  ;;  %v2038_v10 = vmul.f32 %v3885_v14, %v2029_v6  ;;  %2048 = vrot.lane.b32.xlu1 %v2040_v38, %s4409_s4  ;;  %v2041_v37 = vadd.f32 %v2037_v62, %v3888_v16 }
 0xcda   : > { %v2031_v46 = vpop.permute.xlu0 %2030 }
 0xcdb   : > { %v2042_v15 = vadd.f32 %v2038_v10, %v3893_v50  ;;  %v2301_v19 = vsel %vm1361_vm6, %v2297_v52, %v2041_v37  ;;  %v2039_v20 = vmul.f32 %v3891_v17, %v2031_v46  ;;  %2050 = vrot.lane.b32.xlu0 %v2041_v37, %s4409_s4 }
 0xcdd   : > { %v2302_v21 = vsel %vm1361_vm6, %v2298_v56, %v2042_v15  ;;  %2052 = vrot.lane.b32.xlu1 %v2042_v15, %s4409_s4  ;;  %v2043_v18 = vadd.f32 %v2039_v20, %v3900_v23 }
 0xcdf   : > { %v2303_v24 = vsel %vm1361_vm6, %v2299_v58, %v2043_v18  ;;  %2054 = vrot.lane.b32.xlu0 %v2043_v18, %s4409_s4  ;;  %vm4413_vm6 = vmmov %vm4410_vm0 }
 0xd4b   : > { %v2049_v28 = vpop.permute.xlu1 %2048 }
 0xd4c   : > { %v2060_v33 = vmul.f32 %v3875_v1, %v2049_v28 }
 0xd4d   : > { %v2051_v36 = vpop.permute.xlu0 %2050 }
 0xd4e   : > { %v2064_v61 = vadd.f32 %v2060_v33, %v3879_v13  ;;  %v2061_v25 = vmul.f32 %v3882_v11, %v2051_v36 }
 0xd4f   : > { %v2053_v26 = vpop.permute.xlu1 %2052 }
 0xd50   : > { %v2304_v22 = vsel %vm1366_vm7, %v2300_v12, %v2064_v61  ;;  %v2062_v29 = vmul.f32 %v3885_v14, %v2053_v26  ;;  %2072 = vrot.lane.b32.xlu1 %v2064_v61, %s4409_s4  ;;  %v2065_v32 = vadd.f32 %v2061_v25, %v3888_v16 }
 0xd51   : > { %v2055_v44 = vpop.permute.xlu0 %2054 }
 0xd52   : > { %v2066_v41 = vadd.f32 %v2062_v29, %v3893_v50  ;;  %v2305_v40 = vsel %vm1366_vm7, %v2301_v19, %v2065_v32  ;;  %v2063_v27 = vmul.f32 %v3891_v17, %v2055_v44  ;;  %2074 = vrot.lane.b32.xlu0 %v2065_v32, %s4409_s4 }
 0xd54   : > { %v2306_v42 = vsel %vm1366_vm7, %v2302_v21, %v2066_v41  ;;  %2076 = vrot.lane.b32.xlu1 %v2066_v41, %s4409_s4  ;;  %v2067_v43 = vadd.f32 %v2063_v27, %v3900_v23 }
 0xd56   : > { %v2307_v45 = vsel %vm1366_vm7, %v2303_v24, %v2067_v43  ;;  %2078 = vrot.lane.b32.xlu0 %v2067_v43, %s4409_s4 }
 0xdc2   : > { %v2073_v47 = vpop.permute.xlu1 %2072 }
 0xdc3   : > { %v2084_v51 = vmul.f32 %v3875_v1, %v2073_v47 }
 0xdc4   : > { %v2075_v52 = vpop.permute.xlu0 %2074 }
 0xdc5   : > { %v2088_v49 = vadd.f32 %v2084_v51, %v3879_v13  ;;  %v2085_v55 = vmul.f32 %v3882_v11, %v2075_v52 }
 0xdc6   : > { %v2077_v56 = vpop.permute.xlu1 %2076 }
 0xdc7   : > { %v2308_v57 = vsel %vm1371_vm8, %v2304_v22, %v2088_v49  ;;  %v2086_v58 = vmul.f32 %v3885_v14, %v2077_v56  ;;  %2096 = vrot.lane.b32.xlu1 %v2088_v49, %s4409_s4  ;;  %v2089_v59 = vadd.f32 %v2085_v55, %v3888_v16 }
 0xdc8   : > { %v2079_v38 = vpop.permute.xlu0 %2078 }
 0xdc9   : > { %v2090_v63 = vadd.f32 %v2086_v58, %v3893_v50  ;;  %v2309_v0 = vsel %vm1371_vm8, %v2305_v40, %v2089_v59  ;;  %v2087_v62 = vmul.f32 %v3891_v17, %v2079_v38  ;;  %2098 = vrot.lane.b32.xlu0 %v2089_v59, %s4409_s4 }
 0xdcb   : > { %v2310_v6 = vsel %vm1371_vm8, %v2306_v42, %v2090_v63  ;;  %2100 = vrot.lane.b32.xlu1 %v2090_v63, %s4409_s4  ;;  %v2091_v12 = vadd.f32 %v2087_v62, %v3900_v23 }
 0xdcd   : > { %v2311_v10 = vsel %vm1371_vm8, %v2307_v45, %v2091_v12  ;;  %2102 = vrot.lane.b32.xlu0 %v2091_v12, %s4409_s4  ;;  %vm2462_vm8 = vcmask 138240  }
 0xe39   : > { %v2097_v37 = vpop.permute.xlu1 %2096 }
 0xe3a   : > { %v2108_v15 = vmul.f32 %v3875_v1, %v2097_v37 }
 0xe3b   : > { %v2099_v19 = vpop.permute.xlu0 %2098 }
 0xe3c   : > { %v2112_v46 = vadd.f32 %v2108_v15, %v3879_v13  ;;  %v2109_v20 = vmul.f32 %v3882_v11, %v2099_v19 }
 0xe3d   : > { %v2101_v21 = vpop.permute.xlu1 %2100 }
 0xe3e   : > { %v2312_v18 = vsel %vm1376_vm9, %v2308_v57, %v2112_v46  ;;  %v2110_v24 = vmul.f32 %v3885_v14, %v2101_v21  ;;  %2120 = vrot.lane.b32.xlu1 %v2112_v46, %s4409_s4  ;;  %v2113_v28 = vadd.f32 %v2109_v20, %v3888_v16 }
 0xe3f   : > { %v2103_v61 = vpop.permute.xlu0 %2102 }
 0xe40   : > { %v2114_v33 = vadd.f32 %v2110_v24, %v3893_v50  ;;  %v2313_v36 = vsel %vm1376_vm9, %v2309_v0, %v2113_v28  ;;  %v2111_v25 = vmul.f32 %v3891_v17, %v2103_v61  ;;  %2122 = vrot.lane.b32.xlu0 %v2113_v28, %s4409_s4 }
 0xe42   : > { %v2314_v26 = vsel %vm1376_vm9, %v2310_v6, %v2114_v33  ;;  %2124 = vrot.lane.b32.xlu1 %v2114_v33, %s4409_s4  ;;  %v2115_v22 = vadd.f32 %v2111_v25, %v3900_v23 }
 0xe44   : > { %v2315_v29 = vsel %vm1376_vm9, %v2311_v10, %v2115_v22  ;;  %2126 = vrot.lane.b32.xlu0 %v2115_v22, %s4409_s4 }
 0xeb0   : > { %v2121_v32 = vpop.permute.xlu1 %2120 }
 0xeb1   : > { %v2132_v41 = vmul.f32 %v3875_v1, %v2121_v32 }
 0xeb2   : > { %v2123_v40 = vpop.permute.xlu0 %2122 }
 0xeb3   : > { %v2136_v44 = vadd.f32 %v2132_v41, %v3879_v13  ;;  %v2133_v27 = vmul.f32 %v3882_v11, %v2123_v40 }
 0xeb4   : > { %v2125_v42 = vpop.permute.xlu1 %2124 }
 0xeb5   : > { %v2316_v43 = vsel %vm1381_vm10, %v2312_v18, %v2136_v44  ;;  %v2134_v45 = vmul.f32 %v3885_v14, %v2125_v42  ;;  %2144 = vrot.lane.b32.xlu1 %v2136_v44, %s4409_s4  ;;  %v2137_v47 = vadd.f32 %v2133_v27, %v3888_v16 }
 0xeb6   : > { %v2127_v49 = vpop.permute.xlu0 %2126 }
 0xeb7   : > { %v2138_v51 = vadd.f32 %v2134_v45, %v3893_v50  ;;  %v2317_v52 = vsel %vm1381_vm10, %v2313_v36, %v2137_v47  ;;  %v2135_v55 = vmul.f32 %v3891_v17, %v2127_v49  ;;  %2146 = vrot.lane.b32.xlu0 %v2137_v47, %s4409_s4 }
 0xeb9   : > { %v2318_v56 = vsel %vm1381_vm10, %v2314_v26, %v2138_v51  ;;  %2148 = vrot.lane.b32.xlu1 %v2138_v51, %s4409_s4  ;;  %v2139_v57 = vadd.f32 %v2135_v55, %v3900_v23 }
 0xebb   : > { %v2319_v58 = vsel %vm1381_vm10, %v2315_v29, %v2139_v57  ;;  %2150 = vrot.lane.b32.xlu0 %v2139_v57, %s4409_s4 }
 0xf27   : > { %v2145_v59 = vpop.permute.xlu1 %2144 }
 0xf28   : > { %v2156_v63 = vmul.f32 %v3875_v1, %v2145_v59 }
 0xf29   : > { %v2147_v0 = vpop.permute.xlu0 %2146 }
 0xf2a   : > { %v2160_v38 = vadd.f32 %v2156_v63, %v3879_v13  ;;  %v2157_v62 = vmul.f32 %v3882_v11, %v2147_v0 }
 0xf2b   : > { %v2149_v6 = vpop.permute.xlu1 %2148 }
 0xf2c   : > { %v2320_v12 = vsel %vm1386_vm11, %v2316_v43, %v2160_v38  ;;  %v2158_v10 = vmul.f32 %v3885_v14, %v2149_v6  ;;  %2168 = vrot.lane.b32.xlu1 %v2160_v38, %s4409_s4  ;;  %v2161_v37 = vadd.f32 %v2157_v62, %v3888_v16 }
 0xf2d   : > { %v2151_v46 = vpop.permute.xlu0 %2150 }
 0xf2e   : > { %v2162_v15 = vadd.f32 %v2158_v10, %v3893_v50  ;;  %v2321_v19 = vsel %vm1386_vm11, %v2317_v52, %v2161_v37  ;;  %v2159_v20 = vmul.f32 %v3891_v17, %v2151_v46  ;;  %2170 = vrot.lane.b32.xlu0 %v2161_v37, %s4409_s4 }
 0xf30   : > { %v2322_v21 = vsel %vm1386_vm11, %v2318_v56, %v2162_v15  ;;  %2172 = vrot.lane.b32.xlu1 %v2162_v15, %s4409_s4  ;;  %v2163_v18 = vadd.f32 %v2159_v20, %v3900_v23 }
 0xf32   : > { %v2323_v24 = vsel %vm1386_vm11, %v2319_v58, %v2163_v18  ;;  %2174 = vrot.lane.b32.xlu0 %v2163_v18, %s4409_s4 }
 0xf9e   : > { %v2169_v28 = vpop.permute.xlu1 %2168 }
 0xf9f   : > { %v2180_v33 = vmul.f32 %v3875_v1, %v2169_v28 }
 0xfa0   : > { %v2171_v36 = vpop.permute.xlu0 %2170 }
 0xfa1   : > { %v2184_v61 = vadd.f32 %v2180_v33, %v3879_v13  ;;  %v2181_v25 = vmul.f32 %v3882_v11, %v2171_v36 }
 0xfa2   : > { %v2173_v26 = vpop.permute.xlu1 %2172 }
 0xfa3   : > { %v2324_v22 = vsel %vm1391_vm12, %v2320_v12, %v2184_v61  ;;  %v2182_v29 = vmul.f32 %v3885_v14, %v2173_v26  ;;  %2192 = vrot.lane.b32.xlu1 %v2184_v61, %s4409_s4  ;;  %v2185_v32 = vadd.f32 %v2181_v25, %v3888_v16 }
 0xfa4   : > { %v2175_v44 = vpop.permute.xlu0 %2174 }
 0xfa5   : > { %v2186_v41 = vadd.f32 %v2182_v29, %v3893_v50  ;;  %v2325_v40 = vsel %vm1391_vm12, %v2321_v19, %v2185_v32  ;;  %v2183_v27 = vmul.f32 %v3891_v17, %v2175_v44  ;;  %2194 = vrot.lane.b32.xlu0 %v2185_v32, %s4409_s4  ;;  %v2912_v29 = vld [vmem:[%s4403_s22 + $0x4] sm:$0xf] }
 0xfa7   : > { %v2326_v42 = vsel %vm1391_vm12, %v2322_v21, %v2186_v41  ;;  %2196 = vrot.lane.b32.xlu1 %v2186_v41, %s4409_s4  ;;  %v2187_v43 = vadd.f32 %v2183_v27, %v3900_v23  ;;  %v2917_v41 = vld [vmem:[%s4404_s7 + $0x8] sm:$0xff] }
 0xfa9   : > { %v2327_v45 = vsel %vm1391_vm12, %v2323_v24, %v2187_v43  ;;  %2198 = vrot.lane.b32.xlu0 %v2187_v43, %s4409_s4 }
0x1015   : > { %v2193_v47 = vpop.permute.xlu1 %2192 }
0x1016   : > { %v2204_v51 = vmul.f32 %v3875_v1, %v2193_v47 }
0x1017   : > { %v2195_v52 = vpop.permute.xlu0 %2194 }
0x1018   : > { %v2208_v49 = vadd.f32 %v2204_v51, %v3879_v13  ;;  %v2205_v55 = vmul.f32 %v3882_v11, %v2195_v52 }
0x1019   : > { %v2197_v56 = vpop.permute.xlu1 %2196 }
0x101a   : > { %v2328_v57 = vsel %vm1396_vm13, %v2324_v22, %v2208_v49  ;;  %v2206_v58 = vmul.f32 %v3885_v14, %v2197_v56  ;;  %2216 = vrot.lane.b32.xlu1 %v2208_v49, %s4409_s4  ;;  %v2209_v59 = vadd.f32 %v2205_v55, %v3888_v16 }
0x101b   : > { %v2199_v38 = vpop.permute.xlu0 %2198 }
0x101c   : > { %v2210_v63 = vadd.f32 %v2206_v58, %v3893_v50  ;;  %v2329_v0 = vsel %vm1396_vm13, %v2325_v40, %v2209_v59  ;;  %v2207_v62 = vmul.f32 %v3891_v17, %v2199_v38  ;;  %2218 = vrot.lane.b32.xlu0 %v2209_v59, %s4409_s4 }
0x101e   : > { %v2330_v6 = vsel %vm1396_vm13, %v2326_v42, %v2210_v63  ;;  %2220 = vrot.lane.b32.xlu1 %v2210_v63, %s4409_s4  ;;  %v2211_v12 = vadd.f32 %v2207_v62, %v3900_v23  ;;  %v2921_v63 = vld [vmem:[%s4359_s11 + $0x4] sm:$0xf]  ;;  %v2923_v62 = vld [vmem:[%s4361_s13 + $0x8] sm:$0xff] }
0x1020   : > { %v2331_v10 = vsel %vm1396_vm13, %v2327_v45, %v2211_v12  ;;  %2222 = vrot.lane.b32.xlu0 %v2211_v12, %s4409_s4  ;;  %v2464_v12 = vld [vmem:[%s4361_s13] sm:$0xff] }
0x108c   : > { %v2217_v37 = vpop.permute.xlu1 %2216 }
0x108d   : > { %v2228_v15 = vmul.f32 %v3875_v1, %v2217_v37 }
0x108e   : > { %v2219_v19 = vpop.permute.xlu0 %2218 }
0x108f   : > { %v2232_v46 = vadd.f32 %v2228_v15, %v3879_v13  ;;  %v2229_v20 = vmul.f32 %v3882_v11, %v2219_v19 }
0x1090   : > { %v2221_v21 = vpop.permute.xlu1 %2220 }
0x1091   : > { %v2332_v18 = vsel %vm1401_vm14, %v2328_v57, %v2232_v46  ;;  %v2230_v24 = vmul.f32 %v3885_v14, %v2221_v21  ;;  %2240 = vrot.lane.b32.xlu1 %v2232_v46, %s4409_s4  ;;  %v2233_v28 = vadd.f32 %v2229_v20, %v3888_v16 }
0x1092   : > { %v2223_v61 = vpop.permute.xlu0 %2222 }
0x1093   : > { %v2234_v33 = vadd.f32 %v2230_v24, %v3893_v50  ;;  %v2333_v36 = vsel %vm1401_vm14, %v2329_v0, %v2233_v28  ;;  %v2231_v25 = vmul.f32 %v3891_v17, %v2223_v61  ;;  %2242 = vrot.lane.b32.xlu0 %v2233_v28, %s4409_s4  ;;  %v2922_v0 = vld [vmem:[%s4360_s12 + $0x2] sm:$0x3] }
0x1095   : > { %v2334_v26 = vsel %vm1401_vm14, %v2330_v6, %v2234_v33  ;;  %2244 = vrot.lane.b32.xlu1 %v2234_v33, %s4409_s4  ;;  %v2235_v22 = vadd.f32 %v2231_v25, %v3900_v23  ;;  %v4167_v6 = vld [vmem:[%s4361_s13 + $0x10] sm:$0xff] }
0x1097   : > { %v2335_v32 = vsel %vm1401_vm14, %v2331_v10, %v2235_v22  ;;  %2246 = vrot.lane.b32.xlu0 %v2235_v22, %s4409_s4  ;;  %v2532_v10 = vld [vmem:[%s4362_s14] sm:$0xff] }
0x1099   : > { %1576 = vperm.xlu1 %3024, %v2912_v29  }
0x109b   : > { %1581 = vperm.xlu0 %3025, %v2912_v29  }
0x109d   : > { %1735 = vperm.xlu1 %3024, %v2917_v41  }
0x109f   : > { %3027 = vset.pattern.permute.xlu0 %v3171_v4 }
0x10a0   : > { %1746 = vperm.xlu0 %3027, %v2917_v41  }
0x10a1   : > { %3026 = vset.pattern.permute.xlu1 %v3170_v3 }
0x10a2   : > { %1740 = vperm.xlu1 %3026, %v2917_v41  }
0x10a4   : > { %3030 = vset.pattern.permute.xlu0 %v3169_v2 }
0x10a6   : > { %3028 = vset.pattern.permute.xlu1 %v3172_v5 }
0x10a7   : > { %1752 = vperm.xlu1 %3028, %v2917_v41  }
0x10ab   : > { %3029 = vset.pattern.permute.xlu1 %v3169_v2 }
0x1103   : > { %v2241_v44 = vpop.permute.xlu1 %2240 }
0x1104   : > { %v2252_v40 = vmul.f32 %v3875_v1, %v2241_v44 }
0x1105   : > { %v2243_v42 = vpop.permute.xlu0 %2242 }
0x1106   : > { %v2256_v27 = vadd.f32 %v2252_v40, %v3879_v13  ;;  %v2253_v43 = vmul.f32 %v3882_v11, %v2243_v42 }
0x1107   : > { %v2245_v45 = vpop.permute.xlu1 %2244 }
0x1108   : > { %v4129_v47 = vsel %vm4410_vm0, %v2332_v18, %v2256_v27  ;;  %v2254_v51 = vmul.f32 %v3885_v14, %v2245_v45  ;;  %2264 = vrot.lane.b32.xlu1 %v2256_v27, %s4409_s4  ;;  %v2257_v49 = vadd.f32 %v2253_v43, %v3888_v16 }
0x1109   : > { %v2247_v55 = vpop.permute.xlu0 %2246 }
0x110a   : > { %v2258_v52 = vadd.f32 %v2254_v51, %v3893_v50  ;;  %v4136_v56 = vsel %vm4411_vm4, %v2333_v36, %v2257_v49  ;;  %v2255_v57 = vmul.f32 %v3891_v17, %v2247_v55  ;;  %2266 = vrot.lane.b32.xlu0 %v2257_v49, %s4409_s4 }
0x110c   : > { %v4141_v58 = vsel %vm4412_vm5, %v2334_v26, %v2258_v52  ;;  %2268 = vrot.lane.b32.xlu1 %v2258_v52, %s4409_s4  ;;  %v2259_v59 = vadd.f32 %v2255_v57, %v3900_v23 }
0x110e   : > { %v4149_v38 = vsel %vm4413_vm6, %v2335_v32, %v2259_v59  ;;  %2270 = vrot.lane.b32.xlu0 %v2259_v59, %s4409_s4 }
0x1110   : > { %2378 = vperm.xlu1 %3029, %v2921_v63  }
0x1112   : > { %2419 = vperm.xlu0 %3030, %v2922_v0  }
0x1114   : > { %3031 = vset.pattern.permute.xlu1 %v3170_v3 }
0x1115   : > { %2428 = vperm.xlu1 %3031, %v2922_v0  }
0x1116   : > { %3033 = vset.pattern.permute.xlu0 %v3172_v5 }
0x1117   : > { %2448 = vperm.xlu0 %3033, %v2922_v0  }
0x1118   : > { %v1577_v15 = vpop.permute.xlu1 %1576 }
0x1119   : > { %3032 = vset.pattern.permute.xlu1 %v3171_v4  ;;  %v1579_v19 = vmul.f32 %v1577_v15, %v3789_v48 }
0x111a   : > { %2438 = vperm.xlu1 %3032, %v2922_v0   ;;  %v1582_v37 = vpop.permute.xlu0 %1581 }
0x111b   : > { %3037 = vset.pattern.permute.xlu0 %v3170_v3  ;;  %v1584_v46 = vmul.f32 %v1582_v37, %v3792_v30 }
0x111c   : > { %v1736_v28 = vpop.permute.xlu1 %1735 }
0x111d   : > { %v4181_v20 = vadd.f32 %v1584_v46, %v1579_v19  ;;  %v1738_v25 = vmul.f32 %v1736_v28, %v3854_v54 }
0x111e   : > { %3034 = vset.pattern.permute.xlu1 %v3169_v2 }
0x111f   : > { %2490 = vperm.xlu1 %3034, %v2923_v62   ;;  %v2394_v21 = vand.u32 2147483647, %v4181_v20  ;;  %v1747_v26 = vpop.permute.xlu0 %1746  ;;  %vm2398_vm7 = vcmp.ge.f32.partialorder %v4181_v20, 0.0 }
0x1120   : > { %v1749_v48 = vmul.f32 %v1747_v26, %v3862_v39 }
0x1121   : > { %v2395_v18 = vsub.f32 0.0, %v2394_v21  ;;  %v1741_v33 = vpop.permute.xlu1 %1740 }
0x1122   : > { %v1743_v61 = vmul.f32 %v1741_v33, %v3847_v60 }
0x1123   : > { %3035 = vset.pattern.permute.xlu1 %v3170_v3  ;;  %v2396_v24 = vmul.f32 1.442695, %v2395_v18 }
0x1124   : > { %2500 = vperm.xlu1 %3035, %v2923_v62   ;;  %v1744_v22 = vadd.f32 %v1743_v61, %v1738_v25 }
0x1125   : > { %3101 = vpow2.f32 %v2396_v24 }
0x1126   : > { %v1753_v29 = vpop.permute.xlu1 %1752  ;;  %v1750_v32 = vadd.f32 %v1749_v48, %v1744_v22 }
0x1127   : > { %v1755_v41 = vmul.f32 %v1753_v29, %v3869_v53 }
0x1128   : > { %3036 = vset.pattern.permute.xlu1 %v3169_v2 }
0x1129   : > { %2513 = vperm.xlu1 %3036, %v4167_v6   ;;  %v1756_v60 = vadd.f32 %v1755_v41, %v1750_v32 }
0x112d   : > { %2467 = vperm.xlu1 %3036, %v2464_v12  }
0x112f   : > { %v3102_v36 = vpop.eup %3101 }
0x1130   : > { %v2399_v30 = vadd.f32 1.0, %v3102_v36 }
0x1131   : > { %3038 = vset.pattern.permute.xlu1 %v3170_v3 }
0x1132   : > { %2477 = vperm.xlu1 %3038, %v2464_v12   ;;  %3103 = vrcp.f32 %v2399_v30 }
0x1136   : > { %3039 = vset.pattern.permute.xlu1 %v3169_v2 }
0x1137   : > { %2535 = vperm.xlu1 %3039, %v2532_v10  }
0x113c   : > { %v3104_v63 = vpop.eup %3103 }
0x113d   : > { %v2402_v37 = vmul.f32 %v3104_v63, %v3102_v36 }
0x113f   : > { %v2403_v24 = vsel %vm2398_vm7, %v3104_v63, %v2402_v37 }
0x1140   : > { %v2404_v22 = vmul.f32 %v2403_v24, %v4181_v20 }
0x117a   : > { %v2265_v44 = vpop.permute.xlu1 %2264 }
0x117b   : > { %v2276_v40 = vmul.f32 %v3875_v1, %v2265_v44 }
0x117c   : > { %v2267_v42 = vpop.permute.xlu0 %2266 }
0x117d   : > { %v2280_v27 = vadd.f32 %v2276_v40, %v3879_v13  ;;  %v2277_v43 = vmul.f32 %v3882_v11, %v2267_v42 }
0x117e   : > { %v2269_v54 = vpop.permute.xlu1 %2268 }
0x117f   : > { %v2340_v45 = vsel %vm1411_vm1, %v4129_v47, %v2280_v27  ;;  %v2278_v51 = vmul.f32 %v3885_v14, %v2269_v54  ;;  %v2281_v49 = vadd.f32 %v2277_v43, %v3888_v16  ;;  %v2406_v43 = vrot.slane %v2404_v22, 1 }
0x1180   : > { %v2344_v39 = vmul.f32 %v2340_v45, %v1756_v60  ;;  %v2271_v52 = vpop.permute.xlu0 %2270  ;;  %v2407_v54 = vrot.slane %v2404_v22, 2 }
0x1181   : > { %v2282_v53 = vadd.f32 %v2278_v51, %v3893_v50  ;;  %v2341_v13 = vsel %vm1411_vm1, %v4136_v56, %v2281_v49  ;;  %v2279_v55 = vmul.f32 %v3891_v17, %v2271_v52 }
0x1182   : > { %v2348_v1 = vsel %vm1420_vm2, %v2344_v39, 0.0  ;;  %v2345_v57 = vmul.f32 %v2341_v13, %v1756_v60 }
0x1183   : > { %v2349_v11 = vrot.slane %v2348_v1, 4  ;;  %v2342_v47 = vsel %vm1411_vm1, %v4141_v58, %v2282_v53  ;;  %v2283_v14 = vadd.f32 %v2279_v55, %v3900_v23 }
0x1184   : > { %v2346_v59 = vmul.f32 %v2342_v47, %v1756_v60  ;;  %v2355_v50 = vsel %vm1420_vm2, %v2345_v57, 0.0 }
0x1185   : > { %v2350_v16 = vadd.f32 %v2349_v11, %v2348_v1  ;;  %v2356_v0 = vrot.slane %v2355_v50, 4  ;;  %v2343_v56 = vsel %vm1411_vm1, %v4149_v38, %v2283_v14  ;;  %v2408_v1 = vrot.slane %v2404_v22, 3 }
0x1186   : > { %v2362_v62 = vsel %vm1420_vm2, %v2346_v59, 0.0  ;;  %v2347_v17 = vmul.f32 %v2343_v56, %v1756_v60 }
0x1187   : > { %v2363_v12 = vrot.slane %v2362_v62, 4  ;;  %v2351_v10 = vrot.slane %v2350_v16, 2  ;;  %v2357_v15 = vadd.f32 %v2356_v0, %v2355_v50 }
0x1188   : > { %v2369_v58 = vsel %vm1420_vm2, %v2347_v17, 0.0 }
0x1189   : > { %v2364_v46 = vadd.f32 %v2363_v12, %v2362_v62  ;;  %v2352_v19 = vadd.f32 %v2351_v10, %v2350_v16  ;;  %v2370_v23 = vrot.slane %v2369_v58, 4  ;;  %v2358_v21 = vrot.slane %v2357_v15, 2 }
0x118b   : > { %v2365_v18 = vrot.slane %v2364_v46, 2  ;;  %v2371_v28 = vadd.f32 %v2370_v23, %v2369_v58  ;;  %v2359_v33 = vadd.f32 %v2358_v21, %v2357_v15  ;;  %v2353_v61 = vrot.slane %v2352_v19, 1 }
0x118d   : > { %v2366_v25 = vadd.f32 %v2365_v18, %v2364_v46  ;;  %v2360_v38 = vrot.slane %v2359_v33, 1  ;;  %v2372_v26 = vrot.slane %v2371_v28, 2  ;;  %v2354_v48 = vadd.f32 %v2353_v61, %v2352_v19 }
0x118f   : > { %v2379_v36 = vpop.permute.xlu1 %2378  ;;  %v2367_v29 = vrot.slane %v2366_v25, 1  ;;  %v2373_v32 = vadd.f32 %v2372_v26, %v2371_v28  ;;  %v2361_v41 = vadd.f32 %v2360_v38, %v2359_v33 }
0x1190   : > { %v2381_v30 = vmul.f32 %v2379_v36, %v3833_v35 }
0x1191   : > { %v2368_v44 = vadd.f32 %v2367_v29, %v2366_v25  ;;  %v2374_v60 = vrot.slane %v2373_v32, 1  ;;  %v2420_v52 = vpop.permute.xlu0 %2419 }
0x1192   : > { %v2383_v40 = vrot.slane %v2381_v30, 1  ;;  %v2390_v27 = vadd.f32 %v2381_v30, %v2354_v48  ;;  %v2384_v42 = vrot.slane %v2381_v30, 2  ;;  %v2385_v45 = vrot.slane %v2381_v30, 3 }
0x1193   : > { %v2375_v20 = vadd.f32 %v2374_v60, %v2373_v32  ;;  %v3179_v30 = vmov 4   ;;  %v3180_v48 = vmov 6   ;;  %v3181_v32 = vmov 5  }
0x1194   : > { %v2429_v51 = vpop.permute.xlu1 %2428  ;;  %v2391_v39 = vadd.f32 %v2383_v40, %v2361_v41  ;;  %v2413_v49 = vmul.f32 %v2404_v22, %v2390_v27  ;;  %v2392_v53 = vadd.f32 %v2384_v42, %v2368_v44  ;;  %v2926_v41 = vld [vmem:[%s4363_s15 + $0x10] sm:$0xff]  ;;  %v2546_v44 = vld [vmem:[%s4363_s15] sm:$0xff]  ;;  %v3182_v40 = vmov 7  }
0x1195   : > { %v2393_v11 = vadd.f32 %v2385_v45, %v2375_v20  ;;  %v2801_v27 = vld [vmem:[%s4365_s17] sm:$0xff] }
0x1196   : > { %v2414_v13 = vmul.f32 %v2406_v43, %v2391_v39  ;;  %v2425_v35 = vrot.slane %v2413_v49, %v3354_v8  ;;  %v2415_v55 = vmul.f32 %v2407_v54, %v2392_v53  ;;  %v2449_v0 = vpop.permute.xlu0 %2448 }
0x1197   : > { %v2416_v59 = vmul.f32 %v2408_v1, %v2393_v11 }
0x1198   : > { %v2434_v57 = vrot.slane %v2414_v13, %v3354_v8  ;;  %v2444_v47 = vrot.slane %v2415_v55, %v3354_v8  ;;  %v2426_v16 = vmul.f32 %v2425_v35, %v2420_v52 }
0x1199   : > { %v2439_v14 = vpop.permute.xlu1 %2438  ;;  %v2454_v50 = vrot.slane %v2416_v59, %v3354_v8 }
0x119a   : > { %v2435_v63 = vmul.f32 %v2434_v57, %v2429_v51  ;;  %v2445_v56 = vmul.f32 %v2444_v47, %v2439_v14 }
0x119b   : > { %v2455_v17 = vmul.f32 %v2454_v50, %v2449_v0 }
0x119c   : > { %v2436_v62 = vadd.f32 %v2435_v63, %v2426_v16 }
0x119e   : > { %v2446_v12 = vadd.f32 %v2445_v56, %v2436_v62  ;;  %v2491_v37 = vpop.permute.xlu1 %2490  ;;  %v2614_v56 = vsub.s32 6, %v3348_v7 }
0x11a0   : > { %v4215_v10 = vadd.f32 %v2455_v17, %v2446_v12 }
0x11a2   : > { %2458 = vrot.lane.b32.xlu0 %v4215_v10, %s4409_s4 }
0x11a3   : > { %v2501_v15 = vpop.permute.xlu1 %2500 }
0x11a6   : > { %2523 = vperm.xlu0 %3037, %v4167_v6   ;;  %v2925_v6 = vld [vmem:[%s4363_s15 + $0x8] sm:$0xff] }
0x11a8   : > { %v2514_v46 = vpop.permute.xlu1 %2513 }
0x11ac   : > { %v2468_v58 = vpop.permute.xlu1 %2467 }
0x11b1   : > { %v2478_v18 = vpop.permute.xlu1 %2477 }
0x11b6   : > { %v2536_v60 = vpop.permute.xlu1 %2535 }
0x1214   : > { %v2459_v19 = vpop.permute.xlu0 %2458 }
0x1215   : > { %v2461_v23 = vsel %vm1342_vm3, 0.0, %v2459_v19  ;;  %v2624_v19 = vsub.s32 7, %v3348_v7 }
0x1216   : > { %v2463_v21 = vsel %vm2462_vm8, %v2461_v23, 0.0 }
0x1217   : > { %v2473_v24 = vrot.slane %v2463_v21, %v3354_v8  ;;  %v2483_v28 = vrot.slane %v2463_v21, %v3357_v9 }
0x1219   : > { %v2493_v33 = vmul.f32 %v2491_v37, %v2473_v24  ;;  %v2516_v61 = vmul.f32 %v2514_v46, %v2473_v24  ;;  %v2484_v25 = vmul.f32 %v2483_v28, %v2478_v18  ;;  %v2474_v38 = vmul.f32 %v2473_v24, %v2468_v58 }
0x121a   : > { %v2503_v22 = vmul.f32 %v2501_v15, %v2483_v28 }
0x121b   : > { %2518 = vrot.lane.b32.xlu1 %v2516_v61, %s4408_s27  ;;  %2495 = vrot.lane.b32.xlu0 %v2493_v33, %s4407_s28  ;;  %v2485_v26 = vadd.f32 %v2484_v25, %v2474_v38 }
0x121f   : > { %2632 = vperm.xlu1 %3039, %v2925_v6   ;;  %2505 = vrot.lane.b32.xlu0 %v2503_v22, %s4407_s28  ;;  %v2794_v22 = vld [vmem:[%s4364_s16] sm:$0xff] }
0x1223   : > { %3041 = vset.pattern.permute.xlu1 %v3172_v5 }
0x1224   : > { %2662 = vperm.xlu1 %3041, %v2925_v6  }
0x1225   : > { %v2524_v36 = vpop.permute.xlu0 %2523 }
0x1226   : > { %v2526_v29 = vmul.f32 %v2524_v36, %v2483_v28 }
0x1228   : > { %2528 = vrot.lane.b32.xlu0 %v2526_v29, %s4408_s27  ;;  %3042 = vset.pattern.permute.xlu1 %v3179_v30 }
0x1229   : > { %2672 = vperm.xlu1 %3042, %v2925_v6  }
0x122c   : > { %2642 = vperm.xlu0 %3037, %v2925_v6  }
0x122d   : > { %3044 = vset.pattern.permute.xlu1 %v3180_v48 }
0x1230   : > { %3040 = vset.pattern.permute.xlu0 %v3171_v4 }
0x1231   : > { %2652 = vperm.xlu0 %3040, %v2925_v6  }
0x1235   : > { %3043 = vset.pattern.permute.xlu0 %v3181_v32 }
0x1236   : > { %2682 = vperm.xlu0 %3043, %v2925_v6  }
0x123a   : > { %3046 = vset.pattern.permute.xlu0 %v3169_v2 }
0x123b   : > { %2715 = vperm.xlu0 %3046, %v2926_v41  }
0x123f   : > { %3049 = vset.pattern.permute.xlu0 %v3172_v5 }
0x1240   : > { %2745 = vperm.xlu0 %3049, %v2926_v41  }
0x1244   : > { %3052 = vset.pattern.permute.xlu0 %v3180_v48 }
0x1245   : > { %2775 = vperm.xlu0 %3052, %v2926_v41  }
0x1249   : > { %3055 = vset.pattern.permute.xlu0 %v3170_v3 }
0x124a   : > { %2559 = vperm.xlu0 %3055, %v2546_v44  }
0x124e   : > { %3058 = vset.pattern.permute.xlu0 %v3179_v30 }
0x124f   : > { %2589 = vperm.xlu0 %3058, %v2546_v44  }
0x1253   : > { %3061 = vset.pattern.permute.xlu0 %v3182_v40 }
0x1254   : > { %2619 = vperm.xlu0 %3061, %v2546_v44  }
0x1258   : > { %3063 = vset.pattern.permute.xlu0 %v3170_v3 }
0x1259   : > { %2813 = vperm.xlu0 %3063, %v2801_v27  }
0x125d   : > { %3064 = vset.pattern.permute.xlu0 %v3169_v2 }
0x128d   : > { %v2496_v42 = vpop.permute.xlu0 %2495  ;;  %v2519_v51 = vpop.permute.xlu1 %2518 }
0x128e   : > { %v2498_v54 = vadd.f32 %v2496_v42, %v2485_v26 }
0x1291   : > { %v2506_v43 = vpop.permute.xlu0 %2505 }
0x1292   : > { %v2508_v45 = vadd.f32 %v2506_v43, %v2498_v54 }
0x1294   : > { %v2521_v39 = vadd.f32 %v2519_v51, %v2508_v45 }
0x129a   : > { %v2529_v49 = vpop.permute.xlu0 %2528 }
0x129b   : > { %v2531_v53 = vadd.f32 %v2529_v49, %v2521_v39 }
0x129d   : > { %v2538_v20 = vadd.f32 %v2536_v60, %v2531_v53 }
0x129f   : > { %v2539_v52 = vmax.f32 %v2538_v20, 0.0 }
0x12a1   : > { %2541 = vrot.lane.b32.xlu1 %v2539_v52, %s4409_s4 }
0x12a5   : > { %2692 = vperm.xlu1 %3044, %v2925_v6  }
0x12a9   : > { %3045 = vset.pattern.permute.xlu1 %v3182_v40 }
0x12aa   : > { %2702 = vperm.xlu1 %3045, %v2925_v6  }
0x12ab   : > { %v2643_v35 = vpop.permute.xlu0 %2642 }
0x12ae   : > { %3047 = vset.pattern.permute.xlu1 %v3170_v3  ;;  %v2633_v3 = vpop.permute.xlu1 %2632 }
0x12af   : > { %2725 = vperm.xlu1 %3047, %v2926_v41  }
0x12b0   : > { %v2653_v59 = vpop.permute.xlu0 %2652 }
0x12b2   : > { %v2663_v1 = vpop.permute.xlu1 %2662 }
0x12b3   : > { %3048 = vset.pattern.permute.xlu1 %v3171_v4 }
0x12b4   : > { %2735 = vperm.xlu1 %3048, %v2926_v41  }
0x12b5   : > { %v2683_v37 = vpop.permute.xlu0 %2682 }
0x12b6   : > { %v2673_v13 = vpop.permute.xlu1 %2672 }
0x12b8   : > { %3050 = vset.pattern.permute.xlu1 %v3179_v30 }
0x12b9   : > { %2755 = vperm.xlu1 %3050, %v2926_v41  }
0x12bd   : > { %3051 = vset.pattern.permute.xlu1 %v3181_v32 }
0x12be   : > { %2765 = vperm.xlu1 %3051, %v2926_v41  }
0x12c2   : > { %3053 = vset.pattern.permute.xlu1 %v3182_v40 }
0x12c3   : > { %2785 = vperm.xlu1 %3053, %v2926_v41  }
0x12c7   : > { %3054 = vset.pattern.permute.xlu1 %v3169_v2 }
0x12c8   : > { %2549 = vperm.xlu1 %3054, %v2546_v44  }
0x12cc   : > { %3056 = vset.pattern.permute.xlu1 %v3171_v4  ;;  %v2594_v4 = vsub.s32 4, %v3348_v7 }
0x12cd   : > { %2569 = vperm.xlu1 %3056, %v2546_v44  }
0x12d1   : > { %3057 = vset.pattern.permute.xlu1 %v3172_v5 }
0x12d2   : > { %2579 = vperm.xlu1 %3057, %v2546_v44  }
0x12d6   : > { %3059 = vset.pattern.permute.xlu1 %v3181_v32 }
0x12d7   : > { %2599 = vperm.xlu1 %3059, %v2546_v44  }
0x12db   : > { %3060 = vset.pattern.permute.xlu1 %v3180_v48 }
0x12dc   : > { %2609 = vperm.xlu1 %3060, %v2546_v44  }
0x12e0   : > { %3062 = vset.pattern.permute.xlu1 %v3169_v2 }
0x12e1   : > { %2804 = vperm.xlu1 %3062, %v2801_v27  }
0x1313   : > { %v2542_v55 = vpop.permute.xlu1 %2541 }
0x1314   : > { %v2544_v11 = vsel %vm1342_vm3, 0.0, %v2542_v55 }
0x1315   : > { %v2545_v57 = vsel %vm2462_vm8, %v2544_v11, 0.0 }
0x1316   : > { %v2555_v5 = vrot.slane %v2545_v57, %v3354_v8  ;;  %v4259_v47 = vrot.slane %v2545_v57, %v3389_v31  ;;  %v2565_v63 = vrot.slane %v2545_v57, %v3357_v9  ;;  %v4263_v16 = vrot.slane %v2545_v57, %v2594_v4 }
0x1317   : > { %v2585_v62 = vrot.slane %v2545_v57, %v3397_v34  ;;  %v2604_v31 = vsub.s32 5, %v3348_v7  ;;  %v2615_v15 = vrot.slane %v2545_v57, %v2614_v56  ;;  %v2716_v34 = vpop.permute.xlu0 %2715  ;;  %v2625_v21 = vrot.slane %v2545_v57, %v2624_v19  ;;  %v2822_v7 = vld [vmem:[%s4366_s18] sm:$0xff] }
0x1318   : > { %v2635_v14 = vmul.f32 %v2633_v3, %v2555_v5  ;;  %v2655_v2 = vmul.f32 %v2653_v59, %v4259_v47  ;;  %v2645_v50 = vmul.f32 %v2643_v35, %v2565_v63  ;;  %v2675_v0 = vmul.f32 %v2673_v13, %v4263_v16 }
0x1319   : > { %v2665_v12 = vmul.f32 %v2663_v1, %v2585_v62  ;;  %v2605_v17 = vrot.slane %v2545_v57, %v2604_v31  ;;  %v2718_v24 = vmul.f32 %v2716_v34, %v2555_v5 }
0x131a   : > { %2637 = vrot.lane.b32.xlu1 %v2635_v14, %s4407_s28  ;;  %2657 = vrot.lane.b32.xlu0 %v2655_v2, %s4407_s28 }
0x131b   : > { %v2685_v58 = vmul.f32 %v2683_v37, %v2605_v17  ;;  %v2746_v6 = vpop.permute.xlu0 %2745 }
0x131c   : > { %v2748_v26 = vmul.f32 %v2746_v6, %v2585_v62 }
0x131e   : > { %2647 = vrot.lane.b32.xlu1 %v2645_v50, %s4407_s28  ;;  %2677 = vrot.lane.b32.xlu0 %v2675_v0, %s4407_s28 }
0x131f   : > { %v2776_v29 = vpop.permute.xlu0 %2775 }
0x1320   : > { %v2778_v48 = vmul.f32 %v2776_v29, %v2615_v15 }
0x1322   : > { %2667 = vrot.lane.b32.xlu1 %v2665_v12, %s4407_s28 }
0x1323   : > { %v2560_v27 = vpop.permute.xlu0 %2559 }
0x1324   : > { %v2693_v46 = vpop.permute.xlu1 %2692  ;;  %v2566_v43 = vmul.f32 %v2565_v63, %v2560_v27 }
0x1325   : > { %v2695_v23 = vmul.f32 %v2693_v46, %v2615_v15 }
0x1326   : > { %2687 = vrot.lane.b32.xlu1 %v2685_v58, %s4407_s28 }
0x1327   : > { %2697 = vrot.lane.b32.xlu0 %v2695_v23, %s4407_s28  ;;  %v2590_v20 = vpop.permute.xlu0 %2589 }
0x1328   : > { %v2596_v3 = vmul.f32 %v4263_v16, %v2590_v20 }
0x1329   : > { %v2703_v18 = vpop.permute.xlu1 %2702 }
0x132a   : > { %v2705_v28 = vmul.f32 %v2703_v18, %v2625_v21 }
0x132b   : > { %2720 = vrot.lane.b32.xlu0 %v2718_v24, %s4408_s27  ;;  %v2620_v57 = vpop.permute.xlu0 %2619 }
0x132c   : > { %2707 = vrot.lane.b32.xlu1 %v2705_v28, %s4407_s28  ;;  %v2626_v59 = vmul.f32 %v2625_v21, %v2620_v57  ;;  %s591_s28 = sand.u32 1, %s3159_s30  }
0x132d   : > { %s2833_s24 = scalar_lea.sflag [#allocation3], %s591_s28 }
0x132e   : > { %v2726_v33 = vpop.permute.xlu1 %2725 }
0x132f   : > { %v2728_v61 = vmul.f32 %v2726_v33, %v2565_v63  ;;  %v2814_v0 = vpop.permute.xlu0 %2813 }
0x1331   : > { %2730 = vrot.lane.b32.xlu1 %v2728_v61, %s4408_s27 }
0x1333   : > { %v2736_v25 = vpop.permute.xlu1 %2735 }
0x1334   : > { %v2738_v38 = vmul.f32 %v2736_v25, %v4259_v47 }
0x1335   : > { %2825 = vperm.xlu1 %3062, %v2822_v7  }
0x1336   : > { %2740 = vrot.lane.b32.xlu0 %v2738_v38, %s4408_s27 }
0x1338   : > { %v2756_v36 = vpop.permute.xlu1 %2755 }
0x1339   : > { %2750 = vrot.lane.b32.xlu1 %v2748_v26, %s4408_s27  ;;  %v2758_v30 = vmul.f32 %v2756_v36, %v4263_v16 }
0x133a   : > { %2797 = vperm.xlu0 %3064, %v2794_v22   ;;  %v2810_v22 = vrot.slane %v4215_v10, %v3354_v8 }
0x133d   : > { %v2766_v32 = vpop.permute.xlu1 %2765  ;;  %2760 = vrot.lane.b32.xlu1 %v2758_v30, %s4408_s27  ;;  %v2819_v30 = vrot.slane %v4215_v10, %v3357_v9 }
0x133e   : > { %v2768_v41 = vmul.f32 %v2766_v32, %v2605_v17  ;;  %2780 = vrot.lane.b32.xlu0 %v2778_v48, %s4408_s27 }
0x1341   : > { %2770 = vrot.lane.b32.xlu1 %v2768_v41, %s4408_s27 }
0x1342   : > { %v2786_v44 = vpop.permute.xlu1 %2785 }
0x1343   : > { %v2788_v40 = vmul.f32 %v2786_v44, %v2625_v21  ;;  %v2820_v44 = vmul.f32 %v2819_v30, %v2814_v0 }
0x1345   : > { %2790 = vrot.lane.b32.xlu1 %v2788_v40, %s4408_s27  ;;  %s2909_s27 = sshll.u32 %s591_s28, 3 }
0x1346   : > { %s593_s5 = scalar_lea.vmem [#allocation2], %s2909_s27  ;;  %s3109_s27 = sshll.u32 %s3183_s1, 4  ;;  %s3110_s27 = int_to_ptr.vmem [resolvable:$false] %s3109_s27 }
0x1347   : > { %v2550_v42 = vpop.permute.xlu1 %2549  ;;  %s2846_s20 = sshll.u32 %s593_s5, 4  ;;  %s3111_s7 = scalar_lea.vmem %s3110_s27, 256  ;;  %s4307_s20 = int_to_ptr.vmem [resolvable:$true] %s2846_s20 }
0x1348   : > { %v2556_v60 = vmul.f32 %v2555_v5, %v2550_v42  ;;  %s3105_s6 = scalar_lea.vmem %s4307_s20, 128  ;;  %p3112_p0 = scmp.lt.s32.totalorder %s4307_s20, %s3110_s27 }
0x1349   : > { %p3106_p11 = scmp.ne.s32.totalorder %s4307_s20, %s3105_s6  ;;  %p3113_p1 = scmp.lt.s32.totalorder %s3111_s7, %s3105_s6 }
0x134a   : > { %v2567_v54 = vadd.f32 %v2566_v43, %v2556_v60 }
0x134b   : > { %p3107_p12 = pnand %p3106_p11, %p3322_p5  ;;  %p3114_p2 = por %p3113_p1, %p3112_p0 }
0x134c   : > { %v2570_v45 = vpop.permute.xlu1 %2569 }
0x134d   : > { %v2576_v51 = vmul.f32 %v4259_v47, %v2570_v45  ;;  %p3108_p13 = pneg %p3107_p12 }
0x134f   : > { %v2577_v39 = vadd.f32 %v2576_v51, %v2567_v54  ;;  %p3115_p3 = pnand %p3114_p2, %p3108_p13 }
0x1351   : > { %v2580_v49 = vpop.permute.xlu1 %2579 }
0x1352   : > { %v2586_v53 = vmul.f32 %v2585_v62, %v2580_v49 }
0x1354   : > { %v2587_v52 = vadd.f32 %v2586_v53, %v2577_v39 }
0x1356   : > { %v2600_v1 = vpop.permute.xlu1 %2599  ;;  %v2597_v13 = vadd.f32 %v2596_v3, %v2587_v52 }
0x1357   : > { %v2606_v35 = vmul.f32 %v2605_v17, %v2600_v1 }
0x1359   : > { %v2607_v55 = vadd.f32 %v2606_v35, %v2597_v13 }
0x135b   : > { %v2610_v11 = vpop.permute.xlu1 %2609 }
0x135c   : > { %v2616_v4 = vmul.f32 %v2615_v15, %v2610_v11 }
0x135e   : > { %v2617_v5 = vadd.f32 %v2616_v4, %v2607_v55 }
0x1360   : > { %v2627_v14 = vadd.f32 %v2626_v59, %v2617_v5  ;;  %v2805_v2 = vpop.permute.xlu1 %2804 }
0x1361   : > { %v2811_v48 = vmul.f32 %v2810_v22, %v2805_v2 }
0x1363   : > { %v2821_v42 = vadd.f32 %v2820_v44, %v2811_v48 }
0x138c   : > { %v2638_v63 = vpop.permute.xlu1 %2637  ;;  %v2658_v31 = vpop.permute.xlu0 %2657 }
0x138d   : > { %v2640_v50 = vadd.f32 %v2638_v63, %v2627_v14 }
0x1390   : > { %v2648_v47 = vpop.permute.xlu1 %2647  ;;  %v2678_v37 = vpop.permute.xlu0 %2677 }
0x1391   : > { %v2650_v62 = vadd.f32 %v2648_v47, %v2640_v50 }
0x1393   : > { %v2660_v56 = vadd.f32 %v2658_v31, %v2650_v62 }
0x1394   : > { %v2668_v12 = vpop.permute.xlu1 %2667 }
0x1395   : > { %v2670_v16 = vadd.f32 %v2668_v12, %v2660_v56 }
0x1397   : > { %v2680_v17 = vadd.f32 %v2678_v37, %v2670_v16 }
0x1398   : > { %v2688_v46 = vpop.permute.xlu1 %2687 }
0x1399   : > { %v2690_v19 = vadd.f32 %v2688_v46, %v2680_v17  ;;  %v2698_v15 = vpop.permute.xlu0 %2697 }
0x139b   : > { %v2700_v23 = vadd.f32 %v2698_v15, %v2690_v19 }
0x139d   : > { %v2721_v18 = vpop.permute.xlu0 %2720 }
0x139e   : > { %v2708_v58 = vpop.permute.xlu1 %2707 }
0x139f   : > { %v2710_v21 = vadd.f32 %v2708_v58, %v2700_v23 }
0x13a1   : > { %v2723_v28 = vadd.f32 %v2721_v18, %v2710_v21 }
0x13a3   : > { %v2731_v34 = vpop.permute.xlu1 %2730 }
0x13a4   : > { %v2733_v7 = vadd.f32 %v2731_v34, %v2723_v28 }
0x13a8   : > { %v2741_v33 = vpop.permute.xlu0 %2740 }
0x13a9   : > { %v2743_v25 = vadd.f32 %v2741_v33, %v2733_v7 }
0x13b4   : > { %v2826_v24 = vpop.permute.xlu1 %2825 }
0x13b5   : > { %v2828_v43 = vadd.f32 %v2826_v24, %v2821_v42 }
0x13b8   : > { %v2751_v61 = vpop.permute.xlu1 %2750 }
0x13b9   : > { %v2798_v38 = vpop.permute.xlu0 %2797  ;;  %v2753_v26 = vadd.f32 %v2751_v61, %v2743_v25 }
0x13bc   : > { %v2761_v6 = vpop.permute.xlu1 %2760 }
0x13bd   : > { %v2763_v36 = vadd.f32 %v2761_v6, %v2753_v26  ;;  %v2781_v41 = vpop.permute.xlu0 %2780 }
0x13c0   : > { %v2771_v29 = vpop.permute.xlu1 %2770 }
0x13c1   : > { %v2773_v32 = vadd.f32 %v2771_v29, %v2763_v36 }
0x13c3   : > { %v2783_v40 = vadd.f32 %v2781_v41, %v2773_v32 }
0x13c4   : > { %v2791_v27 = vpop.permute.xlu1 %2790 }
0x13c5   : > { %v2793_v60 = vadd.f32 %v2791_v27, %v2783_v40 }
0x13c7   : > { %v2800_v54 = vadd.f32 %v2798_v38, %v2793_v60 }
0x13c9   : > { %v2829_v8 = vadd.f32 %v2828_v43, %v2800_v54 }
0x13cb   : > { %v2830_v45 = vmax.f32 %v2829_v8, 0.0 }
0x13cd   : > { %2831 = vst.msk [vmem:[%s593_s5] sm:$0xff] %vm1420_vm2, %v2830_v45 }
0x13ce   : > { %3118 = shalt.err (!%p3115_p3)
}
0x13cf   : > { %s3119_s28 = scalar_lea.hbm %s4305_s25, 128  ;;  %s3123_s4 = scalar_lea.hbm %s4367_s19, 256 }
0x13d0   : > { %p3120_p4 = scmp.ne.s32.totalorder %s4305_s25, %s3119_s28  ;;  %p3124_p9 = scmp.lt.u32.totalorder %s4305_s25, %s4367_s19 }
0x13d1   : > { %p3125_p10 = scmp.lt.u32.totalorder %s3123_s4, %s3119_s28  ;;  %p3127_p12 = scmp.lt.u32.totalorder %s3119_s28, %s4305_s25 }
0x13d2   : > { %p3121_p7 = pnand %p3120_p4, %p3322_p5 }
0x13d3   : > { %p3126_p11 = por %p3125_p10, %p3124_p9 }
0x13d4   : > { %p3122_p8 = pneg %p3121_p7 }
0x13d5   : > { %p3128_p13 = por %p3127_p12, %p3126_p11 }
0x13d7   : > { %p3129_p0 = pnand %p3128_p13, %p3122_p8 }
0x13d9   : > { %3132 = shalt.err (!%p3129_p0)
}
0x13da   : > { %2931 = dma.vmem_to_hbm [thread:$0]  (%p3322_p5), %s4307_s20, 128, %s4305_s25, %s2833_s24  }
0x13db PF: > { %p2937_p1 = scmp.ge.s32.totalorder %s3167_s21, 2  ;;  %s2858_s6 = sand.u32 1, %s3155_s0  }
0x13dc   : > { %s2859_s7 = scalar_lea.sflag [#allocation3], %s2858_s6 }
0x13dd   : > { %p2934_p2 = pnand %p2937_p1, %p3326_p6 }
0x13df   : > { %3150 = dma.done.wait (!%p2934_p2), %s2859_s7, 128  }
0x13e0   : > { %3152 = vsyncadd (!%p2934_p2), %s2859_s7, 4294967168  ;;  %s4414_s21 = sld [smem:[#allocation6_spill]]  ;;  %s4415_s27 = sld [smem:[#allocation5_spill]] }
0x13e1   : > { %s4416_s20 = sld [smem:[#allocation7_spill]]  ;;  %s4417_s0 = smov %s3159_s30 }
0x13e6   : > { %p29_p3 = scmp.ge.s32.totalorder %s4414_s21, 4   ;;  %s4418_s30 = smov %s4415_s27 }
0x13e8   :  { %31 = sbr.rel (!%p29_p3) target bundleno = 12 (0xc), region = 147 }
0x13ef   :  { %2864 = vsyncpa [#allocation3], 1 }
0x13f0   :  { %2866 = vsyncpa [#allocation3 + $0x1], 1 }

</bundles_post_ra>
